<compile_context>
chip_gen: v5e
topology: v5e:2x2
jax: 0.10.0
libtpu: 0.0.40
codegen_flags: <defaults>
</compile_context>

<pallas_src>
import numpy as np
import jax
import jax.numpy as jnp
from jax.experimental import pallas as pl
from jax.experimental.pallas import tpu as pltpu

NEG_SLOPE = 0.01  # nn.LeakyReLU default negative_slope


def _leaky(v):
    # max(v, a*v) == LeakyReLU(v) for 0 < a < 1 : 2 VPU ops instead of cmp+sel+mul
    return jnp.maximum(v, NEG_SLOPE * v)


# ----------------------------- Pallas kernel --------------------------------
def resattn_kernel(x_ref, w10_ref, w1r_ref, b1_ref, w2_ref, b2_ref,
                   w3_ref, b3_ref, wq_ref, bq_ref, gamma_ref, out_ref):
    # Per grid step (B images).  WC = W*C, WCm2 = 2*W*Cmid; query/key branches
    # are lane-stacked (factor 2):
    #   x_ref   : (B, H, WC)          f32   lane-dense images, lane = w*C + c
    #   w10_ref : (WC, WCm2)          bf16  conv1 of pair 0, column-stacked (x==x)
    #   w1r_ref : (2, 2*WC, WCm2)     bf16  conv1 of pairs 1,2 (block-diag)
    #   b1_ref  : (3, 1, WCm2)        f32
    #   w2_ref  : (3, 3*WCm2, WCm2)   bf16  conv2 (3x3) dy-tap banded weights
    #   b2_ref  : (3, 1, WCm2)        f32
    #   w3_ref  : (3, WCm2, 2*WC)     bf16  conv3 (1x1)
    #   b3_ref  : (3, 1, 2*WC)        f32
    #   wq_ref  : (WC, WC)            bf16  final 1x1 conv (query branch)
    #   bq_ref  : (1, WC)             f32
    #   gamma   : (1, 1)              f32   (SMEM scalar)
    #   out_ref : (B, H, WC)          f32
    B, H, WC = x_ref.shape
    M = B * H

    # Per-image boundary row masks for the 3x3 dy taps (hoisted out of j-loop).
    # After rolling the stacked (M = B*H) rows, the only rows that would mix
    # adjacent images are exactly the rows that must be zero (conv padding).
    row = jax.lax.broadcasted_iota(jnp.int32, (M, 1), 0) % H
    keep_dn = row != 0          # valid rows for tap b[h] = a[h-1]
    keep_up = row != (H - 1)    # valid rows for tap b[h] = a[h+1]

    def mm(a_bf16, w):          # bf16 MXU operands, f32 accumulation
        return jnp.dot(a_bf16, w, preferred_element_type=jnp.float32)

    def conv2_conv3(h1, j):
        # conv2 (3x3, pad=1): three dy row-taps fused into one matmul; the dx
        # taps + W-edge padding live in the banded weight.  Row shifts go on
        # the XLU via pltpu.roll; taps are assembled in bf16.
        h1b = h1.astype(jnp.bfloat16)
        dn = jnp.where(keep_dn, pltpu.roll(h1, 1, 0), 0.0).astype(jnp.bfloat16)
        up = jnp.where(keep_up, pltpu.roll(h1, M - 1, 0), 0.0).astype(jnp.bfloat16)
        taps = jnp.concatenate([dn, h1b, up], axis=-1)            # (M, 3*WCm2) bf16
        h2 = _leaky(mm(taps, w2_ref[j]) + b2_ref[j])              # (M, WCm2)  f32
        # conv3 (1x1) + LeakyReLU
        return _leaky(mm(h2.astype(jnp.bfloat16), w3_ref[j]) + b3_ref[j])  # (M, 2*WC)

    # ---- bottleneck pair 0: both lane-halves of s equal x, so conv1 uses the
    #      column-stacked (WC, WCm2) weight on x directly (K halved).
    xb = x_ref[...].reshape(M, WC).astype(jnp.bfloat16)
    h1 = _leaky(mm(xb, w10_ref[...]) + b1_ref[0])                 # (M, WCm2) f32
    h3 = conv2_conv3(h1, 0)
    x_f = x_ref[...].reshape(M, WC)                               # re-read (cheap vld)
    s = jnp.concatenate([x_f, x_f], axis=-1) + h3                 # (M, 2*WC) f32

    # ---- bottleneck pairs 1, 2 (query_j || key_j lane-stacked)
    for j in (1, 2):
        h1 = _leaky(mm(s.astype(jnp.bfloat16), w1r_ref[j - 1]) + b1_ref[j])
        s = s + conv2_conv3(h1, j)

    # final 1x1 conv + sigmoid on the query branch, gate the key branch
    q_lin = mm(s[:, :WC].astype(jnp.bfloat16), wq_ref[...]) + bq_ref[...]
    q = pl.reciprocal(1.0 + jnp.exp(-q_lin), approx=True)         # sigmoid (EUP)

    gamma = gamma_ref[0, 0]
    x_res = x_ref[...].reshape(M, WC)                             # re-read for residual
    out = x_res + gamma * (q * s[:, WC:])
    out_ref[...] = out.reshape(B, H, WC)


# ------------------------------- glue ---------------------------------------
def _resident(arr):
    """Whole-array VMEM-resident BlockSpec (constant index_map => no re-DMA)."""
    nd = arr.ndim
    return pl.BlockSpec(arr.shape, lambda b: (0,) * nd)


def _pick_block_batch(n, h, target_rows=256):
    """Images per grid step: enough rows to fill the MXU (M ~ 256) but keep the
    grid length >= 2 so v7x megacore can shard steps across both TensorCores."""
    if n < 2:
        return max(n, 1)
    b = max(1, min(n // 2, max(1, target_rows // h)))
    while n % b:
        b -= 1
    return b


@jax.jit
def resattn_pallas(x_lane, packed):
    """x_lane: (N, H, W*C) lane-dense activations (no NCHW transposes here)."""
    n, h, wc = x_lane.shape
    blk_b = _pick_block_batch(n, h)
    act_spec = pl.BlockSpec((blk_b, h, wc), lambda b: (b, 0, 0))

    return pl.pallas_call(
        resattn_kernel,
        out_shape=jax.ShapeDtypeStruct((n, h, wc), jnp.float32),
        grid=(n // blk_b,),
        in_specs=[
            act_spec,
            _resident(packed["w1_0"]), _resident(packed["w1_r"]),
            _resident(packed["b1"]),
            _resident(packed["w2"]), _resident(packed["b2"]),
            _resident(packed["w3"]), _resident(packed["b3"]),
            _resident(packed["wq"]), _resident(packed["bq"]),
            pl.BlockSpec(memory_space=pltpu.MemorySpace.SMEM),
        ],
        out_specs=act_spec,
        compiler_params=pltpu.CompilerParams(
            dimension_semantics=("parallel",),
            vmem_limit_bytes=32 * 1024 * 1024),
    )(x_lane, packed["w1_0"], packed["w1_r"], packed["b1"],
      packed["w2"], packed["b2"], packed["w3"], packed["b3"],
      packed["wq"], packed["bq"], packed["gamma"])


# ----------------------- host-side weight packing ----------------------------
def _block_diag(a, b):
    out = np.zeros((a.shape[0] + b.shape[0], a.shape[1] + b.shape[1]), np.float32)
    out[:a.shape[0], :a.shape[1]] = a
    out[a.shape[0]:, a.shape[1]:] = b
    return out


def _kron_eye(wmat, reps):
    # (cin, cout) -> (reps*cin, reps*cout) block-diagonal; block order matches the
    # (w, c) lane flattening of an (H, W, C) activation stored as (H, W*C).
    return np.kron(np.eye(reps, dtype=np.float32), wmat.astype(np.float32))


def _band_3x3(t2, width):
    # t2: torch conv weight (cout, cin, 3, 3).  Returns (3, width*cin, width*cout):
    # one banded block matrix per dy tap; the dx taps and the zero padding at the
    # left/right image edge are encoded in the band structure.
    cout, cin = t2.shape[0], t2.shape[1]
    out = np.zeros((3, width * cin, width * cout), np.float32)
    for dy in (-1, 0, 1):
        for w_out in range(width):
            for dx in (-1, 0, 1):
                w_in = w_out + dx
                if 0 <= w_in < width:
                    out[dy + 1,
                        w_in * cin:(w_in + 1) * cin,
                        w_out * cout:(w_out + 1) * cout] = t2[:, :, dy + 1, dx + 1].T
    return out


def pack_params(blocks, tq, bq, gamma, width):
    """Pack the 6 ResBottlenecks (query blocks 0-2 lane-stacked with key blocks
    3-5), the final 1x1 query conv and gamma into matmul-ready arrays for the
    (H, W*C) lane-dense layout.  Weights -> bf16, biases -> f32."""
    nb = [{k: np.asarray(v, np.float32) for k, v in blk.items()} for blk in blocks]
    c = nb[0]["t1"].shape[1]
    wc = width * c

    w1, b1, w2, b2, w3, b3 = [], [], [], [], [], []
    for j in range(3):
        qb, kb = nb[j], nb[j + 3]                 # query block j / key block j
        w1.append(_block_diag(_kron_eye(qb["t1"][:, :, 0, 0].T, width),
                              _kron_eye(kb["t1"][:, :, 0, 0].T, width)))
        b1.append(np.concatenate([np.tile(qb["c1b"], width), np.tile(kb["c1b"], width)]))
        bq3, bk3 = _band_3x3(qb["t2"], width), _band_3x3(kb["t2"], width)
        w2.append(np.concatenate([_block_diag(bq3[d], bk3[d]) for d in range(3)], axis=0))
        b2.append(np.concatenate([np.tile(qb["c2b"], width), np.tile(kb["c2b"], width)]))
        w3.append(_block_diag(_kron_eye(qb["t3"][:, :, 0, 0].T, width),
                              _kron_eye(kb["t3"][:, :, 0, 0].T, width)))
        b3.append(np.concatenate([np.tile(qb["c3b"], width), np.tile(kb["c3b"], width)]))

    # j=0 special case: at the first conv1 both lane-halves of the input equal x,
    # so fold the block-diagonal halves into one column-stacked (WC, 2*WCm) weight.
    w1_0 = w1[0][:wc, :] + w1[0][wc:, :]

    wq_bd = _kron_eye(np.asarray(tq, np.float32)[:, :, 0, 0].T, width)
    bq_row = np.tile(np.asarray(bq, np.float32), width)

    return dict(
        w1_0=jnp.asarray(w1_0, jnp.bfloat16),
        w1_r=jnp.asarray(np.stack(w1[1:]), jnp.bfloat16),
        b1=jnp.asarray(np.stack(b1)[:, None, :], jnp.float32),
        w2=jnp.asarray(np.stack(w2), jnp.bfloat16),
        b2=jnp.asarray(np.stack(b2)[:, None, :], jnp.float32),
        w3=jnp.asarray(np.stack(w3), jnp.bfloat16),
        b3=jnp.asarray(np.stack(b3)[:, None, :], jnp.float32),
        wq=jnp.asarray(wq_bd, jnp.bfloat16),
        bq=jnp.asarray(bq_row[None, :], jnp.float32),
        gamma=jnp.full((1, 1), gamma, jnp.float32),
    )


# -------------------- deterministic parameter construction ------------------
def init_params(key, c):
    cmid = c // 2
    keys = iter(jax.random.split(key, 40))

    def wgt(shape, fan_in):
        return jax.random.normal(next(keys), shape, jnp.float32) / np.sqrt(fan_in)

    def bias(shape):
        return 0.1 * jax.random.normal(next(keys), shape, jnp.float32)

    blocks = []
    for _ in range(6):  # 3 query-branch + 3 key-branch ResBottlenecks
        blocks.append(dict(
            t1=wgt((cmid, c, 1, 1), c), c1b=bias((cmid,)),
            t2=wgt((cmid, cmid, 3, 3), cmid * 9), c2b=bias((cmid,)),
            t3=wgt((c, cmid, 1, 1), cmid), c3b=bias((c,)),
        ))
    tq = wgt((c, c, 1, 1), c)
    bq = bias((c,))
    # module inits gamma to zeros(1); use a nonzero value so the attention path
    # is actually exercised (semantics for a given gamma are identical).
    gamma = jnp.float32(0.5)
    return blocks, tq, bq, gamma


# --------------------------- pure-JAX reference ------------------------------
def _conv2d_ref(x, w, b, pad):
    out = jax.lax.conv_general_dilated(
        x, w, window_strides=(1, 1), padding=pad,
        dimension_numbers=("NCHW", "OIHW", "NCHW"))
    return out + b[None, :, None, None]


def _bottleneck_ref(x, p):
    out = _leaky(_conv2d_ref(x, p["t1"], p["c1b"], [(0, 0), (0, 0)]))
    out = _leaky(_conv2d_ref(out, p["t2"], p["c2b"], [(1, 1), (1, 1)]))
    out = _leaky(_conv2d_ref(out, p["t3"], p["c3b"], [(0, 0), (0, 0)]))
    return out + x


def resattn_ref(x, blocks, tq, bq, gamma):
    q = x
    for i in range(3):
        q = _bottleneck_ref(q, blocks[i])
    q = jax.nn.sigmoid(_conv2d_ref(q, tq, bq, [(0, 0), (0, 0)]))
    k = x
    for i in range(3, 6):
        k = _bottleneck_ref(k, blocks[i])
    return x + gamma * (q * k)


# ----------------------------------- main ------------------------------------
if __name__ == "__main__":
    key = jax.random.PRNGKey(0)
    # inplanes = 8, Cmid = 4, W*C = 128 (lane-dense); N = 8 so the wrapper picks
    # B = 4 images per step (M = 64 matmul rows) with a length-2 grid (v7x megacore).
    N, C, H, W = 8, 8, 16, 16
    kx, kp = jax.random.split(key)

    x_nhwc = jax.random.normal(kx, (N, H, W, C), jnp.float32)
    x_lane = x_nhwc.reshape(N, H, W * C)          # kernel-native lane-dense layout

    blocks, tq, bq, gamma = init_params(kp, C)
    packed = pack_params(blocks, tq, bq, gamma, W)

    out_lane = jax.block_until_ready(resattn_pallas(x_lane, packed))

    # Reference check (layout conversion lives in the test harness only).
    x_nchw = jnp.transpose(x_nhwc, (0, 3, 1, 2))
    ref = resattn_ref(x_nchw, blocks, tq, bq, gamma)
    ref_lane = jnp.transpose(ref, (0, 2, 3, 1)).reshape(N, H, W * C)

    # bf16 MXU inputs (f32 accumulation) => looser tolerance than a pure-f32 run;
    # structural bugs (wrong tap/shift/pack/mask) would give O(1) errors, not 5e-2.
    np.testing.assert_allclose(np.asarray(out_lane), np.asarray(ref_lane),
                               rtol=5e-2, atol=5e-2)
    print("KERNEL_OK")
</pallas_src>

<mosaic_0001>
module attributes {stable_mosaic.version = 11 : i64} {
  func.func @resattn_kernel(%arg0: i32, %arg1: memref<4x16x128xf32, #tpu.memory_space<vmem>>, %arg2: memref<128x128xbf16, #tpu.memory_space<vmem>>, %arg3: memref<2x256x128xbf16, #tpu.memory_space<vmem>>, %arg4: memref<3x1x128xf32, #tpu.memory_space<vmem>>, %arg5: memref<3x384x128xbf16, #tpu.memory_space<vmem>>, %arg6: memref<3x1x128xf32, #tpu.memory_space<vmem>>, %arg7: memref<3x128x256xbf16, #tpu.memory_space<vmem>>, %arg8: memref<3x1x256xf32, #tpu.memory_space<vmem>>, %arg9: memref<128x128xbf16, #tpu.memory_space<vmem>>, %arg10: memref<1x128xf32, #tpu.memory_space<vmem>>, %arg11: memref<1x1xf32, #tpu.memory_space<smem>>, %arg12: memref<4x16x128xf32, #tpu.memory_space<vmem>>) attributes {dimension_semantics = [#tpu.dimension_semantics<parallel>], iteration_bounds = array<i64: 2>, scalar_prefetch = 0 : i64, scratch_operands = 0 : i64, tpu.core_type = #tpu.core_type<tc>, window_params = [{transform_indices = @transform_0, window_bounds = array<i64: 4, 16, 128>}, {pipeline_mode = #tpu.pipeline_mode<synchronous>, transform_indices = @transform_1, window_bounds = array<i64: 128, 128>}, {pipeline_mode = #tpu.pipeline_mode<synchronous>, transform_indices = @transform_2, window_bounds = array<i64: 2, 256, 128>}, {pipeline_mode = #tpu.pipeline_mode<synchronous>, transform_indices = @transform_3, window_bounds = array<i64: 3, 1, 128>}, {pipeline_mode = #tpu.pipeline_mode<synchronous>, transform_indices = @transform_4, window_bounds = array<i64: 3, 384, 128>}, {pipeline_mode = #tpu.pipeline_mode<synchronous>, transform_indices = @transform_5, window_bounds = array<i64: 3, 1, 128>}, {pipeline_mode = #tpu.pipeline_mode<synchronous>, transform_indices = @transform_6, window_bounds = array<i64: 3, 128, 256>}, {pipeline_mode = #tpu.pipeline_mode<synchronous>, transform_indices = @transform_7, window_bounds = array<i64: 3, 1, 256>}, {pipeline_mode = #tpu.pipeline_mode<synchronous>, transform_indices = @transform_8, window_bounds = array<i64: 128, 128>}, {pipeline_mode = #tpu.pipeline_mode<synchronous>, transform_indices = @transform_9, window_bounds = array<i64: 1, 128>}, {transform_indices = @transform_10, window_bounds = array<i64: 1, 1>}, {transform_indices = @transform_11, window_bounds = array<i64: 4, 16, 128>}]} {
    %0 = tpu.iota {dimensions = array<i32: 0>} : vector<64x1xi32>
    %c16_i32 = arith.constant 16 : i32
    %c0_i32 = arith.constant 0 : i32
    %1 = arith.cmpi eq, %c16_i32, %c0_i32 : i32
    %c1_i32 = arith.constant 1 : i32
    %2 = arith.select %1, %c1_i32, %c16_i32 : i32
    %3 = vector.broadcast %2 : i32 to vector<64x1xi32>
    %4 = arith.remsi %0, %3 : vector<64x1xi32>
    %c0_i32_0 = arith.constant 0 : i32
    %5 = vector.broadcast %c0_i32_0 : i32 to vector<64x1xi32>
    %6 = arith.cmpi ne, %4, %5 : vector<64x1xi32>
    %c0_i32_1 = arith.constant 0 : i32
    %7 = vector.broadcast %c0_i32_1 : i32 to vector<64x1xi32>
    %8 = arith.cmpi slt, %4, %7 : vector<64x1xi32>
    %c0_i32_2 = arith.constant 0 : i32
    %9 = arith.cmpi slt, %2, %c0_i32_2 : i32
    %10 = vector.broadcast %9 : i1 to vector<64x1xi1>
    %11 = vector.broadcast %10 : vector<64x1xi1> to vector<64x1xi1>
    %12 = arith.xori %8, %11 : vector<64x1xi1>
    %13 = arith.andi %12, %6 : vector<64x1xi1>
    %14 = vector.broadcast %2 : i32 to vector<64x1xi32>
    %15 = arith.addi %4, %14 : vector<64x1xi32>
    %16 = arith.select %13, %15, %4 : vector<64x1xi1>, vector<64x1xi32>
    %c0_i32_3 = arith.constant 0 : i32
    %17 = vector.broadcast %c0_i32_3 : i32 to vector<64x1xi32>
    %18 = arith.cmpi ne, %16, %17 : vector<64x1xi32>
    %c15_i32 = arith.constant 15 : i32
    %19 = vector.broadcast %c15_i32 : i32 to vector<64x1xi32>
    %20 = arith.cmpi ne, %16, %19 : vector<64x1xi32>
    %c0 = arith.constant 0 : index
    %c0_4 = arith.constant 0 : index
    %c0_5 = arith.constant 0 : index
    %21 = vector.load %arg1[%c0, %c0_4, %c0_5] : memref<4x16x128xf32, #tpu.memory_space<vmem>>, vector<4x16x128xf32>
    %22 = vector.shape_cast %21 : vector<4x16x128xf32> to vector<64x128xf32>
    %23 = arith.truncf %22 : vector<64x128xf32> to vector<64x128xbf16>
    %c0_6 = arith.constant 0 : index
    %c0_7 = arith.constant 0 : index
    %24 = vector.load %arg2[%c0_6, %c0_7] : memref<128x128xbf16, #tpu.memory_space<vmem>>, vector<128x128xbf16>
    %cst = arith.constant dense<0.000000e+00> : vector<64x128xf32>
    %25 = tpu.matmul %23, %24, %cst {dimension_numbers = #tpu.dot_dimension_numbers<[1], [0], [0], [1], [0, 0, 1, 1], [], []>} : vector<64x128xbf16>, vector<128x128xbf16>, vector<64x128xf32> -> vector<64x128xf32>
    %c0_8 = arith.constant 0 : index
    %c0_9 = arith.constant 0 : index
    %c0_10 = arith.constant 0 : index
    %26 = vector.load %arg4[%c0_8, %c0_9, %c0_10] : memref<3x1x128xf32, #tpu.memory_space<vmem>>, vector<1x1x128xf32>
    %27 = vector.shape_cast %26 : vector<1x1x128xf32> to vector<1x128xf32>
    %28 = vector.broadcast %27 : vector<1x128xf32> to vector<64x128xf32>
    %29 = arith.addf %25, %28 : vector<64x128xf32>
    %cst_11 = arith.constant 0.00999999977 : f32
    %30 = vector.broadcast %cst_11 : f32 to vector<64x128xf32>
    %31 = arith.mulf %30, %29 : vector<64x128xf32>
    %32 = arith.maximumf %29, %31 : vector<64x128xf32>
    %33 = arith.truncf %32 : vector<64x128xf32> to vector<64x128xbf16>
    %c1_i32_12 = arith.constant 1 : i32
    %34 = tpu.dynamic_rotate %32 by %c1_i32_12 dim 0 : vector<64x128xf32>, i32 -> vector<64x128xf32>
    %cst_13 = arith.constant 0.000000e+00 : f32
    %35 = vector.shape_cast %18 : vector<64x1xi1> to vector<64x1xi1>
    %36 = vector.broadcast %35 : vector<64x1xi1> to vector<64x128xi1>
    %37 = vector.broadcast %cst_13 : f32 to vector<64x128xf32>
    %38 = arith.select %36, %34, %37 : vector<64x128xi1>, vector<64x128xf32>
    %39 = arith.truncf %38 : vector<64x128xf32> to vector<64x128xbf16>
    %c63_i32 = arith.constant 63 : i32
    %40 = tpu.dynamic_rotate %32 by %c63_i32 dim 0 : vector<64x128xf32>, i32 -> vector<64x128xf32>
    %cst_14 = arith.constant 0.000000e+00 : f32
    %41 = vector.shape_cast %20 : vector<64x1xi1> to vector<64x1xi1>
    %42 = vector.broadcast %41 : vector<64x1xi1> to vector<64x128xi1>
    %43 = vector.broadcast %cst_14 : f32 to vector<64x128xf32>
    %44 = arith.select %42, %40, %43 : vector<64x128xi1>, vector<64x128xf32>
    %45 = arith.truncf %44 : vector<64x128xf32> to vector<64x128xbf16>
    %46 = tpu.concatenate %39, %33, %45 in 1 : vector<64x128xbf16>, vector<64x128xbf16>, vector<64x128xbf16> -> vector<64x384xbf16>
    %c0_15 = arith.constant 0 : index
    %c0_16 = arith.constant 0 : index
    %c0_17 = arith.constant 0 : index
    %47 = vector.load %arg5[%c0_15, %c0_16, %c0_17] : memref<3x384x128xbf16, #tpu.memory_space<vmem>>, vector<1x384x128xbf16>
    %48 = vector.shape_cast %47 : vector<1x384x128xbf16> to vector<384x128xbf16>
    %cst_18 = arith.constant dense<0.000000e+00> : vector<64x128xf32>
    %49 = tpu.matmul %46, %48, %cst_18 {dimension_numbers = #tpu.dot_dimension_numbers<[1], [0], [0], [1], [0, 0, 1, 1], [], []>} : vector<64x384xbf16>, vector<384x128xbf16>, vector<64x128xf32> -> vector<64x128xf32>
    %c0_19 = arith.constant 0 : index
    %c0_20 = arith.constant 0 : index
    %c0_21 = arith.constant 0 : index
    %50 = vector.load %arg6[%c0_19, %c0_20, %c0_21] : memref<3x1x128xf32, #tpu.memory_space<vmem>>, vector<1x1x128xf32>
    %51 = vector.shape_cast %50 : vector<1x1x128xf32> to vector<1x128xf32>
    %52 = vector.broadcast %51 : vector<1x128xf32> to vector<64x128xf32>
    %53 = arith.addf %49, %52 : vector<64x128xf32>
    %cst_22 = arith.constant 0.00999999977 : f32
    %54 = vector.broadcast %cst_22 : f32 to vector<64x128xf32>
    %55 = arith.mulf %54, %53 : vector<64x128xf32>
    %56 = arith.maximumf %53, %55 : vector<64x128xf32>
    %57 = arith.truncf %56 : vector<64x128xf32> to vector<64x128xbf16>
    %c0_23 = arith.constant 0 : index
    %c0_24 = arith.constant 0 : index
    %c0_25 = arith.constant 0 : index
    %58 = vector.load %arg7[%c0_23, %c0_24, %c0_25] : memref<3x128x256xbf16, #tpu.memory_space<vmem>>, vector<1x128x256xbf16>
    %59 = vector.shape_cast %58 : vector<1x128x256xbf16> to vector<128x256xbf16>
    %cst_26 = arith.constant dense<0.000000e+00> : vector<64x256xf32>
    %60 = tpu.matmul %57, %59, %cst_26 {dimension_numbers = #tpu.dot_dimension_numbers<[1], [0], [0], [1], [0, 0, 1, 1], [], []>} : vector<64x128xbf16>, vector<128x256xbf16>, vector<64x256xf32> -> vector<64x256xf32>
    %c0_27 = arith.constant 0 : index
    %c0_28 = arith.constant 0 : index
    %c0_29 = arith.constant 0 : index
    %61 = vector.load %arg8[%c0_27, %c0_28, %c0_29] : memref<3x1x256xf32, #tpu.memory_space<vmem>>, vector<1x1x256xf32>
    %62 = vector.shape_cast %61 : vector<1x1x256xf32> to vector<1x256xf32>
    %63 = vector.broadcast %62 : vector<1x256xf32> to vector<64x256xf32>
    %64 = arith.addf %60, %63 : vector<64x256xf32>
    %cst_30 = arith.constant 0.00999999977 : f32
    %65 = vector.broadcast %cst_30 : f32 to vector<64x256xf32>
    %66 = arith.mulf %65, %64 : vector<64x256xf32>
    %67 = arith.maximumf %64, %66 : vector<64x256xf32>
    %c0_31 = arith.constant 0 : index
    %c0_32 = arith.constant 0 : index
    %c0_33 = arith.constant 0 : index
    %68 = vector.load %arg1[%c0_31, %c0_32, %c0_33] : memref<4x16x128xf32, #tpu.memory_space<vmem>>, vector<4x16x128xf32>
    %69 = vector.shape_cast %68 : vector<4x16x128xf32> to vector<64x128xf32>
    %70 = tpu.concatenate %69, %69 in 1 : vector<64x128xf32>, vector<64x128xf32> -> vector<64x256xf32>
    %71 = arith.addf %70, %67 : vector<64x256xf32>
    %72 = arith.truncf %71 : vector<64x256xf32> to vector<64x256xbf16>
    %c0_34 = arith.constant 0 : index
    %c0_35 = arith.constant 0 : index
    %c0_36 = arith.constant 0 : index
    %73 = vector.load %arg3[%c0_34, %c0_35, %c0_36] : memref<2x256x128xbf16, #tpu.memory_space<vmem>>, vector<1x256x128xbf16>
    %74 = vector.shape_cast %73 : vector<1x256x128xbf16> to vector<256x128xbf16>
    %cst_37 = arith.constant dense<0.000000e+00> : vector<64x128xf32>
    %75 = tpu.matmul %72, %74, %cst_37 {dimension_numbers = #tpu.dot_dimension_numbers<[1], [0], [0], [1], [0, 0, 1, 1], [], []>} : vector<64x256xbf16>, vector<256x128xbf16>, vector<64x128xf32> -> vector<64x128xf32>
    %c1 = arith.constant 1 : index
    %c0_38 = arith.constant 0 : index
    %c0_39 = arith.constant 0 : index
    %76 = vector.load %arg4[%c1, %c0_38, %c0_39] : memref<3x1x128xf32, #tpu.memory_space<vmem>>, vector<1x1x128xf32>
    %77 = vector.shape_cast %76 : vector<1x1x128xf32> to vector<1x128xf32>
    %78 = vector.broadcast %77 : vector<1x128xf32> to vector<64x128xf32>
    %79 = arith.addf %75, %78 : vector<64x128xf32>
    %cst_40 = arith.constant 0.00999999977 : f32
    %80 = vector.broadcast %cst_40 : f32 to vector<64x128xf32>
    %81 = arith.mulf %80, %79 : vector<64x128xf32>
    %82 = arith.maximumf %79, %81 : vector<64x128xf32>
    %83 = arith.truncf %82 : vector<64x128xf32> to vector<64x128xbf16>
    %c1_i32_41 = arith.constant 1 : i32
    %84 = tpu.dynamic_rotate %82 by %c1_i32_41 dim 0 : vector<64x128xf32>, i32 -> vector<64x128xf32>
    %cst_42 = arith.constant 0.000000e+00 : f32
    %85 = vector.shape_cast %18 : vector<64x1xi1> to vector<64x1xi1>
    %86 = vector.broadcast %85 : vector<64x1xi1> to vector<64x128xi1>
    %87 = vector.broadcast %cst_42 : f32 to vector<64x128xf32>
    %88 = arith.select %86, %84, %87 : vector<64x128xi1>, vector<64x128xf32>
    %89 = arith.truncf %88 : vector<64x128xf32> to vector<64x128xbf16>
    %c63_i32_43 = arith.constant 63 : i32
    %90 = tpu.dynamic_rotate %82 by %c63_i32_43 dim 0 : vector<64x128xf32>, i32 -> vector<64x128xf32>
    %cst_44 = arith.constant 0.000000e+00 : f32
    %91 = vector.shape_cast %20 : vector<64x1xi1> to vector<64x1xi1>
    %92 = vector.broadcast %91 : vector<64x1xi1> to vector<64x128xi1>
    %93 = vector.broadcast %cst_44 : f32 to vector<64x128xf32>
    %94 = arith.select %92, %90, %93 : vector<64x128xi1>, vector<64x128xf32>
    %95 = arith.truncf %94 : vector<64x128xf32> to vector<64x128xbf16>
    %96 = tpu.concatenate %89, %83, %95 in 1 : vector<64x128xbf16>, vector<64x128xbf16>, vector<64x128xbf16> -> vector<64x384xbf16>
    %c1_45 = arith.constant 1 : index
    %c0_46 = arith.constant 0 : index
    %c0_47 = arith.constant 0 : index
    %97 = vector.load %arg5[%c1_45, %c0_46, %c0_47] : memref<3x384x128xbf16, #tpu.memory_space<vmem>>, vector<1x384x128xbf16>
    %98 = vector.shape_cast %97 : vector<1x384x128xbf16> to vector<384x128xbf16>
    %cst_48 = arith.constant dense<0.000000e+00> : vector<64x128xf32>
    %99 = tpu.matmul %96, %98, %cst_48 {dimension_numbers = #tpu.dot_dimension_numbers<[1], [0], [0], [1], [0, 0, 1, 1], [], []>} : vector<64x384xbf16>, vector<384x128xbf16>, vector<64x128xf32> -> vector<64x128xf32>
    %c1_49 = arith.constant 1 : index
    %c0_50 = arith.constant 0 : index
    %c0_51 = arith.constant 0 : index
    %100 = vector.load %arg6[%c1_49, %c0_50, %c0_51] : memref<3x1x128xf32, #tpu.memory_space<vmem>>, vector<1x1x128xf32>
    %101 = vector.shape_cast %100 : vector<1x1x128xf32> to vector<1x128xf32>
    %102 = vector.broadcast %101 : vector<1x128xf32> to vector<64x128xf32>
    %103 = arith.addf %99, %102 : vector<64x128xf32>
    %cst_52 = arith.constant 0.00999999977 : f32
    %104 = vector.broadcast %cst_52 : f32 to vector<64x128xf32>
    %105 = arith.mulf %104, %103 : vector<64x128xf32>
    %106 = arith.maximumf %103, %105 : vector<64x128xf32>
    %107 = arith.truncf %106 : vector<64x128xf32> to vector<64x128xbf16>
    %c1_53 = arith.constant 1 : index
    %c0_54 = arith.constant 0 : index
    %c0_55 = arith.constant 0 : index
    %108 = vector.load %arg7[%c1_53, %c0_54, %c0_55] : memref<3x128x256xbf16, #tpu.memory_space<vmem>>, vector<1x128x256xbf16>
    %109 = vector.shape_cast %108 : vector<1x128x256xbf16> to vector<128x256xbf16>
    %cst_56 = arith.constant dense<0.000000e+00> : vector<64x256xf32>
    %110 = tpu.matmul %107, %109, %cst_56 {dimension_numbers = #tpu.dot_dimension_numbers<[1], [0], [0], [1], [0, 0, 1, 1], [], []>} : vector<64x128xbf16>, vector<128x256xbf16>, vector<64x256xf32> -> vector<64x256xf32>
    %c1_57 = arith.constant 1 : index
    %c0_58 = arith.constant 0 : index
    %c0_59 = arith.constant 0 : index
    %111 = vector.load %arg8[%c1_57, %c0_58, %c0_59] : memref<3x1x256xf32, #tpu.memory_space<vmem>>, vector<1x1x256xf32>
    %112 = vector.shape_cast %111 : vector<1x1x256xf32> to vector<1x256xf32>
    %113 = vector.broadcast %112 : vector<1x256xf32> to vector<64x256xf32>
    %114 = arith.addf %110, %113 : vector<64x256xf32>
    %cst_60 = arith.constant 0.00999999977 : f32
    %115 = vector.broadcast %cst_60 : f32 to vector<64x256xf32>
    %116 = arith.mulf %115, %114 : vector<64x256xf32>
    %117 = arith.maximumf %114, %116 : vector<64x256xf32>
    %118 = arith.addf %71, %117 : vector<64x256xf32>
    %119 = arith.truncf %118 : vector<64x256xf32> to vector<64x256xbf16>
    %c1_61 = arith.constant 1 : index
    %c0_62 = arith.constant 0 : index
    %c0_63 = arith.constant 0 : index
    %120 = vector.load %arg3[%c1_61, %c0_62, %c0_63] : memref<2x256x128xbf16, #tpu.memory_space<vmem>>, vector<1x256x128xbf16>
    %121 = vector.shape_cast %120 : vector<1x256x128xbf16> to vector<256x128xbf16>
    %cst_64 = arith.constant dense<0.000000e+00> : vector<64x128xf32>
    %122 = tpu.matmul %119, %121, %cst_64 {dimension_numbers = #tpu.dot_dimension_numbers<[1], [0], [0], [1], [0, 0, 1, 1], [], []>} : vector<64x256xbf16>, vector<256x128xbf16>, vector<64x128xf32> -> vector<64x128xf32>
    %c2 = arith.constant 2 : index
    %c0_65 = arith.constant 0 : index
    %c0_66 = arith.constant 0 : index
    %123 = vector.load %arg4[%c2, %c0_65, %c0_66] : memref<3x1x128xf32, #tpu.memory_space<vmem>>, vector<1x1x128xf32>
    %124 = vector.shape_cast %123 : vector<1x1x128xf32> to vector<1x128xf32>
    %125 = vector.broadcast %124 : vector<1x128xf32> to vector<64x128xf32>
    %126 = arith.addf %122, %125 : vector<64x128xf32>
    %cst_67 = arith.constant 0.00999999977 : f32
    %127 = vector.broadcast %cst_67 : f32 to vector<64x128xf32>
    %128 = arith.mulf %127, %126 : vector<64x128xf32>
    %129 = arith.maximumf %126, %128 : vector<64x128xf32>
    %130 = arith.truncf %129 : vector<64x128xf32> to vector<64x128xbf16>
    %c1_i32_68 = arith.constant 1 : i32
    %131 = tpu.dynamic_rotate %129 by %c1_i32_68 dim 0 : vector<64x128xf32>, i32 -> vector<64x128xf32>
    %cst_69 = arith.constant 0.000000e+00 : f32
    %132 = vector.shape_cast %18 : vector<64x1xi1> to vector<64x1xi1>
    %133 = vector.broadcast %132 : vector<64x1xi1> to vector<64x128xi1>
    %134 = vector.broadcast %cst_69 : f32 to vector<64x128xf32>
    %135 = arith.select %133, %131, %134 : vector<64x128xi1>, vector<64x128xf32>
    %136 = arith.truncf %135 : vector<64x128xf32> to vector<64x128xbf16>
    %c63_i32_70 = arith.constant 63 : i32
    %137 = tpu.dynamic_rotate %129 by %c63_i32_70 dim 0 : vector<64x128xf32>, i32 -> vector<64x128xf32>
    %cst_71 = arith.constant 0.000000e+00 : f32
    %138 = vector.shape_cast %20 : vector<64x1xi1> to vector<64x1xi1>
    %139 = vector.broadcast %138 : vector<64x1xi1> to vector<64x128xi1>
    %140 = vector.broadcast %cst_71 : f32 to vector<64x128xf32>
    %141 = arith.select %139, %137, %140 : vector<64x128xi1>, vector<64x128xf32>
    %142 = arith.truncf %141 : vector<64x128xf32> to vector<64x128xbf16>
    %143 = tpu.concatenate %136, %130, %142 in 1 : vector<64x128xbf16>, vector<64x128xbf16>, vector<64x128xbf16> -> vector<64x384xbf16>
    %c2_72 = arith.constant 2 : index
    %c0_73 = arith.constant 0 : index
    %c0_74 = arith.constant 0 : index
    %144 = vector.load %arg5[%c2_72, %c0_73, %c0_74] : memref<3x384x128xbf16, #tpu.memory_space<vmem>>, vector<1x384x128xbf16>
    %145 = vector.shape_cast %144 : vector<1x384x128xbf16> to vector<384x128xbf16>
    %cst_75 = arith.constant dense<0.000000e+00> : vector<64x128xf32>
    %146 = tpu.matmul %143, %145, %cst_75 {dimension_numbers = #tpu.dot_dimension_numbers<[1], [0], [0], [1], [0, 0, 1, 1], [], []>} : vector<64x384xbf16>, vector<384x128xbf16>, vector<64x128xf32> -> vector<64x128xf32>
    %c2_76 = arith.constant 2 : index
    %c0_77 = arith.constant 0 : index
    %c0_78 = arith.constant 0 : index
    %147 = vector.load %arg6[%c2_76, %c0_77, %c0_78] : memref<3x1x128xf32, #tpu.memory_space<vmem>>, vector<1x1x128xf32>
    %148 = vector.shape_cast %147 : vector<1x1x128xf32> to vector<1x128xf32>
    %149 = vector.broadcast %148 : vector<1x128xf32> to vector<64x128xf32>
    %150 = arith.addf %146, %149 : vector<64x128xf32>
    %cst_79 = arith.constant 0.00999999977 : f32
    %151 = vector.broadcast %cst_79 : f32 to vector<64x128xf32>
    %152 = arith.mulf %151, %150 : vector<64x128xf32>
    %153 = arith.maximumf %150, %152 : vector<64x128xf32>
    %154 = arith.truncf %153 : vector<64x128xf32> to vector<64x128xbf16>
    %c2_80 = arith.constant 2 : index
    %c0_81 = arith.constant 0 : index
    %c0_82 = arith.constant 0 : index
    %155 = vector.load %arg7[%c2_80, %c0_81, %c0_82] : memref<3x128x256xbf16, #tpu.memory_space<vmem>>, vector<1x128x256xbf16>
    %156 = vector.shape_cast %155 : vector<1x128x256xbf16> to vector<128x256xbf16>
    %cst_83 = arith.constant dense<0.000000e+00> : vector<64x256xf32>
    %157 = tpu.matmul %154, %156, %cst_83 {dimension_numbers = #tpu.dot_dimension_numbers<[1], [0], [0], [1], [0, 0, 1, 1], [], []>} : vector<64x128xbf16>, vector<128x256xbf16>, vector<64x256xf32> -> vector<64x256xf32>
    %c2_84 = arith.constant 2 : index
    %c0_85 = arith.constant 0 : index
    %c0_86 = arith.constant 0 : index
    %158 = vector.load %arg8[%c2_84, %c0_85, %c0_86] : memref<3x1x256xf32, #tpu.memory_space<vmem>>, vector<1x1x256xf32>
    %159 = vector.shape_cast %158 : vector<1x1x256xf32> to vector<1x256xf32>
    %160 = vector.broadcast %159 : vector<1x256xf32> to vector<64x256xf32>
    %161 = arith.addf %157, %160 : vector<64x256xf32>
    %cst_87 = arith.constant 0.00999999977 : f32
    %162 = vector.broadcast %cst_87 : f32 to vector<64x256xf32>
    %163 = arith.mulf %162, %161 : vector<64x256xf32>
    %164 = arith.maximumf %161, %163 : vector<64x256xf32>
    %165 = arith.addf %118, %164 : vector<64x256xf32>
    %166 = vector.extract_strided_slice %165 {offsets = [0, 0], sizes = [64, 128], strides = [1, 1]} : vector<64x256xf32> to vector<64x128xf32>
    %167 = arith.truncf %166 : vector<64x128xf32> to vector<64x128xbf16>
    %c0_88 = arith.constant 0 : index
    %c0_89 = arith.constant 0 : index
    %168 = vector.load %arg9[%c0_88, %c0_89] : memref<128x128xbf16, #tpu.memory_space<vmem>>, vector<128x128xbf16>
    %cst_90 = arith.constant dense<0.000000e+00> : vector<64x128xf32>
    %169 = tpu.matmul %167, %168, %cst_90 {dimension_numbers = #tpu.dot_dimension_numbers<[1], [0], [0], [1], [0, 0, 1, 1], [], []>} : vector<64x128xbf16>, vector<128x128xbf16>, vector<64x128xf32> -> vector<64x128xf32>
    %c0_91 = arith.constant 0 : index
    %c0_92 = arith.constant 0 : index
    %170 = vector.load %arg10[%c0_91, %c0_92] : memref<1x128xf32, #tpu.memory_space<vmem>>, vector<1x128xf32>
    %171 = vector.broadcast %170 : vector<1x128xf32> to vector<64x128xf32>
    %172 = arith.addf %169, %171 : vector<64x128xf32>
    %cst_93 = arith.constant 0.000000e+00 : f32
    %173 = vector.broadcast %cst_93 : f32 to vector<64x128xf32>
    %174 = arith.subf %173, %172 : vector<64x128xf32>
    %175 = math.exp %174 : vector<64x128xf32>
    %cst_94 = arith.constant 1.000000e+00 : f32
    %176 = vector.broadcast %cst_94 : f32 to vector<64x128xf32>
    %177 = arith.addf %176, %175 : vector<64x128xf32>
    %178 = tpu.reciprocal %177 {approx = true} : vector<64x128xf32> -> vector<64x128xf32>
    %c0_95 = arith.constant 0 : index
    %c0_96 = arith.constant 0 : index
    %179 = memref.load %arg11[%c0_95, %c0_96] : memref<1x1xf32, #tpu.memory_space<smem>>
    %c0_97 = arith.constant 0 : index
    %c0_98 = arith.constant 0 : index
    %c0_99 = arith.constant 0 : index
    %180 = vector.load %arg1[%c0_97, %c0_98, %c0_99] : memref<4x16x128xf32, #tpu.memory_space<vmem>>, vector<4x16x128xf32>
    %181 = vector.shape_cast %180 : vector<4x16x128xf32> to vector<64x128xf32>
    %182 = vector.extract_strided_slice %165 {offsets = [0, 128], sizes = [64, 128], strides = [1, 1]} : vector<64x256xf32> to vector<64x128xf32>
    %183 = arith.mulf %178, %182 : vector<64x128xf32>
    %184 = vector.broadcast %179 : f32 to vector<64x128xf32>
    %185 = arith.mulf %184, %183 : vector<64x128xf32>
    %186 = arith.addf %181, %185 : vector<64x128xf32>
    %187 = vector.shape_cast %186 : vector<64x128xf32> to vector<4x16x128xf32>
    %c0_100 = arith.constant 0 : index
    %c0_101 = arith.constant 0 : index
    %c0_102 = arith.constant 0 : index
    %188 = vector.load %arg12[%c0_100, %c0_101, %c0_102] : memref<4x16x128xf32, #tpu.memory_space<vmem>>, vector<4x16x128xf32>
    tpu.vector_store %arg12[%c0_100, %c0_101, %c0_102], %187 {strides = array<i32>} : memref<4x16x128xf32, #tpu.memory_space<vmem>>, vector<4x16x128xf32>,
    return
  }
  func.func @transform_0(%arg0: i32) -> (i32, i32, i32) {
    %c0_i32 = arith.constant 0 : i32
    %c0_i32_0 = arith.constant 0 : i32
    %c0_i32_1 = arith.constant 0 : i32
    return %arg0, %c0_i32, %c0_i32_0 : i32, i32, i32
  }
  func.func @transform_1(%arg0: i32) -> (i32, i32) {
    %c0_i32 = arith.constant 0 : i32
    %c0_i32_0 = arith.constant 0 : i32
    %c0_i32_1 = arith.constant 0 : i32
    return %c0_i32, %c0_i32_0 : i32, i32
  }
  func.func @transform_2(%arg0: i32) -> (i32, i32, i32) {
    %c0_i32 = arith.constant 0 : i32
    %c0_i32_0 = arith.constant 0 : i32
    %c0_i32_1 = arith.constant 0 : i32
    %c0_i32_2 = arith.constant 0 : i32
    return %c0_i32, %c0_i32_0, %c0_i32_1 : i32, i32, i32
  }
  func.func @transform_3(%arg0: i32) -> (i32, i32, i32) {
    %c0_i32 = arith.constant 0 : i32
    %c0_i32_0 = arith.constant 0 : i32
    %c0_i32_1 = arith.constant 0 : i32
    %c0_i32_2 = arith.constant 0 : i32
    return %c0_i32, %c0_i32_0, %c0_i32_1 : i32, i32, i32
  }
  func.func @transform_4(%arg0: i32) -> (i32, i32, i32) {
    %c0_i32 = arith.constant 0 : i32
    %c0_i32_0 = arith.constant 0 : i32
    %c0_i32_1 = arith.constant 0 : i32
    %c0_i32_2 = arith.constant 0 : i32
    return %c0_i32, %c0_i32_0, %c0_i32_1 : i32, i32, i32
  }
  func.func @transform_5(%arg0: i32) -> (i32, i32, i32) {
    %c0_i32 = arith.constant 0 : i32
    %c0_i32_0 = arith.constant 0 : i32
    %c0_i32_1 = arith.constant 0 : i32
    %c0_i32_2 = arith.constant 0 : i32
    return %c0_i32, %c0_i32_0, %c0_i32_1 : i32, i32, i32
  }
  func.func @transform_6(%arg0: i32) -> (i32, i32, i32) {
    %c0_i32 = arith.constant 0 : i32
    %c0_i32_0 = arith.constant 0 : i32
    %c0_i32_1 = arith.constant 0 : i32
    %c0_i32_2 = arith.constant 0 : i32
    return %c0_i32, %c0_i32_0, %c0_i32_1 : i32, i32, i32
  }
  func.func @transform_7(%arg0: i32) -> (i32, i32, i32) {
    %c0_i32 = arith.constant 0 : i32
    %c0_i32_0 = arith.constant 0 : i32
    %c0_i32_1 = arith.constant 0 : i32
    %c0_i32_2 = arith.constant 0 : i32
    return %c0_i32, %c0_i32_0, %c0_i32_1 : i32, i32, i32
  }
  func.func @transform_8(%arg0: i32) -> (i32, i32) {
    %c0_i32 = arith.constant 0 : i32
    %c0_i32_0 = arith.constant 0 : i32
    %c0_i32_1 = arith.constant 0 : i32
    return %c0_i32, %c0_i32_0 : i32, i32
  }
  func.func @transform_9(%arg0: i32) -> (i32, i32) {
    %c0_i32 = arith.constant 0 : i32
    %c0_i32_0 = arith.constant 0 : i32
    %c0_i32_1 = arith.constant 0 : i32
    return %c0_i32, %c0_i32_0 : i32, i32
  }
  func.func @transform_10(%arg0: i32) -> (i32, i32) {
    %c0_i32 = arith.constant 0 : i32
    %c0_i32_0 = arith.constant 0 : i32
    %c0_i32_1 = arith.constant 0 : i32
    return %c0_i32, %c0_i32_0 : i32, i32
  }
  func.func @transform_11(%arg0: i32) -> (i32, i32, i32) {
    %c0_i32 = arith.constant 0 : i32
    %c0_i32_0 = arith.constant 0 : i32
    %c0_i32_1 = arith.constant 0 : i32
    return %arg0, %c0_i32, %c0_i32_0 : i32, i32, i32
  }
}

</mosaic_0001>

<bundles_post_ra>
// kernel: resattn_pallas.1
= control target key start
LH: loop header
LB: loop body
LE: loop exit
PB: predicated region body
PF: predicated region fallthrough
CT: control target
= control target key end

     0   :  { %s5898_s0 = inlined_call_operand.hbm [shape: f32[8,16,128], index: 0, kind: input, shape index: {}]   ;;  %s5899_s1 = inlined_call_operand.hbm [shape: bf16[128,128], index: 1, kind: input, shape index: {}]   ;;  %s5900_s2 = inlined_call_operand.hbm [shape: bf16[2,256,128], index: 2, kind: input, shape index: {}]   ;;  %s5901_s3 = inlined_call_operand.hbm [shape: f32[3,1,128], index: 3, kind: input, shape index: {}]   ;;  %s5902_s4 = inlined_call_operand.hbm [shape: bf16[3,384,128], index: 4, kind: input, shape index: {}]   ;;  %s5903_s5 = inlined_call_operand.vmem [shape: f32[3,1,128], index: 5, kind: input, shape index: {}]   ;;  %s5904_s6 = inlined_call_operand.hbm [shape: bf16[3,128,256], index: 6, kind: input, shape index: {}]   ;;  %s5905_s7 = inlined_call_operand.hbm [shape: f32[3,1,256], index: 7, kind: input, shape index: {}]   ;;  %s5906_s8 = inlined_call_operand.hbm [shape: bf16[128,128], index: 8, kind: input, shape index: {}]   ;;  %s5907_s9 = inlined_call_operand.vmem [shape: f32[1,128], index: 9, kind: input, shape index: {}]   ;;  %s5908_s10 = inlined_call_operand.<no memory space> [shape: f32[1,1], index: 10, kind: input, shape index: {}]   ;;  %s5909_s11 = inlined_call_operand.hbm [shape: f32[8,16,128], index: 11, kind: output, shape index: {}]  }
   0x1   :  { %5913 = sst [smem:[#allocation24_spill]] %s5899_s1 }
   0x2   :  { %5914 = sst [smem:[#allocation25_spill]] %s5900_s2 }
   0x3   :  { %5915 = sst [smem:[#allocation26_spill]] %s5901_s3 }
   0x4   :  { %5916 = sst [smem:[#allocation27_spill]] %s5909_s11 }
   0x5   :  { %16 = sst [smem:[#allocation2]] %s5908_s10 }
   0x6   :  { %17 = vsyncpa [#allocation4], 0 }
   0x7   :  { %19 = vsyncpa [#allocation4 + $0x1], 0 }
   0x8   :  { %20 = vsyncpa [#allocation7], 0 }
   0x9   :  { %21 = vsyncpa [#allocation10], 0 }
   0xa   :  { %22 = vsyncpa [#allocation13], 0 }
   0xb   :  { %23 = vsyncpa [#allocation16], 0 }
   0xc   :  { %24 = vsyncpa [#allocation5], 0 }
   0xd   :  { %26 = vsyncpa [#allocation5 + $0x1], 0  ;;  %s5013_s19 = smov 0   ;;  %s5015_s20 = smov 0  }
   0xe   :  { %s5017_s21 = smov 0   ;;  %s5019_s22 = smov 0  }
   0xf LB: > { %s5917_s1 = sld [smem:[#allocation24_spill]]  ;;  %s5037_s25 = sadd.s32 4294967295, %s4931_s22   ;;  %s4931_s22 = sphi %s5019_s22, %s5949_s22   ;;  %s4927_s21 = sphi %s5017_s21, %s5948_s21   ;;  %s4923_s20 = sphi %s5015_s20, %s5947_s20   ;;  %s4919_s19 = sphi %s5013_s19, %s5946_s19  }
  0x10   : > { %p3544_p0 = scmp.ge.s32.totalorder %s4931_s22, 1  ;;  %p53_p1 = scmp.eq.s32.totalorder %s5037_s25, 0 }
  0x11   : > { %p299_p2 = scmp.lt.s32.totalorder %s4931_s22, 3  ;;  %s4933_s27 = smov [#allocation6]  }
  0x12   : > { %s312_s28 = sshll.u32 %s4933_s27, 4  ;;  %s5919_s3 = sld [smem:[#allocation26_spill]]  ;;  %s313_s28 = int_to_ptr.vmem [resolvable:$true] %s312_s28 }
  0x13   : > { %p5042_p3 = pnand %p3544_p0, %p299_p2  ;;  %s4934_s14 = smov [#allocation9]  }
  0x14   : > { %s340_s15 = sshll.u32 %s4934_s14, 4  ;;  %s4935_s16 = smov 64   ;;  %s341_s15 = int_to_ptr.vmem [resolvable:$true] %s340_s15 }
  0x15   : > { %s310_s24 = sshll.u32 %s5917_s1, 4  ;;  %p4467_p4 = pneg %p5042_p3  ;;  %s311_s24 = int_to_ptr.hbm [resolvable:$true] %s310_s24 }
  0x16   : > { %s4936_s17 = smov 4   ;;  %s4937_s18 = smov 16  }
  0x17   : > { %p5054_p6 = pnand %p4467_p4, %p53_p1  ;;  %s4938_s10 = smov 1  }
  0x18   : > { %s338_s12 = sshll.u32 %s5919_s3, 4  ;;  %s369_s29 = sshll.u32 %s5904_s6, 4  ;;  %s339_s12 = int_to_ptr.hbm [resolvable:$true] %s338_s12  ;;  %s370_s29 = int_to_ptr.hbm [resolvable:$true] %s369_s29 }
  0x19   : > { %4470 = dma.hbm_to_vmem [thread:$0]  (!%p5054_p6), %s311_s24, 1024, %s313_s28, [#allocation7], %s4935_s16, %s4935_s16, %s4936_s17  }
  0x1a   : > { %4476 = dma.hbm_to_vmem [thread:$0]  (!%p5054_p6), %s339_s12, 48, %s341_s15, [#allocation10], %s4937_s18, %s4937_s18, %s4938_s10  }
  0x1b   : > { %s4939_s30 = smov [#allocation12]   ;;  %s5921_s2 = sld [smem:[#allocation25_spill]] }
  0x1c   : > { %s371_s14 = sshll.u32 %s4939_s30, 4  ;;  %s5911_s24 = smov 128   ;;  %s372_s14 = int_to_ptr.vmem [resolvable:$true] %s371_s14 }
  0x1d   : > { %s5912_s28 = smov 8   ;;  %s4942_s12 = smov [#allocation8]  }
  0x1e   : > { %4482 = dma.hbm_to_vmem [thread:$0]  (!%p5054_p6), %s370_s29, 6144, %s372_s14, [#allocation13], %s5911_s24, %s5911_s24, %s5912_s28  }
  0x1f   : > { %s326_s15 = sshll.u32 %s4942_s12, 4  ;;  %s352_s23 = sshll.u32 %s5902_s4, 4  ;;  %s327_s15 = int_to_ptr.vmem [resolvable:$true] %s326_s15  ;;  %s353_s23 = int_to_ptr.hbm [resolvable:$true] %s352_s23 }
  0x20   : > { %s383_s27 = sshll.u32 %s5905_s7, 4  ;;  %s4943_s29 = smov [#allocation11]   ;;  %s384_s27 = int_to_ptr.hbm [resolvable:$true] %s383_s27 }
  0x21   : > { %s324_s11 = sshll.u32 %s5921_s2, 4  ;;  %s354_s30 = sshll.u32 %s4943_s29, 4  ;;  %s325_s11 = int_to_ptr.hbm [resolvable:$true] %s324_s11  ;;  %s355_s30 = int_to_ptr.vmem [resolvable:$true] %s354_s30 }
  0x22   : > { %4473 = dma.hbm_to_vmem [thread:$0]  (!%p5054_p6), %s325_s11, 4096, %s327_s15, [#allocation7], %s4935_s16, %s4935_s16, %s4936_s17  }
  0x23   : > { %4479 = dma.hbm_to_vmem [thread:$0]  (!%p5054_p6), %s353_s23, 9216, %s355_s30, [#allocation10], %s4935_s16, %s4935_s16, %s4936_s17  }
  0x24   : > { %s4944_s14 = smov [#allocation14]   ;;  %s4945_s12 = smov 32  }
  0x25   : > { %s385_s11 = sshll.u32 %s4944_s14, 4  ;;  %s4946_s15 = smov 2   ;;  %s386_s11 = int_to_ptr.vmem [resolvable:$true] %s385_s11 }
  0x26   : > { %4485 = dma.hbm_to_vmem [thread:$0]  (!%p5054_p6), %s384_s27, 96, %s386_s11, [#allocation13], %s4945_s12, %s4945_s12, %s4946_s15  }
  0x27   : > { %s397_s1 = sshll.u32 %s5906_s8, 4  ;;  %s4947_s23 = smov [#allocation15]   ;;  %s398_s1 = int_to_ptr.hbm [resolvable:$true] %s397_s1 }
  0x28   : > { %s399_s3 = sshll.u32 %s4947_s23, 4  ;;  %s3543_s29 = sadd.s32 4294967294, %s4931_s22   ;;  %s400_s3 = int_to_ptr.vmem [resolvable:$true] %s399_s3 }
  0x29   : > { %4488 = dma.hbm_to_vmem [thread:$0]  (!%p5054_p6), %s398_s1, 1024, %s400_s3, [#allocation16], %s4935_s16, %s4935_s16, %s4936_s17  }
  0x2a   : > { %s5104_s30 = sadd.s32 1, %s4931_s22   ;;  %s39_s27 = sadd.s32 1, %s4927_s21 }
  0x2b   : > { %s36_s14 = ssub.s32 %s4931_s22, %s5104_s30  ;;  %p46_p7 = scmp.ne.s32.totalorder %s4927_s21, %s4923_s20 }
  0x2c   : > { %p37_p8 = scmp.eq.s32.totalorder %s36_s14, 0  ;;  %p47_p9 = scmp.eq.s32.totalorder %s4931_s22, 0 }
  0x2d   : > { %p52_p10 = scmp.ne.s32.totalorder %s4923_s20, %s4919_s19  ;;  %p286_p11 = scmp.eq.s32.totalorder %s5037_s25, 1 }
  0x2e   : > { %s5116_s11 = scalar_select %p37_p8, %s4927_s21, %s39_s27  }
  0x2f   : > { %p5120_p12 = por %p53_p1, %p52_p10  ;;  %p5124_p13 = por %p286_p11, %p46_p7 }
  0x30   : > { %p292_p0 = scmp.eq.s32.totalorder %s3543_s29, 1  ;;  %p48_p2 = por %p47_p9, %p46_p7 }
  0x31   : > { %s419_s17 = sand.u32 1, %s4927_s21   ;;  %p4504_p6 = scmp.lt.s32.totalorder %s4931_s22, 2 }
  0x32   : > { %p5129_p4 = por %p292_p0, %p52_p10  ;;  %s3553_s15 = sshll.u32 %s419_s17, 6 }
  0x33   : > { %s4248_s18 = sshll.u32 %s4931_s22, 6  ;;  %s423_s27 = scalar_lea.vmem [#allocation3], %s3553_s15 }
  0x34   : > { %s429_s23 = scalar_lea.hbm %s5898_s0, %s4248_s18  ;;  %s432_s14 = sshll.u32 %s423_s27, 4  ;;  %s433_s14 = int_to_ptr.vmem [resolvable:$true] %s432_s14 }
  0x35   : > { %s430_s3 = sshll.u32 %s429_s23, 4  ;;  %p5138_p8 = pnand %p4504_p6, %p48_p2  ;;  %s431_s3 = int_to_ptr.hbm [resolvable:$true] %s430_s3 }
  0x36   : > { %s420_s24 = scalar_lea.sflag [#allocation4], %s419_s17  ;;  %s4819_s28 = sshra.s32 %s431_s3, 4  ;;  %s4820_s28 = int_to_ptr.hbm [resolvable:$true] %s4819_s28 }
  0x37   : > { %s4821_s2 = scalar_lea.hbm %s4820_s28, 64  ;;  %p4823_p9 = pneg %p5138_p8 }
  0x38   : > { %p4822_p7 = scmp.ne.s32.totalorder %s4820_s28, %s4821_s2  ;;  %s4826_s15 = scalar_lea.hbm %s5898_s0, 128 }
  0x39   : > { %p4827_p0 = scmp.lt.s32.totalorder %s4820_s28, %s5898_s0  ;;  %p4828_p2 = scmp.lt.s32.totalorder %s4826_s15, %s4821_s2 }
  0x3a   : > { %p4824_p10 = pnand %p4823_p9, %p4822_p7 }
  0x3b   : > { %p4829_p6 = por %p4828_p2, %p4827_p0 }
  0x3c   : > { %p4825_p11 = pneg %p4824_p10 }
  0x3e   : > { %p4830_p5 = pnand %p4829_p6, %p4825_p11 }
  0x40   : > { %4833 = shalt.err (!%p4830_p5)
}
  0x41   : > { %s5926_s17 = smov 8   ;;  %s5927_s27 = smov 128  }
  0x42   : > { %4492 = dma.hbm_to_vmem [thread:$0]  (!%p5138_p8), %s431_s3, 1024, %s433_s14, %s420_s24, %s5927_s27, %s5927_s27, %s5926_s17  }
  0x43   : > { %444 = sbr.rel (%p5042_p3) target bundleno = 1793 (0x701), region = 64  ;;  %s5158_s18 = sand.u32 (!%p5042_p3), 1, %s4923_s20  }
  0x44   : > { %s3558_s2 = sshll.u32 (!%p5042_p3), %s5158_s18, 6  ;;  %s447_s28 = scalar_lea.sflag (!%p5042_p3), [#allocation4], %s5158_s18 }
  0x45   : > { %s5164_s10 = scalar_lea.vmem (!%p5042_p3), [#allocation3], %s3558_s2 }
  0x48   : > { %4894 = dma.done.wait (%p5120_p12), %s447_s28, 1024  }
  0x49   : > { %4896 = vsyncadd (%p5120_p12), %s447_s28, 4294966272 }
  0x4a   : > { %4898 = dma.done.wait (%p53_p1), [#allocation7], 5120  }
  0x4b   : > { %4900 = vsyncadd (%p53_p1), [#allocation7], 4294962176 }
  0x4c   : > { %4902 = dma.done.wait (%p53_p1), [#allocation10], 9264  }
  0x4d   : > { %4904 = vsyncadd (%p53_p1), [#allocation10], 4294958032 }
  0x4e   : > { %4906 = dma.done.wait (%p53_p1), [#allocation13], 6240  }
  0x4f   : > { %4908 = vsyncadd (%p53_p1), [#allocation13], 4294961056 }
  0x50   : > { %4910 = dma.done.wait (%p53_p1), [#allocation16], 1024  }
  0x51   : > { %4912 = vsyncadd (%p53_p1), [#allocation16], 4294966272  ;;  %v4256_v0 = vld [vmem:[#allocation6 + $0x38] sm:$0xff]  ;;  %v4255_v1 = vld [vmem:[#allocation6 + $0x30] sm:$0xff]  ;;  %v527_v52 = vlaneseq  ;;  %s3352_s23 = sld [smem:[#allocation2]]  ;;  %s5825_s17 = scalar_lea.vmem [#allocation17], %s3558_s2 }
  0x52   : > { %728 = vmatpush.bf16.msra.mxu0 %v4256_v0  ;;  %4419 = vmatpush.bf16.msra.mxu1 %v4256_v0  ;;  %v4254_v2 = vld [vmem:[#allocation6 + $0x28] sm:$0xff]  ;;  %v4253_v3 = vld [vmem:[#allocation6 + $0x20] sm:$0xff]  ;;  %v4252_v4 = vld [vmem:[#allocation6 + $0x18] sm:$0xff]  ;;  %s4418_s27 = sshll.u32 %s5037_s25, 6  ;;  %s5944_s26 = sld [smem:[#allocation27_spill]] }
  0x53   : > { %v4272_v5 = vld [vmem:[#allocation11 + $0x78] sm:$0xff]  ;;  %v4251_v6 = vld [vmem:[#allocation6 + $0x10] sm:$0xff]  ;;  %v4250_v8 = vld [vmem:[#allocation6 + $0x8] sm:$0xff]  ;;  %v5226_v56 = vshrl.u32 %v527_v52, 7  ;;  %s3400_s13 = sshll.u32 %s5825_s17, 4  ;;  %s3387_s25 = scalar_lea.sflag [#allocation5], %s5158_s18  ;;  %s3401_s13 = int_to_ptr.vmem [resolvable:$true] %s3400_s13 }
  0x54   : > { %1176 = vmatpush.bf16.msra.mxu2 %v4272_v5  ;;  %v4271_v7 = vld [vmem:[#allocation11 + $0x70] sm:$0xff]  ;;  %v4270_v9 = vld [vmem:[#allocation11 + $0x68] sm:$0xff]  ;;  %v4249_v10 = vld [vmem:[#allocation6] sm:$0xff] }
  0x55   : > { %v5187_v11 = vld [vmem:[%s5164_s10] sm:$0xff]  ;;  %v5190_v12 = vld [vmem:[%s5164_s10 + $0x8] sm:$0xff]  ;;  %v5203_v17 = vld [vmem:[%s5164_s10 + $0x10] sm:$0xff]  ;;  %v529_v58 = vadd.s32 8, %v5226_v56  ;;  %vm838_vm0 = vcmp.lt.s32.totalorder %v5226_v56, 7  ;;  %vm789_vm2 = vcmp.lt.s32.totalorder %v5226_v56, 1 }
  0x56   : > { %729 = vmatpush.bf16.msra.mxu0 %v4255_v1  ;;  %4420 = vmatpush.bf16.msra.mxu1 %v4255_v1  ;;  %v5193_v13 = vld [vmem:[%s5164_s10 + $0x20] sm:$0xff]  ;;  %v5196_v14 = vld [vmem:[%s5164_s10 + $0x28] sm:$0xff]  ;;  %v656_v15 = vpack.c.bf16 %v5190_v12, %v5187_v11  ;;  %v5206_v18 = vld [vmem:[%s5164_s10 + $0x18] sm:$0xff] }
  0x57   : > { %v658_v16 = vpack.c.bf16 %v5196_v14, %v5193_v13  ;;  %v5209_v19 = vld [vmem:[%s5164_s10 + $0x30] sm:$0xff]  ;;  %v5212_v20 = vld [vmem:[%s5164_s10 + $0x38] sm:$0xff]  ;;  %v657_v21 = vpack.c.bf16 %v5206_v18, %v5203_v17  ;;  %v4269_v23 = vld [vmem:[#allocation11 + $0x60] sm:$0xff] }
  0x58   : > { %1177 = vmatpush.bf16.msra.mxu2 %v4271_v7  ;;  %v659_v22 = vpack.c.bf16 %v5212_v20, %v5209_v19  ;;  %v4280_v24 = vld [vmem:[#allocation11 + $0xb8] sm:$0xff]  ;;  %v4279_v26 = vld [vmem:[#allocation11 + $0xb0] sm:$0xff]  ;;  %v4278_v29 = vld [vmem:[#allocation11 + $0xa8] sm:$0xff]  ;;  %s3399_s24 = scalar_lea.hbm %s5944_s26, %s4418_s27 }
  0x59   : > { %1205 = vmatpush.bf16.msra.mxu3 %v4280_v24  ;;  %v4268_v25 = vld [vmem:[#allocation11 + $0x58] sm:$0xff]  ;;  %v4267_v28 = vld [vmem:[#allocation11 + $0x50] sm:$0xff]  ;;  %v4266_v31 = vld [vmem:[#allocation11 + $0x48] sm:$0xff]  ;;  %s3402_s3 = sshll.u32 %s3399_s24, 4  ;;  %s3403_s3 = int_to_ptr.hbm [resolvable:$true] %s3402_s3 }
  0x5a   : > { %730 = vmatpush.bf16.msra.mxu0 %v4254_v2  ;;  %4421 = vmatpush.bf16.msra.mxu1 %v4254_v2  ;;  %v4264_v27 = vld [vmem:[#allocation11 + $0x38] sm:$0xff]  ;;  %v4263_v30 = vld [vmem:[#allocation11 + $0x30] sm:$0xff]  ;;  %v4277_v32 = vld [vmem:[#allocation11 + $0xa0] sm:$0xff]  ;;  %s4863_s14 = sshra.s32 %s3403_s3, 4  ;;  %s4864_s14 = int_to_ptr.hbm [resolvable:$true] %s4863_s14 }
  0x5b   : > { %v4262_v33 = vld [vmem:[#allocation11 + $0x28] sm:$0xff]  ;;  %v4265_v34 = vld [vmem:[#allocation11 + $0x40] sm:$0xff]  ;;  %v4276_v35 = vld [vmem:[#allocation11 + $0x98] sm:$0xff]  ;;  %s4865_s29 = scalar_lea.hbm %s4864_s14, 64  ;;  %p4870_p12 = scmp.lt.s32.totalorder %s4864_s14, %s5944_s26 }
  0x5c   : > { %1178 = vmatpush.bf16.msra.mxu2 %v4270_v9  ;;  %v4261_v36 = vld [vmem:[#allocation11 + $0x20] sm:$0xff]  ;;  %v4275_v37 = vld [vmem:[#allocation11 + $0x90] sm:$0xff]  ;;  %v4260_v38 = vld [vmem:[#allocation11 + $0x18] sm:$0xff]  ;;  %p4866_p1 = scmp.ne.s32.totalorder %s4864_s14, %s4865_s29 }
  0x5d   : > { %1206 = vmatpush.bf16.msra.mxu3 %v4279_v26  ;;  %v4274_v39 = vld [vmem:[#allocation11 + $0x88] sm:$0xff]  ;;  %v4259_v40 = vld [vmem:[#allocation11 + $0x10] sm:$0xff]  ;;  %v4273_v41 = vld [vmem:[#allocation11 + $0x80] sm:$0xff] }
  0x5e   : > { %731 = vmatpush.bf16.msra.mxu0 %v4253_v3  ;;  %4422 = vmatpush.bf16.msra.mxu1 %v4253_v3  ;;  %v4258_v42 = vld [vmem:[#allocation11 + $0x8] sm:$0xff]  ;;  %v5218_v43 = vld [vmem:[#allocation9] ss:$0 sm:$0xff]  ;;  %v4257_v47 = vld [vmem:[#allocation11] sm:$0xff]  ;;  %v547_v3 = vand.u32 15, %v529_v58  ;;  %p4867_p3 = pnand %p4866_p1, %p5124_p13 }
  0x60   : > { %1179 = vmatpush.bf16.msra.mxu2 %v4269_v23  ;;  %vm5241_vm1 = vcmp.ne.s32.totalorder %v547_v3, 15  ;;  %p4868_p5 = pneg %p4867_p3 }
  0x61   : > { %1207 = vmatpush.bf16.msra.mxu3 %v4278_v29 }
  0x62   : > { %732 = vmatpush.bf16.msra.mxu0 %v4252_v4  ;;  %4423 = vmatpush.bf16.msra.mxu1 %v4252_v4 }
  0x64   : > { %1180 = vmatpush.bf16.msra.mxu2 %v4268_v25  ;;  %v531_v25 = vadd.s32 24, %v5226_v56 }
  0x65   : > { %1208 = vmatpush.bf16.msra.mxu3 %v4277_v32  ;;  %v540_v32 = vand.u32 15, %v5226_v56 }
  0x66   : > { %733 = vmatpush.bf16.msra.mxu0 %v4251_v6  ;;  %4424 = vmatpush.bf16.msra.mxu1 %v4251_v6 }
  0x67   : > { %vm5272_vm3 = vcmp.ne.s32.totalorder %v540_v32, 0 }
  0x68   : > { %1181 = vmatpush.bf16.msra.mxu2 %v4267_v28 }
  0x69   : > { %1209 = vmatpush.bf16.msra.mxu3 %v4276_v35 }
  0x6a   : > { %734 = vmatpush.bf16.msra.mxu0 %v4250_v8  ;;  %4425 = vmatpush.bf16.msra.mxu1 %v4250_v8 }
  0x6c   : > { %1182 = vmatpush.bf16.msra.mxu2 %v4266_v31 }
  0x6d   : > { %1210 = vmatpush.bf16.msra.mxu3 %v4275_v37 }
  0x6e   : > { %735 = vmatpush.bf16.msra.mxu0 %v4249_v10  ;;  %4426 = vmatpush.bf16.msra.mxu1 %v4249_v10 }
  0x70   : > { %1183 = vmatpush.bf16.msra.mxu2 %v4265_v34 }
  0x71   : > { %736 = vmatmul.bf16.vlgmr.msra.gmra.mxu0 %v656_v15  ;;  %746 = vmatmul.bf16.vlgmr.msra.gmra.mxu1 %v658_v16 }
  0x72   : > { %1147 = vmatpush.bf16.msrb.mxu1 %v4264_v27  ;;  %1211 = vmatpush.bf16.msra.mxu3 %v4274_v39 }
  0x76   : > { %1148 = vmatpush.bf16.msrb.mxu1 %v4263_v30  ;;  %1212 = vmatpush.bf16.msra.mxu3 %v4273_v41 }
  0x7a   : > { %1149 = vmatpush.bf16.msrb.mxu1 %v4262_v33 }
  0x7e   : > { %1150 = vmatpush.bf16.msrb.mxu1 %v4261_v36 }
  0x81   : > { %741 = vmatmul.bf16.gmra.mxu0 %v657_v21  ;;  %751 = vmatmul.bf16.gmra.mxu1 %v659_v22 }
  0x82   : > { %1151 = vmatpush.bf16.msrb.mxu1 %v4260_v38  ;;  %v561_v38 = vand.u32 15, %v531_v25 }
  0x84   : > { %vm5285_vm4 = vcmp.ne.s32.totalorder %v561_v38, 15 }
  0x86   : > { %1152 = vmatpush.bf16.msrb.mxu1 %v4259_v40 }
  0x8a   : > { %1153 = vmatpush.bf16.msrb.mxu1 %v4258_v42 }
  0x8e   : > { %1154 = vmatpush.bf16.msrb.mxu1 %v4257_v47 }
  0xee   : > { %v737_v44 = vpop.f32.mrf.mxu0  ;;  %v747_v45 = vpop.f32.mrf.mxu1 }
  0xef   : > { %v738_v46 = vadd.f32 %v5218_v43, %v737_v44  ;;  %v748_v4 = vadd.f32 %v5218_v43, %v747_v45 }
  0xf1   : > { %v757_v48 = vmul.f32 0.01, %v738_v46  ;;  %v761_v15 = vmul.f32 0.01, %v748_v4 }
  0xf3   : > { %v5222_v53 = vmax.f32 %v738_v46, %v757_v48  ;;  %v5260_v34 = vmax.f32 %v748_v4, %v761_v15 }
  0xf5   : > { %v773_v57 = vpack.c.bf16 %v5222_v53, %v5222_v53  ;;  %v830_v6 = vrot.slane %v5222_v53, 1  ;;  %v781_v33 = vrot.slane %v5222_v53, 7  ;;  %v834_v46 = vrot.slane %v5260_v34, 1 }
  0xf6   : > { %v739_v49 = vpop.f32.mrf.mxu0  ;;  %v749_v50 = vpop.f32.mrf.mxu1 }
  0xf7   : > { %v740_v51 = vadd.f32 %v5218_v43, %v739_v49  ;;  %v911_v63 = vunpack.c.l.b16 %v773_v57  ;;  %v750_v47 = vadd.f32 %v5218_v43, %v749_v50 }
  0xf9   : > { %v758_v54 = vmul.f32 0.01, %v740_v51 }
  0xfb   : > { %v5224_v55 = vmax.f32 %v740_v51, %v758_v54 }
  0xfd   : > { %v774_v61 = vpack.c.bf16 %v5224_v55, %v5224_v55  ;;  %v831_v1 = vrot.slane %v5224_v55, 1  ;;  %v782_v26 = vrot.slane %v5224_v55, 7 }
  0xfe   : > { %v742_v59 = vpop.f32.mrf.mxu0  ;;  %v752_v60 = vpop.f32.mrf.mxu1 }
  0xff   : > { %v743_v62 = vadd.f32 %v5218_v43, %v742_v59  ;;  %v912_v0 = vunpack.c.l.b16 %v774_v61  ;;  %v845_v10 = vsel %vm838_vm0, %v830_v6, %v831_v1  ;;  %v796_v41 = vsel %vm789_vm2, %v781_v33, %v782_v26 }
 0x100   : > { %v871_v28 = vpack.c.bf16 %v845_v10, %v845_v10  ;;  %v753_v51 = vadd.f32 %v5218_v43, %v752_v60  ;;  %v823_v54 = vpack.c.bf16 %v796_v41, %v796_v41  ;;  %v530_v60 = vadd.s32 16, %v5226_v56 }
 0x101   : > { %v759_v2 = vmul.f32 0.01, %v743_v62  ;;  %v919_v5 = vpack.c.b16 %v912_v0, %v911_v63  ;;  %v762_v61 = vmul.f32 0.01, %v750_v47 }
 0x102   : > { %v935_v39 = vunpack.c.l.b16 %v871_v28  ;;  %v888_v0 = vunpack.c.l.b16 %v823_v54  ;;  %v763_v3 = vmul.f32 0.01, %v753_v51  ;;  %v554_v10 = vand.u32 15, %v530_v60 }
 0x103   : > { %v5238_v7 = vmax.f32 %v743_v62, %v759_v2  ;;  %1184 = vmatmul.bf16.vlgmr.msra.gmra.mxu2 %v919_v5  ;;  %v5299_v15 = vmax.f32 %v750_v47, %v762_v61  ;;  %v535_v60 = vadd.s32 56, %v5226_v56 }
 0x104   : > { %vm5305_vm5 = vcmp.ne.s32.totalorder %v554_v10, 0 }
 0x105   : > { %v832_v8 = vrot.slane %v5238_v7, 1  ;;  %v775_v40 = vpack.c.bf16 %v5238_v7, %v5238_v7  ;;  %v783_v4 = vrot.slane %v5238_v7, 7  ;;  %v778_v28 = vpack.c.bf16 %v5299_v15, %v5299_v15 }
 0x106   : > { %v744_v16 = vpop.f32.mrf.mxu0  ;;  %v754_v21 = vpop.f32.mrf.mxu1 }
 0x107   : > { %v745_v22 = vadd.f32 %v5218_v43, %v744_v16  ;;  %v755_v23 = vadd.f32 %v5218_v43, %v754_v21  ;;  %v844_v24 = vsel %vm838_vm0, %v831_v1, %v832_v8  ;;  %v913_v57 = vunpack.c.l.b16 %v775_v40 }
 0x108   : > { %v864_v27 = vsel %vm5241_vm1, %v844_v24, 0.0  ;;  %v795_v7 = vsel %vm789_vm2, %v782_v26, %v783_v4  ;;  %v835_v26 = vrot.slane %v5299_v15, 1  ;;  %v916_v38 = vunpack.c.l.b16 %v778_v28 }
 0x109   : > { %v760_v29 = vmul.f32 0.01, %v745_v22  ;;  %v764_v30 = vmul.f32 0.01, %v755_v23  ;;  %v872_v31 = vpack.c.bf16 %v864_v27, %v864_v27  ;;  %v816_v32 = vsel %vm5305_vm5, %v795_v7, 0.0 }
 0x10a   : > { %v824_v40 = vpack.c.bf16 %v816_v32, %v816_v32 }
 0x10b   : > { %v5262_v35 = vmax.f32 %v745_v22, %v760_v29  ;;  %v5264_v36 = vmax.f32 %v755_v23, %v764_v30  ;;  %v936_v37 = vunpack.c.l.b16 %v872_v31  ;;  %v5302_v23 = vmax.f32 %v753_v51, %v763_v3  ;;  %v3747_v3 = vld [vmem:[#allocation12 + $0x68] sm:$0xf0] }
 0x10c   : > { %v777_v31 = vpack.c.bf16 %v5260_v34, %v5260_v34 }
 0x10d   : > { %v833_v42 = vrot.slane %v5262_v35, 1  ;;  %v788_v44 = vrot.slane %v5264_v36, 7  ;;  %v943_v48 = vpack.c.b16 %v936_v37, %v935_v39  ;;  %v776_v49 = vpack.c.bf16 %v5262_v35, %v5262_v35 }
 0x10e   : > { %v784_v16 = vrot.slane %v5262_v35, 7  ;;  %v836_v30 = vrot.slane %v5302_v23, 1  ;;  %v532_v39 = vadd.s32 32, %v5226_v56  ;;  %v915_v41 = vunpack.c.l.b16 %v777_v31 }
 0x10f   : > { %v797_v52 = vsel %vm789_vm2, %v788_v44, %v781_v33  ;;  %1213 = vmatmul.bf16.vlgmr.msra.gmra.mxu3 %v943_v48  ;;  %v914_v58 = vunpack.c.l.b16 %v776_v49  ;;  %v842_v59 = vsel %vm838_vm0, %v833_v42, %v834_v46  ;;  %v843_v1 = vsel %vm838_vm0, %v832_v8, %v833_v42 }
 0x110   : > { %v814_v50 = vsel %vm5272_vm3, %v797_v52, 0.0  ;;  %v866_v2 = vsel %vm5285_vm4, %v842_v59, 0.0  ;;  %v873_v21 = vpack.c.bf16 %v843_v1, %v843_v1  ;;  %v533_v8 = vadd.s32 40, %v5226_v56 }
 0x111   : > { %v822_v43 = vpack.c.bf16 %v814_v50, %v814_v50  ;;  %v920_v62 = vpack.c.b16 %v914_v58, %v913_v57  ;;  %v874_v22 = vpack.c.bf16 %v866_v2, %v866_v2  ;;  %v794_v29 = vsel %vm789_vm2, %v783_v4, %v784_v16 }
 0x112   : > { %v937_v25 = vunpack.c.l.b16 %v873_v21  ;;  %v575_v33 = vand.u32 15, %v533_v8  ;;  %v825_v35 = vpack.c.bf16 %v794_v29, %v794_v29  ;;  %v840_v47 = vsel %vm838_vm0, %v835_v26, %v836_v30 }
 0x113   : > { %v887_v63 = vunpack.c.l.b16 %v822_v43  ;;  %1189 = vmatmul.bf16.gmra.mxu2 %v920_v62  ;;  %v938_v27 = vunpack.c.l.b16 %v874_v22  ;;  %v921_v49 = vpack.c.b16 %v916_v38, %v915_v41  ;;  %v568_v51 = vand.u32 15, %v532_v39  ;;  %v4295_v62 = vld [vmem:[#allocation12 + $0x74] sm:$0xf] }
 0x114   : > { %vm5322_vm6 = vcmp.ne.s32.totalorder %v575_v33, 15  ;;  %v890_v48 = vunpack.c.l.b16 %v825_v35  ;;  %v889_v52 = vunpack.c.l.b16 %v824_v40  ;;  %v785_v57 = vrot.slane %v5260_v34, 7  ;;  %v4291_v22 = vld [vmem:[#allocation12 + $0x54] sm:$0xf]  ;;  %v4289_v33 = vld [vmem:[#allocation12 + $0x44] sm:$0xf] }
 0x115   : > { %v895_v5 = vpack.c.b16 %v888_v0, %v887_v63  ;;  %v944_v37 = vpack.c.b16 %v938_v27, %v937_v25  ;;  %v868_v54 = vsel %vm5322_vm6, %v840_v47, 0.0  ;;  %v841_v50 = vsel %vm838_vm0, %v834_v46, %v835_v26  ;;  %v3755_v63 = vld [vmem:[#allocation12 + $0x78] sm:$0xf0]  ;;  %v4293_v0 = vld [vmem:[#allocation12 + $0x64] sm:$0xf] }
 0x116   : > { %v896_v58 = vpack.c.b16 %v890_v48, %v889_v52  ;;  %v876_v59 = vpack.c.bf16 %v868_v54, %v868_v54  ;;  %vm5335_vm7 = vcmp.ne.s32.totalorder %v568_v51, 0  ;;  %v793_v61 = vsel %vm789_vm2, %v784_v16, %v785_v57  ;;  %v3739_v16 = vld [vmem:[#allocation12 + $0x58] sm:$0xf0]  ;;  %v3731_v35 = vld [vmem:[#allocation12 + $0x48] sm:$0xf0] }
 0x117   : > { %1155 = vmatmul.bf16.vlgmr.msrb.gmra.mxu1 %v895_v5  ;;  %v786_v34 = vrot.slane %v5299_v15, 7  ;;  %v875_v1 = vpack.c.bf16 %v841_v50, %v841_v50  ;;  %v3758_v2 = vor.u32 %v4295_v62, %v3755_v63  ;;  %v780_v4 = vpack.c.bf16 %v5264_v36, %v5264_v36 }
 0x118   : > { %v940_v46 = vunpack.c.l.b16 %v876_v59  ;;  %v818_v5 = vsel %vm5335_vm7, %v793_v61, 0.0  ;;  %v3750_v10 = vor.u32 %v4293_v0, %v3747_v3  ;;  %v589_v21 = vand.u32 15, %v535_v60  ;;  %v3753_v3 = vld [vmem:[#allocation12 + $0x70] sm:$0xf] }
 0x119   : > { %1385 = vmatpush.bf16.msra.mxu1 %v3758_v2  ;;  %v837_v8 = vrot.slane %v5264_v36, 1  ;;  %v939_v7 = vunpack.c.l.b16 %v875_v1  ;;  %v779_v15 = vpack.c.bf16 %v5302_v23, %v5302_v23  ;;  %v792_v25 = vsel %vm789_vm2, %v785_v57, %v786_v34  ;;  %v3745_v36 = vld [vmem:[#allocation12 + $0x60] sm:$0xf] }
 0x11a   : > { %v826_v27 = vpack.c.bf16 %v818_v5, %v818_v5  ;;  %v918_v29 = vunpack.c.l.b16 %v780_v4  ;;  %v3742_v31 = vor.u32 %v4291_v22, %v3739_v16  ;;  %v827_v32 = vpack.c.bf16 %v792_v25, %v792_v25  ;;  %v3723_v5 = vld [vmem:[#allocation12 + $0x38] sm:$0xf0]  ;;  %v3737_v22 = vld [vmem:[#allocation12 + $0x50] sm:$0xf]  ;;  %v4292_v16 = vld [vmem:[#allocation12 + $0x54] sm:$0xf0] }
 0x11b   : > { %v945_v28 = vpack.c.b16 %v940_v46, %v939_v7  ;;  %v917_v26 = vunpack.c.l.b16 %v779_v15  ;;  %vm5352_vm8 = vcmp.ne.s32.totalorder %v589_v21, 15  ;;  %v846_v38 = vsel %vm838_vm0, %v837_v8, %v830_v6  ;;  %v4287_v46 = vld [vmem:[#allocation12 + $0x34] sm:$0xf]  ;;  %v4285_v7 = vld [vmem:[#allocation12 + $0x24] sm:$0xf] }
 0x11c   : > { %v891_v39 = vunpack.c.l.b16 %v826_v27  ;;  %v534_v40 = vadd.s32 48, %v5226_v56  ;;  %v3734_v47 = vor.u32 %v4289_v33, %v3731_v35  ;;  %v892_v48 = vunpack.c.l.b16 %v827_v32  ;;  %v3715_v15 = vld [vmem:[#allocation12 + $0x28] sm:$0xf0]  ;;  %v3729_v27 = vld [vmem:[#allocation12 + $0x40] sm:$0xf] }
 0x11d   : > { %1386 = vmatpush.bf16.msra.mxu1 %v3750_v10  ;;  %v922_v41 = vpack.c.b16 %v918_v29, %v917_v26  ;;  %v870_v51 = vsel %vm5352_vm8, %v846_v38, 0.0  ;;  %v787_v53 = vrot.slane %v5302_v23, 7  ;;  %v4294_v10 = vld [vmem:[#allocation12 + $0x64] sm:$0xf0]  ;;  %v3726_v21 = vor.u32 %v4287_v46, %v3723_v5  ;;  %v3721_v29 = vld [vmem:[#allocation12 + $0x30] sm:$0xf] }
 0x11e   : > { %v897_v52 = vpack.c.b16 %v892_v48, %v891_v39  ;;  %v582_v6 = vand.u32 15, %v534_v40  ;;  %v878_v57 = vpack.c.bf16 %v870_v51, %v870_v51  ;;  %v3718_v25 = vor.u32 %v4285_v7, %v3715_v15  ;;  %v4288_v32 = vld [vmem:[#allocation12 + $0x34] sm:$0xf0]  ;;  %v4283_v33 = vld [vmem:[#allocation12 + $0x14] sm:$0xf] }
 0x11f   : > { %1218 = vmatmul.bf16.gmra.mxu3 %v944_v37  ;;  %v791_v50 = vsel %vm789_vm2, %v786_v34, %v787_v53  ;;  %v790_v23 = vsel %vm789_vm2, %v787_v53, %v788_v44  ;;  %v4296_v34 = vld [vmem:[#allocation12 + $0x74] sm:$0xf0]  ;;  %v3746_v44 = vor.u32 %v4294_v10, %v3745_v36  ;;  %v3707_v35 = vld [vmem:[#allocation12 + $0x18] sm:$0xf0]  ;;  %v3722_v38 = vor.u32 %v4288_v32, %v3721_v29  ;;  %v3713_v39 = vld [vmem:[#allocation12 + $0x20] sm:$0xf] }
 0x120   : > { %vm5368_vm9 = vcmp.ne.s32.totalorder %v582_v6, 0  ;;  %v942_v59 = vunpack.c.l.b16 %v878_v57  ;;  %v829_v61 = vpack.c.bf16 %v790_v23, %v790_v23  ;;  %v3754_v4 = vor.u32 %v4296_v34, %v3753_v3  ;;  %v4286_v40 = vld [vmem:[#allocation12 + $0x24] sm:$0xf0]  ;;  %v4284_v48 = vld [vmem:[#allocation12 + $0x14] sm:$0xf0] }
 0x121   : > { %1387 = vmatpush.bf16.msra.mxu1 %v3742_v31  ;;  %v820_v60 = vsel %vm5368_vm9, %v791_v50, 0.0  ;;  %v3710_v26 = vor.u32 %v4283_v33, %v3707_v35  ;;  %v3699_v51 = vld [vmem:[#allocation12 + $0x8] sm:$0xf0]  ;;  %v4282_v57 = vld [vmem:[#allocation12 + $0x4] sm:$0xf0] }
 0x122   : > { %v828_v63 = vpack.c.bf16 %v820_v60, %v820_v60  ;;  %v894_v0 = vunpack.c.l.b16 %v829_v61  ;;  %1356 = vmatpush.bf16.msrb.mxu0 %v3754_v4  ;;  %v4404_v56 = vld [vmem:[#allocation12 + $0x154] sm:$0xf0] }
 0x123   : > { %1194 = vmatmul.bf16.gmra.mxu2 %v921_v49  ;;  %v839_v49 = vsel %vm838_vm0, %v836_v30, %v837_v8  ;;  %v3738_v8 = vor.u32 %v4292_v16, %v3737_v22 }
 0x124   : > { %v877_v54 = vpack.c.bf16 %v839_v49, %v839_v49  ;;  %v893_v1 = vunpack.c.l.b16 %v828_v63  ;;  %v4281_v49 = vld [vmem:[#allocation12 + $0x4] sm:$0xf] }
 0x125   : > { %1388 = vmatpush.bf16.msra.mxu1 %v3734_v47  ;;  %v3714_v47 = vor.u32 %v4286_v40, %v3713_v39  ;;  %v3702_v53 = vor.u32 %v4281_v49, %v3699_v51  ;;  %v4304_v49 = vld [vmem:[#allocation8 + $0x38] sm:$0xff] }
 0x126   : > { %v941_v30 = vunpack.c.l.b16 %v877_v54  ;;  %v898_v2 = vpack.c.b16 %v894_v0, %v893_v1  ;;  %1357 = vmatpush.bf16.msrb.mxu0 %v3746_v44  ;;  %v3697_v54 = vld [vmem:[#allocation12] sm:$0xf]  ;;  %v4312_v51 = vld [vmem:[#allocation8 + $0x78] sm:$0xff]  ;;  %1603 = vmatpush.bf16.msrb.mxu2 %v4304_v49 }
 0x127   : > { %1160 = vmatmul.bf16.gmra.mxu1 %v896_v58  ;;  %v3698_v50 = vor.u32 %v4282_v57, %v3697_v54  ;;  %1632 = vmatpush.bf16.msrb.mxu3 %v4312_v51  ;;  %v4179_v58 = vld [vmem:[#allocation12 + $0x140] sm:$0xf] }
 0x128   : > { %v946_v62 = vpack.c.b16 %v942_v59, %v941_v30  ;;  %v5383_v30 = vld [vmem:[%s5903_s5] ss:$0 sm:$0xff] }
 0x129   : > { %1389 = vmatpush.bf16.msra.mxu1 %v3726_v21 }
 0x12a   : > { %1358 = vmatpush.bf16.msrb.mxu0 %v3738_v8 }
 0x12d   : > { %1390 = vmatpush.bf16.msra.mxu1 %v3718_v25 }
 0x12f   : > { %1223 = vmatmul.bf16.gmra.mxu3 %v945_v28  ;;  %v4290_v28 = vld [vmem:[#allocation12 + $0x44] sm:$0xf0] }
 0x130   : > { %v3730_v31 = vor.u32 %v4290_v28, %v3729_v27 }
 0x131   : > { %1391 = vmatpush.bf16.msra.mxu1 %v3710_v26 }
 0x132   : > { %1359 = vmatpush.bf16.msrb.mxu0 %v3730_v31 }
 0x133   : > { %1199 = vmatmul.bf16.gmra.mxu2 %v922_v41  ;;  %v3705_v41 = vld [vmem:[#allocation12 + $0x10] sm:$0xf] }
 0x135   : > { %1392 = vmatpush.bf16.msra.mxu1 %v3702_v53 }
 0x136   : > { %1360 = vmatpush.bf16.msrb.mxu0 %v3722_v38 }
 0x137   : > { %1165 = vmatmul.bf16.gmra.mxu1 %v897_v52  ;;  %v3706_v52 = vor.u32 %v4284_v48, %v3705_v41 }
 0x13a   : > { %1361 = vmatpush.bf16.msrb.mxu0 %v3714_v47 }
 0x13e   : > { %1362 = vmatpush.bf16.msrb.mxu0 %v3706_v52  ;;  %v4303_v52 = vld [vmem:[#allocation8 + $0x30] sm:$0xff] }
 0x13f   : > { %1228 = vmatmul.bf16.gmra.mxu3 %v946_v62  ;;  %1604 = vmatpush.bf16.msrb.mxu2 %v4303_v52 }
 0x142   : > { %1363 = vmatpush.bf16.msrb.mxu0 %v3698_v50 }
 0x147   : > { %1170 = vmatmul.bf16.gmra.mxu1 %v898_v2 }
 0x186   : > { %v1185_v6 = vpop.f32.mrf.mxu2 }
 0x18e   : > { %v1187_v59 = vpop.f32.mrf.mxu2 }
 0x192   : > { %v1214_v23 = vpop.f32.mrf.mxu3 }
 0x194   : > { %v1156_v60 = vpop.f32.mrf.mxu1 }
 0x195   : > { %v1157_v61 = vadd.f32 %v5383_v30, %v1156_v60  ;;  %v4302_v60 = vld [vmem:[#allocation8 + $0x28] sm:$0xff] }
 0x196   : > { %v1190_v0 = vpop.f32.mrf.mxu2  ;;  %1605 = vmatpush.bf16.msrb.mxu2 %v4302_v60 }
 0x197   : > { %v1186_v62 = vadd.f32 %v1185_v6, %v1157_v61  ;;  %v4311_v6 = vld [vmem:[#allocation8 + $0x70] sm:$0xff]  ;;  %v4310_v61 = vld [vmem:[#allocation8 + $0x68] sm:$0xff] }
 0x198   : > { %1633 = vmatpush.bf16.msrb.mxu3 %v4311_v6 }
 0x199   : > { %v1215_v2 = vadd.f32 %v1214_v23, %v1186_v62 }
 0x19a   : > { %v1216_v63 = vpop.f32.mrf.mxu3 }
 0x19b   : > { %v1234_v46 = vmul.f32 0.01, %v1215_v2 }
 0x19c   : > { %v1158_v1 = vpop.f32.mrf.mxu1  ;;  %1634 = vmatpush.bf16.msrb.mxu3 %v4310_v61 }
 0x19d   : > { %v1159_v3 = vadd.f32 %v5383_v30, %v1158_v1  ;;  %v1242_v44 = vmax.f32 %v1215_v2, %v1234_v46  ;;  %v4301_v1 = vld [vmem:[#allocation8 + $0x20] sm:$0xff] }
 0x19e   : > { %v1192_v16 = vpop.f32.mrf.mxu2  ;;  %v4309_v2 = vld [vmem:[#allocation8 + $0x60] sm:$0xff]  ;;  %1606 = vmatpush.bf16.msrb.mxu2 %v4301_v1 }
 0x19f   : > { %v1188_v34 = vadd.f32 %v1187_v59, %v1159_v3 }
 0x1a0   : > { %1635 = vmatpush.bf16.msrb.mxu3 %v4309_v2 }
 0x1a1   : > { %v1217_v4 = vadd.f32 %v1216_v63, %v1188_v34 }
 0x1a2   : > { %v1219_v36 = vpop.f32.mrf.mxu3 }
 0x1a3   : > { %v1235_v5 = vmul.f32 0.01, %v1217_v4 }
 0x1a4   : > { %v1161_v10 = vpop.f32.mrf.mxu1 }
 0x1a5   : > { %v1162_v21 = vadd.f32 %v5383_v30, %v1161_v10  ;;  %v1243_v22 = vmax.f32 %v1217_v4, %v1235_v5 }
 0x1a6   : > { %v1195_v31 = vpop.f32.mrf.mxu2 }
 0x1a7   : > { %v1250_v8 = vpack.c.bf16 %v1243_v22, %v1242_v44  ;;  %v1191_v7 = vadd.f32 %v1190_v0, %v1162_v21  ;;  %v4300_v21 = vld [vmem:[#allocation8 + $0x18] sm:$0xff] }
 0x1a8   : > { %v4308_v44 = vld [vmem:[#allocation8 + $0x58] sm:$0xff]  ;;  %1607 = vmatpush.bf16.msrb.mxu2 %v4300_v21 }
 0x1a9   : > { %1364 = vmatmul.bf16.vlgmr.msrb.gmra.mxu0 %v1250_v8  ;;  %1393 = vmatmul.bf16.vlgmr.msra.gmra.mxu1 %v1250_v8  ;;  %v1220_v27 = vadd.f32 %v1219_v36, %v1191_v7  ;;  %v4307_v8 = vld [vmem:[#allocation8 + $0x50] sm:$0xff] }
 0x1aa   : > { %v1221_v15 = vpop.f32.mrf.mxu3  ;;  %1636 = vmatpush.bf16.msrb.mxu3 %v4308_v44 }
 0x1ab   : > { %v1236_v33 = vmul.f32 0.01, %v1220_v27 }
 0x1ac   : > { %v1163_v25 = vpop.f32.mrf.mxu1 }
 0x1ad   : > { %v1164_v28 = vadd.f32 %v5383_v30, %v1163_v25  ;;  %v1244_v40 = vmax.f32 %v1220_v27, %v1236_v33 }
 0x1ae   : > { %v1197_v53 = vpop.f32.mrf.mxu2  ;;  %1637 = vmatpush.bf16.msrb.mxu3 %v4307_v8 }
 0x1af   : > { %v1193_v29 = vadd.f32 %v1192_v16, %v1164_v28  ;;  %v4299_v16 = vld [vmem:[#allocation8 + $0x10] sm:$0xff] }
 0x1b0   : > { %1608 = vmatpush.bf16.msrb.mxu2 %v4299_v16 }
 0x1b1   : > { %v1222_v32 = vadd.f32 %v1221_v15, %v1193_v29 }
 0x1b2   : > { %v1224_v35 = vpop.f32.mrf.mxu3 }
 0x1b3   : > { %v1237_v26 = vmul.f32 0.01, %v1222_v32 }
 0x1b4   : > { %v1166_v38 = vpop.f32.mrf.mxu1 }
 0x1b5   : > { %v1167_v39 = vadd.f32 %v5383_v30, %v1166_v38  ;;  %v1245_v41 = vmax.f32 %v1222_v32, %v1237_v26 }
 0x1b6   : > { %v1200_v3 = vpop.f32.mrf.mxu2 }
 0x1b7   : > { %v1251_v47 = vpack.c.bf16 %v1245_v41, %v1244_v40  ;;  %v1196_v48 = vadd.f32 %v1195_v31, %v1167_v39  ;;  %v4298_v39 = vld [vmem:[#allocation8 + $0x8] sm:$0xff]  ;;  %v4297_v41 = vld [vmem:[#allocation8] sm:$0xff] }
 0x1b8   : > { %v4306_v40 = vld [vmem:[#allocation8 + $0x48] sm:$0xff]  ;;  %1609 = vmatpush.bf16.msrb.mxu2 %v4298_v39 }
 0x1b9   : > { %1369 = vmatmul.bf16.gmra.mxu0 %v1251_v47  ;;  %1398 = vmatmul.bf16.gmra.mxu1 %v1251_v47  ;;  %v1225_v50 = vadd.f32 %v1224_v35, %v1196_v48  ;;  %v4305_v47 = vld [vmem:[#allocation8 + $0x40] sm:$0xff] }
 0x1ba   : > { %v1226_v54 = vpop.f32.mrf.mxu3  ;;  %1638 = vmatpush.bf16.msrb.mxu3 %v4306_v40 }
 0x1bb   : > { %v1238_v63 = vmul.f32 0.01, %v1225_v50 }
 0x1bc   : > { %v1168_v57 = vpop.f32.mrf.mxu1  ;;  %1610 = vmatpush.bf16.msrb.mxu2 %v4297_v41 }
 0x1bd   : > { %v1169_v59 = vadd.f32 %v5383_v30, %v1168_v57  ;;  %v1246_v4 = vmax.f32 %v1225_v50, %v1238_v63 }
 0x1be   : > { %v1202_v27 = vpop.f32.mrf.mxu2  ;;  %1639 = vmatpush.bf16.msrb.mxu3 %v4305_v47 }
 0x1bf   : > { %v1198_v23 = vadd.f32 %v1197_v53, %v1169_v59 }
 0x1c1   : > { %v1227_v62 = vadd.f32 %v1226_v54, %v1198_v23 }
 0x1c2   : > { %v1229_v36 = vpop.f32.mrf.mxu3 }
 0x1c3   : > { %v1239_v0 = vmul.f32 0.01, %v1227_v62 }
 0x1c4   : > { %v1171_v34 = vpop.f32.mrf.mxu1 }
 0x1c5   : > { %v1172_v46 = vadd.f32 %v5383_v30, %v1171_v34  ;;  %v1247_v5 = vmax.f32 %v1227_v62, %v1239_v0 }
 0x1c7   : > { %v1252_v10 = vpack.c.bf16 %v1247_v5, %v1246_v4  ;;  %v1201_v22 = vadd.f32 %v1200_v3, %v1172_v46 }
 0x1c9   : > { %1374 = vmatmul.bf16.gmra.mxu0 %v1252_v10  ;;  %1403 = vmatmul.bf16.gmra.mxu1 %v1252_v10  ;;  %v1230_v15 = vadd.f32 %v1229_v36, %v1201_v22 }
 0x1ca   : > { %v1231_v29 = vpop.f32.mrf.mxu3 }
 0x1cb   : > { %v1240_v32 = vmul.f32 0.01, %v1230_v15 }
 0x1cc   : > { %v1173_v7 = vpop.f32.mrf.mxu1 }
 0x1cd   : > { %v1174_v25 = vadd.f32 %v5383_v30, %v1173_v7  ;;  %v1248_v35 = vmax.f32 %v1230_v15, %v1240_v32  ;;  %v1270_v30 = vld [vmem:[#allocation14] sm:$0x3] }
 0x1ce   : > { %v5393_v48 = vperm.slane %v1270_v30, 0  ;;  %v5395_v49 = vperm.slane %v1270_v30, 1 }
 0x1cf   : > { %v1203_v28 = vadd.f32 %v1202_v27, %v1174_v25 }
 0x1d1   : > { %v1232_v31 = vadd.f32 %v1231_v29, %v1203_v28 }
 0x1d3   : > { %v1241_v33 = vmul.f32 0.01, %v1232_v31 }
 0x1d5   : > { %v1249_v26 = vmax.f32 %v1232_v31, %v1241_v33 }
 0x1d7   : > { %v1253_v38 = vpack.c.bf16 %v1249_v26, %v1248_v35 }
 0x1d9   : > { %1379 = vmatmul.bf16.gmra.mxu0 %v1253_v38  ;;  %1408 = vmatmul.bf16.gmra.mxu1 %v1253_v38 }
 0x226   : > { %v1365_v51 = vpop.f32.mrf.mxu0  ;;  %v1394_v53 = vpop.f32.mrf.mxu1 }
 0x227   : > { %v1366_v52 = vadd.f32 %v1365_v51, %v5393_v48  ;;  %v1395_v6 = vadd.f32 %v1394_v53, %v5395_v49  ;;  %v4328_v53 = vld [vmem:[#allocation11 + $0x138] sm:$0xff] }
 0x228   : > { %2048 = vmatpush.bf16.msrb.mxu1 %v4328_v53  ;;  %v4324_v53 = vld [vmem:[#allocation11 + $0x118] sm:$0xff] }
 0x229   : > { %v1414_v54 = vmul.f32 0.01, %v1366_v52  ;;  %v1415_v57 = vmul.f32 0.01, %v1395_v6 }
 0x22b   : > { %v1430_v61 = vmax.f32 %v1366_v52, %v1414_v54  ;;  %v1431_v62 = vmax.f32 %v1395_v6, %v1415_v57 }
 0x22d   : > { %v5402_v3 = vadd.f32 %v1430_v61, %v5187_v11  ;;  %v5405_v34 = vadd.f32 %v1431_v62, %v5187_v11 }
 0x22e   : > { %v1367_v50 = vpop.f32.mrf.mxu0  ;;  %v1396_v59 = vpop.f32.mrf.mxu1 }
 0x22f   : > { %v1368_v23 = vadd.f32 %v1367_v50, %v5393_v48  ;;  %v1397_v60 = vadd.f32 %v1396_v59, %v5395_v49 }
 0x231   : > { %v1416_v63 = vmul.f32 0.01, %v1368_v23  ;;  %v1417_v0 = vmul.f32 0.01, %v1397_v60 }
 0x233   : > { %v1432_v1 = vmax.f32 %v1368_v23, %v1416_v63  ;;  %v1433_v2 = vmax.f32 %v1397_v60, %v1417_v0 }
 0x235   : > { %v5408_v46 = vadd.f32 %v1432_v1, %v5190_v12  ;;  %v5411_v4 = vadd.f32 %v1433_v2, %v5190_v12 }
 0x236   : > { %v1370_v5 = vpop.f32.mrf.mxu0  ;;  %v1399_v36 = vpop.f32.mrf.mxu1 }
 0x237   : > { %v1462_v10 = vpack.c.bf16 %v5408_v46, %v5402_v3  ;;  %v1463_v21 = vpack.c.bf16 %v5411_v4, %v5405_v34  ;;  %v1371_v44 = vadd.f32 %v1370_v5, %v5393_v48  ;;  %v1400_v22 = vadd.f32 %v1399_v36, %v5395_v49 }
 0x239   : > { %1611 = vmatmul.bf16.vlgmr.msrb.gmra.mxu2 %v1462_v10  ;;  %1640 = vmatmul.bf16.vlgmr.msrb.gmra.mxu3 %v1463_v21  ;;  %v1418_v11 = vmul.f32 0.01, %v1371_v44  ;;  %v1419_v16 = vmul.f32 0.01, %v1400_v22 }
 0x23b   : > { %v1434_v25 = vmax.f32 %v1371_v44, %v1418_v11  ;;  %v1435_v27 = vmax.f32 %v1400_v22, %v1419_v16 }
 0x23d   : > { %v5422_v33 = vadd.f32 %v1434_v25, %v5203_v17  ;;  %v5428_v26 = vadd.f32 %v1435_v27, %v5203_v17  ;;  %v4327_v17 = vld [vmem:[#allocation11 + $0x130] sm:$0xff] }
 0x23e   : > { %v1372_v8 = vpop.f32.mrf.mxu0  ;;  %v1401_v7 = vpop.f32.mrf.mxu1  ;;  %2049 = vmatpush.bf16.msrb.mxu1 %v4327_v17  ;;  %v4320_v17 = vld [vmem:[#allocation11 + $0xf8] sm:$0xff] }
 0x23f   : > { %v1373_v12 = vadd.f32 %v1372_v8, %v5393_v48  ;;  %v1402_v15 = vadd.f32 %v1401_v7, %v5395_v49  ;;  %2019 = vmatpush.bf16.msra.mxu0 %v4320_v17 }
 0x241   : > { %v1420_v28 = vmul.f32 0.01, %v1373_v12  ;;  %v1421_v29 = vmul.f32 0.01, %v1402_v15 }
 0x243   : > { %v1436_v31 = vmax.f32 %v1373_v12, %v1420_v28  ;;  %v1437_v32 = vmax.f32 %v1402_v15, %v1421_v29 }
 0x245   : > { %v5425_v35 = vadd.f32 %v1436_v31, %v5206_v18  ;;  %v5431_v38 = vadd.f32 %v1437_v32, %v5206_v18 }
 0x246   : > { %v1375_v39 = vpop.f32.mrf.mxu0  ;;  %v1404_v40 = vpop.f32.mrf.mxu1 }
 0x247   : > { %v1464_v41 = vpack.c.bf16 %v5425_v35, %v5422_v33  ;;  %v1465_v47 = vpack.c.bf16 %v5431_v38, %v5428_v26  ;;  %v1376_v30 = vadd.f32 %v1375_v39, %v5393_v48  ;;  %v1405_v51 = vadd.f32 %v1404_v40, %v5395_v49 }
 0x249   : > { %1616 = vmatmul.bf16.gmra.mxu2 %v1464_v41  ;;  %1645 = vmatmul.bf16.gmra.mxu3 %v1465_v47  ;;  %v1422_v52 = vmul.f32 0.01, %v1376_v30  ;;  %v1423_v18 = vmul.f32 0.01, %v1405_v51  ;;  %v4326_v47 = vld [vmem:[#allocation11 + $0x128] sm:$0xff] }
 0x24a   : > { %2050 = vmatpush.bf16.msrb.mxu1 %v4326_v47 }
 0x24b   : > { %v1438_v59 = vmax.f32 %v1376_v30, %v1422_v52  ;;  %v1439_v23 = vmax.f32 %v1405_v51, %v1423_v18  ;;  %v4336_v30 = vld [vmem:[#allocation11 + $0x178] sm:$0xff]  ;;  %v4325_v51 = vld [vmem:[#allocation11 + $0x120] sm:$0xff]  ;;  %v4334_v52 = vld [vmem:[#allocation11 + $0x168] sm:$0xff] }
 0x24c   : > { %2077 = vmatpush.bf16.msra.mxu2 %v4336_v30  ;;  %v4322_v18 = vld [vmem:[#allocation11 + $0x108] sm:$0xff] }
 0x24d   : > { %v5442_v0 = vadd.f32 %v1438_v59, %v5193_v13  ;;  %v5448_v2 = vadd.f32 %v1439_v23, %v5193_v13  ;;  %v4332_v59 = vld [vmem:[#allocation11 + $0x158] sm:$0xff] }
 0x24e   : > { %v1377_v6 = vpop.f32.mrf.mxu0  ;;  %v1406_v54 = vpop.f32.mrf.mxu1  ;;  %2051 = vmatpush.bf16.msrb.mxu1 %v4325_v51 }
 0x24f   : > { %v1378_v57 = vadd.f32 %v1377_v6, %v5393_v48  ;;  %v1407_v50 = vadd.f32 %v1406_v54, %v5395_v49  ;;  %v4333_v6 = vld [vmem:[#allocation11 + $0x160] sm:$0xff]  ;;  %v4319_v54 = vld [vmem:[#allocation11 + $0xf0] sm:$0xff] }
 0x250   : > { %2020 = vmatpush.bf16.msra.mxu0 %v4319_v54 }
 0x251   : > { %v1424_v60 = vmul.f32 0.01, %v1378_v57  ;;  %v1425_v61 = vmul.f32 0.01, %v1407_v50 }
 0x252   : > { %2052 = vmatpush.bf16.msrb.mxu1 %v4324_v53 }
 0x253   : > { %v1440_v62 = vmax.f32 %v1378_v57, %v1424_v60  ;;  %v1441_v63 = vmax.f32 %v1407_v50, %v1425_v61  ;;  %v5477_v57 = vld [vmem:[#allocation9 + $0x1] ss:$0 sm:$0xff]  ;;  %v4321_v50 = vld [vmem:[#allocation11 + $0x100] sm:$0xff] }
 0x255   : > { %v5445_v1 = vadd.f32 %v1440_v62, %v5196_v14  ;;  %v5451_v5 = vadd.f32 %v1441_v63, %v5196_v14  ;;  %v4331_v62 = vld [vmem:[#allocation11 + $0x150] sm:$0xff]  ;;  %v4318_v63 = vld [vmem:[#allocation11 + $0xe8] sm:$0xff] }
 0x256   : > { %v1380_v36 = vpop.f32.mrf.mxu0  ;;  %v1409_v10 = vpop.f32.mrf.mxu1  ;;  %2021 = vmatpush.bf16.msra.mxu0 %v4318_v63 }
 0x257   : > { %v1466_v21 = vpack.c.bf16 %v5445_v1, %v5442_v0  ;;  %v1467_v44 = vpack.c.bf16 %v5451_v5, %v5448_v2  ;;  %v1381_v22 = vadd.f32 %v1380_v36, %v5393_v48  ;;  %v1410_v11 = vadd.f32 %v1409_v10, %v5395_v49  ;;  %v4330_v10 = vld [vmem:[#allocation11 + $0x148] sm:$0xff] }
 0x259   : > { %1621 = vmatmul.bf16.gmra.mxu2 %v1466_v21  ;;  %1650 = vmatmul.bf16.gmra.mxu3 %v1467_v44  ;;  %v1426_v16 = vmul.f32 0.01, %v1381_v22  ;;  %v1427_v13 = vmul.f32 0.01, %v1410_v11 }
 0x25b   : > { %v1442_v15 = vmax.f32 %v1381_v22, %v1426_v16  ;;  %v1443_v25 = vmax.f32 %v1410_v11, %v1427_v13  ;;  %v4329_v16 = vld [vmem:[#allocation11 + $0x140] sm:$0xff] }
 0x25c   : > { %v4317_v13 = vld [vmem:[#allocation11 + $0xe0] sm:$0xff] }
 0x25d   : > { %v5462_v32 = vadd.f32 %v1442_v15, %v5209_v19  ;;  %v5468_v40 = vadd.f32 %v1443_v25, %v5209_v19  ;;  %v4335_v19 = vld [vmem:[#allocation11 + $0x170] sm:$0xff]  ;;  %2022 = vmatpush.bf16.msra.mxu0 %v4317_v13 }
 0x25e   : > { %v1382_v8 = vpop.f32.mrf.mxu0  ;;  %v1411_v7 = vpop.f32.mrf.mxu1  ;;  %2078 = vmatpush.bf16.msra.mxu2 %v4335_v19 }
 0x25f   : > { %v1383_v14 = vadd.f32 %v1382_v8, %v5393_v48  ;;  %v1412_v12 = vadd.f32 %v1411_v7, %v5395_v49 }
 0x261   : > { %v1428_v27 = vmul.f32 0.01, %v1383_v14  ;;  %v1429_v28 = vmul.f32 0.01, %v1412_v12 }
 0x262   : > { %2079 = vmatpush.bf16.msra.mxu2 %v4334_v52 }
 0x263   : > { %v1444_v29 = vmax.f32 %v1383_v14, %v1428_v27  ;;  %v1445_v31 = vmax.f32 %v1412_v12, %v1429_v28 }
 0x265   : > { %v5465_v39 = vadd.f32 %v1444_v29, %v5212_v20  ;;  %v5471_v41 = vadd.f32 %v1445_v31, %v5212_v20  ;;  %v4323_v20 = vld [vmem:[#allocation11 + $0x110] sm:$0xff]  ;;  %v4316_v31 = vld [vmem:[#allocation11 + $0xd8] sm:$0xff] }
 0x266   : > { %2053 = vmatpush.bf16.msrb.mxu1 %v4323_v20  ;;  %2080 = vmatpush.bf16.msra.mxu2 %v4333_v6 }
 0x267   : > { %v1468_v48 = vpack.c.bf16 %v5465_v39, %v5462_v32  ;;  %v1469_v49 = vpack.c.bf16 %v5471_v41, %v5468_v40  ;;  %2023 = vmatpush.bf16.msra.mxu0 %v4316_v31 }
 0x269   : > { %1626 = vmatmul.bf16.gmra.mxu2 %v1468_v48  ;;  %1655 = vmatmul.bf16.gmra.mxu3 %v1469_v49 }
 0x26a   : > { %2054 = vmatpush.bf16.msrb.mxu1 %v4322_v18  ;;  %2081 = vmatpush.bf16.msra.mxu2 %v4332_v59 }
 0x26e   : > { %2055 = vmatpush.bf16.msrb.mxu1 %v4321_v50  ;;  %2082 = vmatpush.bf16.msra.mxu2 %v4331_v62  ;;  %v4315_v50 = vld [vmem:[#allocation11 + $0xd0] sm:$0xff] }
 0x26f   : > { %2024 = vmatpush.bf16.msra.mxu0 %v4315_v50 }
 0x272   : > { %2083 = vmatpush.bf16.msra.mxu2 %v4330_v10 }
 0x276   : > { %2084 = vmatpush.bf16.msra.mxu2 %v4329_v16 }
 0x2bc   : > { %v1612_v23 = vpop.f32.mrf.mxu2  ;;  %v1641_v60 = vpop.f32.mrf.mxu3 }
 0x2bd   : > { %v1613_v61 = vadd.f32 %v5477_v57, %v1612_v23 }
 0x2bf   : > { %v1642_v36 = vadd.f32 %v1641_v60, %v1613_v61 }
 0x2c1   : > { %v1661_v21 = vmul.f32 0.01, %v1642_v36 }
 0x2c3   : > { %v5481_v8 = vmax.f32 %v1642_v36, %v1661_v21 }
 0x2c4   : > { %v1614_v44 = vpop.f32.mrf.mxu2  ;;  %v1643_v22 = vpop.f32.mrf.mxu3 }
 0x2c5   : > { %v1615_v11 = vadd.f32 %v5477_v57, %v1614_v44  ;;  %v1677_v12 = vpack.c.bf16 %v5481_v8, %v5481_v8  ;;  %v1717_v19 = vrot.slane %v5481_v8, 1 }
 0x2c7   : > { %v1644_v7 = vadd.f32 %v1643_v22, %v1615_v11  ;;  %v1781_v48 = vunpack.c.l.b16 %v1677_v12 }
 0x2c9   : > { %v1662_v14 = vmul.f32 0.01, %v1644_v7 }
 0x2cb   : > { %v5485_v15 = vmax.f32 %v1644_v7, %v1662_v14  ;;  %v4314_v7 = vld [vmem:[#allocation11 + $0xc8] sm:$0xff] }
 0x2cc   : > { %v1617_v25 = vpop.f32.mrf.mxu2  ;;  %v1646_v27 = vpop.f32.mrf.mxu3  ;;  %2025 = vmatpush.bf16.msra.mxu0 %v4314_v7 }
 0x2cd   : > { %v1678_v28 = vpack.c.bf16 %v5485_v15, %v5485_v15  ;;  %v1618_v29 = vadd.f32 %v5477_v57, %v1617_v25  ;;  %v1718_v30 = vrot.slane %v5485_v15, 1  ;;  %v4313_v25 = vld [vmem:[#allocation11 + $0xc0] sm:$0xff] }
 0x2cf   : > { %v1782_v49 = vunpack.c.l.b16 %v1678_v28  ;;  %v1647_v47 = vadd.f32 %v1646_v27, %v1618_v29  ;;  %v1731_v18 = vsel %vm838_vm0, %v1717_v19, %v1718_v30 }
 0x2d0   : > { %v1741_v60 = vpack.c.bf16 %v1731_v18, %v1731_v18  ;;  %2026 = vmatpush.bf16.msra.mxu0 %v4313_v25 }
 0x2d1   : > { %v1663_v51 = vmul.f32 0.01, %v1647_v47  ;;  %v1789_v53 = vpack.c.b16 %v1782_v49, %v1781_v48 }
 0x2d2   : > { %v1805_v10 = vunpack.c.l.b16 %v1741_v60 }
 0x2d3   : > { %v5492_v17 = vmax.f32 %v1647_v47, %v1663_v51  ;;  %2056 = vmatmul.bf16.vlgmr.msrb.gmra.mxu1 %v1789_v53 }
 0x2d4   : > { %v1619_v20 = vpop.f32.mrf.mxu2  ;;  %v1648_v52 = vpop.f32.mrf.mxu3 }
 0x2d5   : > { %v1719_v6 = vrot.slane %v5492_v17, 1  ;;  %v1620_v54 = vadd.f32 %v5477_v57, %v1619_v20  ;;  %v1679_v11 = vpack.c.bf16 %v5492_v17, %v5492_v17 }
 0x2d7   : > { %v1649_v59 = vadd.f32 %v1648_v52, %v1620_v54  ;;  %v1730_v23 = vsel %vm838_vm0, %v1718_v30, %v1719_v6  ;;  %v1783_v28 = vunpack.c.l.b16 %v1679_v11 }
 0x2d8   : > { %v1734_v61 = vsel %vm5241_vm1, %v1730_v23, 0.0 }
 0x2d9   : > { %v1664_v62 = vmul.f32 0.01, %v1649_v59  ;;  %v1742_v63 = vpack.c.bf16 %v1734_v61, %v1734_v61 }
 0x2db   : > { %v5504_v36 = vmax.f32 %v1649_v59, %v1664_v62  ;;  %v1806_v21 = vunpack.c.l.b16 %v1742_v63 }
 0x2dc   : > { %v1622_v44 = vpop.f32.mrf.mxu2  ;;  %v1651_v22 = vpop.f32.mrf.mxu3 }
 0x2dd   : > { %v1623_v16 = vadd.f32 %v5477_v57, %v1622_v44  ;;  %v1813_v13 = vpack.c.b16 %v1806_v21, %v1805_v10  ;;  %v1680_v14 = vpack.c.bf16 %v5504_v36, %v5504_v36  ;;  %v1720_v27 = vrot.slane %v5504_v36, 1 }
 0x2df   : > { %v1652_v12 = vadd.f32 %v1651_v22, %v1623_v16  ;;  %2085 = vmatmul.bf16.vlgmr.msra.gmra.mxu2 %v1813_v13  ;;  %v1784_v29 = vunpack.c.l.b16 %v1680_v14  ;;  %v1729_v51 = vsel %vm838_vm0, %v1719_v6, %v1720_v27 }
 0x2e0   : > { %v1743_v54 = vpack.c.bf16 %v1729_v51, %v1729_v51 }
 0x2e1   : > { %v1665_v31 = vmul.f32 0.01, %v1652_v12  ;;  %v1790_v48 = vpack.c.b16 %v1784_v29, %v1783_v28 }
 0x2e2   : > { %v1807_v61 = vunpack.c.l.b16 %v1743_v54 }
 0x2e3   : > { %v5512_v49 = vmax.f32 %v1652_v12, %v1665_v31  ;;  %2061 = vmatmul.bf16.gmra.mxu1 %v1790_v48  ;;  %v1686_v48 = vrot.slane %v5485_v15, 7 }
 0x2e4   : > { %v1624_v47 = vpop.f32.mrf.mxu2  ;;  %v1653_v30 = vpop.f32.mrf.mxu3 }
 0x2e5   : > { %v1721_v53 = vrot.slane %v5512_v49, 1  ;;  %v1625_v20 = vadd.f32 %v5477_v57, %v1624_v47  ;;  %v1681_v10 = vpack.c.bf16 %v5512_v49, %v5512_v49 }
 0x2e7   : > { %v1654_v52 = vadd.f32 %v1653_v30, %v1625_v20  ;;  %v1728_v18 = vsel %vm838_vm0, %v1720_v27, %v1721_v53  ;;  %v1785_v13 = vunpack.c.l.b16 %v1681_v10 }
 0x2e8   : > { %v1736_v50 = vsel %vm5285_vm4, %v1728_v18, 0.0 }
 0x2e9   : > { %v1666_v59 = vmul.f32 0.01, %v1654_v52  ;;  %v1744_v23 = vpack.c.bf16 %v1736_v50, %v1736_v50 }
 0x2eb   : > { %v5522_v60 = vmax.f32 %v1654_v52, %v1666_v59  ;;  %v1808_v62 = vunpack.c.l.b16 %v1744_v23  ;;  %v1685_v52 = vrot.slane %v5481_v8, 7 }
 0x2ec   : > { %v1627_v63 = vpop.f32.mrf.mxu2  ;;  %v1656_v6 = vpop.f32.mrf.mxu3 }
 0x2ed   : > { %v1628_v21 = vadd.f32 %v5477_v57, %v1627_v63  ;;  %v1814_v44 = vpack.c.b16 %v1808_v62, %v1807_v61  ;;  %v1682_v22 = vpack.c.bf16 %v5522_v60, %v5522_v60  ;;  %v1722_v16 = vrot.slane %v5522_v60, 1 }
 0x2ef   : > { %v1657_v11 = vadd.f32 %v1656_v6, %v1628_v21  ;;  %2090 = vmatmul.bf16.gmra.mxu2 %v1814_v44  ;;  %v1786_v7 = vunpack.c.l.b16 %v1682_v22  ;;  %v1727_v28 = vsel %vm838_vm0, %v1721_v53, %v1722_v16  ;;  %v1699_v53 = vsel %vm789_vm2, %v1685_v52, %v1686_v48 }
 0x2f0   : > { %v1745_v20 = vpack.c.bf16 %v1727_v28, %v1727_v28  ;;  %v1710_v10 = vpack.c.bf16 %v1699_v53, %v1699_v53 }
 0x2f1   : > { %v1667_v14 = vmul.f32 0.01, %v1657_v11  ;;  %v1791_v12 = vpack.c.b16 %v1786_v7, %v1785_v13 }
 0x2f2   : > { %v1758_v28 = vunpack.c.l.b16 %v1710_v10 }
 0x2f3   : > { %v5530_v25 = vmax.f32 %v1657_v11, %v1667_v14  ;;  %2066 = vmatmul.bf16.gmra.mxu1 %v1791_v12 }
 0x2f4   : > { %v1629_v27 = vpop.f32.mrf.mxu2  ;;  %v1658_v47 = vpop.f32.mrf.mxu3 }
 0x2f5   : > { %v1723_v29 = vrot.slane %v5530_v25, 1  ;;  %v1630_v31 = vadd.f32 %v5477_v57, %v1629_v27  ;;  %v1809_v57 = vunpack.c.l.b16 %v1745_v20  ;;  %v1683_v15 = vpack.c.bf16 %v5530_v25, %v5530_v25 }
 0x2f7   : > { %v1659_v30 = vadd.f32 %v1658_v47, %v1630_v31  ;;  %v1726_v51 = vsel %vm838_vm0, %v1722_v16, %v1723_v29  ;;  %v1787_v21 = vunpack.c.l.b16 %v1683_v15  ;;  %v1687_v31 = vrot.slane %v5492_v17, 7 }
 0x2f8   : > { %v1738_v18 = vsel %vm5322_vm6, %v1726_v51, 0.0 }
 0x2f9   : > { %v1668_v54 = vmul.f32 0.01, %v1659_v30  ;;  %v1746_v50 = vpack.c.bf16 %v1738_v18, %v1738_v18 }
 0x2fb   : > { %v1676_v59 = vmax.f32 %v1659_v30, %v1668_v54  ;;  %v1810_v23 = vunpack.c.l.b16 %v1746_v50 }
 0x2fd   : > { %v1692_v61 = vrot.slane %v1676_v59, 7  ;;  %v1724_v62 = vrot.slane %v1676_v59, 1  ;;  %v1815_v63 = vpack.c.b16 %v1810_v23, %v1809_v57  ;;  %v1684_v6 = vpack.c.bf16 %v1676_v59, %v1676_v59 }
 0x2fe   : > { %v1690_v23 = vrot.slane %v5522_v60, 7 }
 0x2ff   : > { %2095 = vmatmul.bf16.gmra.mxu2 %v1815_v63  ;;  %v1788_v44 = vunpack.c.l.b16 %v1684_v6  ;;  %v1700_v22 = vsel %vm789_vm2, %v1692_v61, %v1685_v52  ;;  %v1732_v11 = vsel %vm838_vm0, %v1724_v62, %v1717_v19  ;;  %v1725_v14 = vsel %vm838_vm0, %v1723_v29, %v1724_v62 }
 0x300   : > { %v1701_v16 = vsel %vm5272_vm3, %v1700_v22, 0.0  ;;  %v1740_v12 = vsel %vm5352_vm8, %v1732_v11, 0.0  ;;  %v1747_v47 = vpack.c.bf16 %v1725_v14, %v1725_v14  ;;  %v1688_v19 = vrot.slane %v5504_v36, 7 }
 0x301   : > { %v1792_v13 = vpack.c.b16 %v1788_v44, %v1787_v21  ;;  %v1709_v7 = vpack.c.bf16 %v1701_v16, %v1701_v16  ;;  %v1748_v30 = vpack.c.bf16 %v1740_v12, %v1740_v12  ;;  %v1698_v52 = vsel %vm789_vm2, %v1686_v48, %v1687_v31 }
 0x302   : > { %v1811_v51 = vunpack.c.l.b16 %v1747_v47  ;;  %v1697_v29 = vsel %vm789_vm2, %v1687_v31, %v1688_v19  ;;  %v1703_v18 = vsel %vm5305_vm5, %v1698_v52, 0.0  ;;  %v1689_v36 = vrot.slane %v5512_v49, 7 }
 0x303   : > { %v1757_v27 = vunpack.c.l.b16 %v1709_v7  ;;  %2071 = vmatmul.bf16.gmra.mxu1 %v1792_v13  ;;  %v1812_v20 = vunpack.c.l.b16 %v1748_v30  ;;  %v1712_v50 = vpack.c.bf16 %v1697_v29, %v1697_v29  ;;  %v1711_v17 = vpack.c.bf16 %v1703_v18, %v1703_v18  ;;  %v3970_v30 = vld [vmem:[#allocation12 + $0xe0] sm:$0xf]  ;;  %v3962_v29 = vld [vmem:[#allocation12 + $0xd0] sm:$0xf]  ;;  %v4348_v18 = vld [vmem:[#allocation12 + $0xd4] sm:$0xf0] }
 0x304   : > { %v1696_v48 = vsel %vm789_vm2, %v1688_v19, %v1689_v36  ;;  %v1695_v15 = vsel %vm789_vm2, %v1689_v36, %v1690_v23  ;;  %v1691_v44 = vrot.slane %v5530_v25, 7  ;;  %v4351_v25 = vld [vmem:[#allocation12 + $0xf4] sm:$0xf]  ;;  %v4350_v19 = vld [vmem:[#allocation12 + $0xe4] sm:$0xf0] }
 0x305   : > { %v1765_v8 = vpack.c.b16 %v1758_v28, %v1757_v27  ;;  %v1816_v54 = vpack.c.b16 %v1812_v20, %v1811_v51  ;;  %v1760_v53 = vunpack.c.l.b16 %v1712_v50  ;;  %v1759_v59 = vunpack.c.l.b16 %v1711_v17  ;;  %v3978_v27 = vld [vmem:[#allocation12 + $0xf0] sm:$0xf]  ;;  %v4352_v28 = vld [vmem:[#allocation12 + $0xf4] sm:$0xf0]  ;;  %v4349_v51 = vld [vmem:[#allocation12 + $0xe4] sm:$0xf] }
 0x306   : > { %v1705_v62 = vsel %vm5335_vm7, %v1696_v48, 0.0  ;;  %v1714_v63 = vpack.c.bf16 %v1695_v15, %v1695_v15  ;;  %v1694_v60 = vsel %vm789_vm2, %v1690_v23, %v1691_v44  ;;  %v1693_v22 = vsel %vm789_vm2, %v1691_v44, %v1692_v61  ;;  %v3972_v20 = vld [vmem:[#allocation12 + $0xe8] sm:$0xf0]  ;;  %v4347_v50 = vld [vmem:[#allocation12 + $0xd4] sm:$0xf] }
 0x307   : > { %2027 = vmatmul.bf16.vlgmr.msra.gmra.mxu0 %v1765_v8  ;;  %v1766_v57 = vpack.c.b16 %v1760_v53, %v1759_v59  ;;  %v1713_v6 = vpack.c.bf16 %v1705_v62, %v1705_v62  ;;  %v1707_v11 = vsel %vm5368_vm9, %v1694_v60, 0.0  ;;  %v1716_v16 = vpack.c.bf16 %v1693_v22, %v1693_v22  ;;  %v3980_v8 = vld [vmem:[#allocation12 + $0xf8] sm:$0xf0]  ;;  %v3954_v59 = vld [vmem:[#allocation12 + $0xc0] sm:$0xf] }
 0x308   : > { %v1762_v10 = vunpack.c.l.b16 %v1714_v63  ;;  %v1715_v13 = vpack.c.bf16 %v1707_v11, %v1707_v11  ;;  %v3979_v31 = vor.u32 %v4352_v28, %v3978_v27  ;;  %v3983_v47 = vor.u32 %v4351_v25, %v3980_v8  ;;  %v3964_v17 = vld [vmem:[#allocation12 + $0xd8] sm:$0xf0]  ;;  %v4346_v36 = vld [vmem:[#allocation12 + $0xc4] sm:$0xf0]  ;;  %v4345_v23 = vld [vmem:[#allocation12 + $0xc4] sm:$0xf] }
 0x309   : > { %v1761_v21 = vunpack.c.l.b16 %v1713_v6  ;;  %v1764_v7 = vunpack.c.l.b16 %v1716_v16  ;;  %v3971_v61 = vor.u32 %v4350_v19, %v3970_v30  ;;  %v3975_v52 = vor.u32 %v4349_v51, %v3972_v20  ;;  %v3956_v48 = vld [vmem:[#allocation12 + $0xc8] sm:$0xf0]  ;;  %v3946_v62 = vld [vmem:[#allocation12 + $0xb0] sm:$0xf]  ;;  %v4344_v63 = vld [vmem:[#allocation12 + $0xb4] sm:$0xf0] }
 0x30a   : > { %v1763_v14 = vunpack.c.l.b16 %v1715_v13  ;;  %2230 = vmatpush.bf16.msra.mxu3 %v3979_v31  ;;  %2259 = vmatpush.bf16.msrb.mxu0 %v3983_v47  ;;  %v3967_v53 = vor.u32 %v4347_v50, %v3964_v17  ;;  %v3959_v15 = vor.u32 %v4345_v23, %v3956_v48  ;;  %v3947_v6 = vor.u32 %v4344_v63, %v3946_v62  ;;  %v4342_v60 = vld [vmem:[#allocation12 + $0xa4] sm:$0xf0]  ;;  %v4341_v11 = vld [vmem:[#allocation12 + $0xa4] sm:$0xf]  ;;  %v3940_v16 = vld [vmem:[#allocation12 + $0xa8] sm:$0xf0] }
 0x30b   : > { %v1767_v49 = vpack.c.b16 %v1762_v10, %v1761_v21  ;;  %v4343_v10 = vld [vmem:[#allocation12 + $0xb4] sm:$0xf]  ;;  %v3948_v21 = vld [vmem:[#allocation12 + $0xb8] sm:$0xf0]  ;;  %v3943_v13 = vor.u32 %v4341_v11, %v3940_v16  ;;  %v3922_v31 = vld [vmem:[#allocation12 + $0x80] sm:$0xf] }
 0x30c   : > { %v1768_v12 = vpack.c.b16 %v1764_v7, %v1763_v14  ;;  %v3951_v44 = vor.u32 %v4343_v10, %v3948_v21  ;;  %v3930_v7 = vld [vmem:[#allocation12 + $0x90] sm:$0xf]  ;;  %v4340_v14 = vld [vmem:[#allocation12 + $0x94] sm:$0xf0]  ;;  %v3932_v28 = vld [vmem:[#allocation12 + $0x98] sm:$0xf0] }
 0x30d   : > { %v3931_v27 = vor.u32 %v4340_v14, %v3930_v7  ;;  %v4338_v8 = vld [vmem:[#allocation12 + $0x84] sm:$0xf0]  ;;  %v4337_v47 = vld [vmem:[#allocation12 + $0x84] sm:$0xf]  ;;  %v3924_v19 = vld [vmem:[#allocation12 + $0x88] sm:$0xf0] }
 0x30e   : > { %2231 = vmatpush.bf16.msra.mxu3 %v3971_v61  ;;  %2260 = vmatpush.bf16.msrb.mxu0 %v3975_v52  ;;  %v3923_v30 = vor.u32 %v4338_v8, %v3922_v31  ;;  %v3927_v61 = vor.u32 %v4337_v47, %v3924_v19  ;;  %v5584_v52 = vld [vmem:[%s5903_s5 + $0x1] ss:$0 sm:$0xff] }
 0x30f   : > { %2100 = vmatmul.bf16.gmra.mxu2 %v1816_v54  ;;  %v3963_v54 = vor.u32 %v4348_v18, %v3962_v29 }
 0x312   : > { %2232 = vmatpush.bf16.msra.mxu3 %v3963_v54  ;;  %2261 = vmatpush.bf16.msrb.mxu0 %v3967_v53 }
 0x316   : > { %2262 = vmatpush.bf16.msrb.mxu0 %v3959_v15 }
 0x317   : > { %2032 = vmatmul.bf16.gmra.mxu0 %v1766_v57  ;;  %v3955_v57 = vor.u32 %v4346_v36, %v3954_v59 }
 0x319   : > { %2233 = vmatpush.bf16.msra.mxu3 %v3955_v57 }
 0x31a   : > { %2263 = vmatpush.bf16.msrb.mxu0 %v3951_v44 }
 0x31d   : > { %2234 = vmatpush.bf16.msra.mxu3 %v3947_v6 }
 0x31e   : > { %2264 = vmatpush.bf16.msrb.mxu0 %v3943_v13 }
 0x327   : > { %2037 = vmatmul.bf16.gmra.mxu0 %v1767_v49  ;;  %v3938_v49 = vld [vmem:[#allocation12 + $0xa0] sm:$0xf] }
 0x328   : > { %v3939_v22 = vor.u32 %v4342_v60, %v3938_v49 }
 0x32a   : > { %2235 = vmatpush.bf16.msra.mxu3 %v3939_v22 }
 0x32e   : > { %2236 = vmatpush.bf16.msra.mxu3 %v3931_v27 }
 0x332   : > { %2237 = vmatpush.bf16.msra.mxu3 %v3923_v30 }
 0x337   : > { %2042 = vmatmul.bf16.gmra.mxu0 %v1768_v12  ;;  %v4339_v12 = vld [vmem:[#allocation12 + $0x94] sm:$0xf] }
 0x338   : > { %v3935_v25 = vor.u32 %v4339_v12, %v3932_v28 }
 0x33a   : > { %2265 = vmatpush.bf16.msrb.mxu0 %v3935_v25 }
 0x33e   : > { %2266 = vmatpush.bf16.msrb.mxu0 %v3927_v61 }
 0x350   : > { %v2057_v51 = vpop.f32.mrf.mxu1 }
 0x358   : > { %v2059_v29 = vpop.f32.mrf.mxu1 }
 0x360   : > { %v2062_v53 = vpop.f32.mrf.mxu1 }
 0x362   : > { %v2086_v20 = vpop.f32.mrf.mxu2 }
 0x368   : > { %v2064_v49 = vpop.f32.mrf.mxu1 }
 0x36a   : > { %v2088_v18 = vpop.f32.mrf.mxu2 }
 0x370   : > { %v2067_v12 = vpop.f32.mrf.mxu1 }
 0x372   : > { %v2091_v23 = vpop.f32.mrf.mxu2 }
 0x37a   : > { %v2093_v22 = vpop.f32.mrf.mxu2 }
 0x382   : > { %v2096_v25 = vpop.f32.mrf.mxu2 }
 0x384   : > { %v2028_v54 = vpop.f32.mrf.mxu0 }
 0x385   : > { %v2029_v50 = vadd.f32 %v5584_v52, %v2028_v54  ;;  %v4367_v54 = vld [vmem:[#allocation8 + $0xf0] sm:$0xff] }
 0x387   : > { %v2058_v17 = vadd.f32 %v2057_v51, %v2029_v50  ;;  %v4359_v50 = vld [vmem:[#allocation8 + $0xb0] sm:$0xff] }
 0x389   : > { %v2087_v36 = vadd.f32 %v2086_v20, %v2058_v17  ;;  %v4368_v20 = vld [vmem:[#allocation8 + $0xf8] sm:$0xff] }
 0x38a   : > { %2507 = vmatpush.bf16.msrb.mxu2 %v4368_v20  ;;  %v2098_v17 = vpop.f32.mrf.mxu2 }
 0x38b   : > { %v2106_v15 = vmul.f32 0.01, %v2087_v36 }
 0x38c   : > { %v2030_v59 = vpop.f32.mrf.mxu0 }
 0x38d   : > { %v2031_v57 = vadd.f32 %v5584_v52, %v2030_v59  ;;  %v2114_v10 = vmax.f32 %v2087_v36, %v2106_v15 }
 0x38e   : > { %2508 = vmatpush.bf16.msrb.mxu2 %v4367_v54  ;;  %v4362_v54 = vld [vmem:[#allocation8 + $0xc8] sm:$0xff] }
 0x38f   : > { %v2060_v48 = vadd.f32 %v2059_v29, %v2031_v57  ;;  %v4360_v29 = vld [vmem:[#allocation8 + $0xb8] sm:$0xff] }
 0x390   : > { %2478 = vmatpush.bf16.msra.mxu1 %v4360_v29 }
 0x391   : > { %v2089_v62 = vadd.f32 %v2088_v18, %v2060_v48  ;;  %v2069_v18 = vpop.f32.mrf.mxu1  ;;  %v4358_v48 = vld [vmem:[#allocation8 + $0xa8] sm:$0xff] }
 0x393   : > { %v2107_v63 = vmul.f32 0.01, %v2089_v62 }
 0x394   : > { %v2033_v6 = vpop.f32.mrf.mxu0  ;;  %2479 = vmatpush.bf16.msra.mxu1 %v4359_v50  ;;  %v4354_v50 = vld [vmem:[#allocation8 + $0x88] sm:$0xff] }
 0x395   : > { %v2115_v21 = vmax.f32 %v2089_v62, %v2107_v63  ;;  %v2034_v44 = vadd.f32 %v5584_v52, %v2033_v6  ;;  %v4365_v6 = vld [vmem:[#allocation8 + $0xe0] sm:$0xff] }
 0x397   : > { %v2122_v60 = vpack.c.bf16 %v2115_v21, %v2114_v10  ;;  %v2063_v11 = vadd.f32 %v2062_v53, %v2034_v44  ;;  %v4357_v10 = vld [vmem:[#allocation8 + $0xa0] sm:$0xff] }
 0x398   : > { %2480 = vmatpush.bf16.msra.mxu1 %v4358_v48 }
 0x399   : > { %2238 = vmatmul.bf16.vlgmr.msra.gmra.mxu3 %v2122_v60  ;;  %2267 = vmatmul.bf16.vlgmr.msrb.gmra.mxu0 %v2122_v60  ;;  %v2092_v13 = vadd.f32 %v2091_v23, %v2063_v11  ;;  %v4366_v23 = vld [vmem:[#allocation8 + $0xe8] sm:$0xff]  ;;  %v2072_v21 = vpop.f32.mrf.mxu1  ;;  %v2101_v11 = vpop.f32.mrf.mxu2 }
 0x39a   : > { %2509 = vmatpush.bf16.msrb.mxu2 %v4366_v23 }
 0x39b   : > { %v2108_v28 = vmul.f32 0.01, %v2092_v13 }
 0x39c   : > { %v2035_v16 = vpop.f32.mrf.mxu0  ;;  %2481 = vmatpush.bf16.msra.mxu1 %v4357_v10 }
 0x39d   : > { %v2036_v7 = vadd.f32 %v5584_v52, %v2035_v16  ;;  %v2116_v30 = vmax.f32 %v2092_v13, %v2108_v28  ;;  %v4364_v13 = vld [vmem:[#allocation8 + $0xd8] sm:$0xff] }
 0x39e   : > { %2510 = vmatpush.bf16.msrb.mxu2 %v4365_v6 }
 0x39f   : > { %v2065_v14 = vadd.f32 %v2064_v49, %v2036_v7  ;;  %v4356_v7 = vld [vmem:[#allocation8 + $0x98] sm:$0xff] }
 0x3a0   : > { %2482 = vmatpush.bf16.msra.mxu1 %v4356_v7 }
 0x3a1   : > { %v2094_v27 = vadd.f32 %v2093_v22, %v2065_v14 }
 0x3a2   : > { %2511 = vmatpush.bf16.msrb.mxu2 %v4364_v13 }
 0x3a3   : > { %v2109_v31 = vmul.f32 0.01, %v2094_v27 }
 0x3a4   : > { %v2038_v8 = vpop.f32.mrf.mxu0 }
 0x3a5   : > { %v2039_v47 = vadd.f32 %v5584_v52, %v2038_v8  ;;  %v2117_v19 = vmax.f32 %v2094_v27, %v2109_v31  ;;  %v2074_v31 = vpop.f32.mrf.mxu1 }
 0x3a7   : > { %v2123_v61 = vpack.c.bf16 %v2117_v19, %v2116_v30  ;;  %v2068_v51 = vadd.f32 %v2067_v12, %v2039_v47  ;;  %v4363_v12 = vld [vmem:[#allocation8 + $0xd0] sm:$0xff]  ;;  %v2103_v47 = vpop.f32.mrf.mxu2 }
 0x3a8   : > { %2512 = vmatpush.bf16.msrb.mxu2 %v4363_v12 }
 0x3a9   : > { %2243 = vmatmul.bf16.gmra.mxu3 %v2123_v61  ;;  %2272 = vmatmul.bf16.gmra.mxu0 %v2123_v61  ;;  %v2097_v59 = vadd.f32 %v2096_v25, %v2068_v51 }
 0x3ab   : > { %v2110_v62 = vmul.f32 0.01, %v2097_v59 }
 0x3ac   : > { %v2040_v53 = vpop.f32.mrf.mxu0  ;;  %2513 = vmatpush.bf16.msrb.mxu2 %v4362_v54 }
 0x3ad   : > { %v2041_v36 = vadd.f32 %v5584_v52, %v2040_v53  ;;  %v2118_v60 = vmax.f32 %v2097_v59, %v2110_v62  ;;  %v2144_v53 = vld [vmem:[#allocation14 + $0x2] sm:$0x3] }
 0x3ae   : > { %v5594_v59 = vperm.slane %v2144_v53, 1  ;;  %v5597_v23 = vperm.slane %v2144_v53, 0 }
 0x3af   : > { %v2070_v57 = vadd.f32 %v2069_v18, %v2041_v36  ;;  %v4355_v18 = vld [vmem:[#allocation8 + $0x90] sm:$0xff] }
 0x3b0   : > { %2483 = vmatpush.bf16.msra.mxu1 %v4355_v18 }
 0x3b1   : > { %v2099_v15 = vadd.f32 %v2098_v17, %v2070_v57  ;;  %v4361_v17 = vld [vmem:[#allocation8 + $0xc0] sm:$0xff] }
 0x3b2   : > { %2514 = vmatpush.bf16.msrb.mxu2 %v4361_v17 }
 0x3b3   : > { %v2111_v63 = vmul.f32 0.01, %v2099_v15 }
 0x3b4   : > { %v2043_v44 = vpop.f32.mrf.mxu0  ;;  %2484 = vmatpush.bf16.msra.mxu1 %v4354_v50 }
 0x3b5   : > { %v2044_v49 = vadd.f32 %v5584_v52, %v2043_v44  ;;  %v2119_v22 = vmax.f32 %v2099_v15, %v2111_v63 }
 0x3b7   : > { %v2124_v16 = vpack.c.bf16 %v2119_v22, %v2118_v60  ;;  %v2073_v14 = vadd.f32 %v2072_v21, %v2044_v49 }
 0x3b9   : > { %2248 = vmatmul.bf16.gmra.mxu3 %v2124_v16  ;;  %2277 = vmatmul.bf16.gmra.mxu0 %v2124_v16  ;;  %v2102_v28 = vadd.f32 %v2101_v11, %v2073_v14 }
 0x3bb   : > { %v2112_v19 = vmul.f32 0.01, %v2102_v28 }
 0x3bc   : > { %v2045_v27 = vpop.f32.mrf.mxu0 }
 0x3bd   : > { %v2046_v25 = vadd.f32 %v5584_v52, %v2045_v27  ;;  %v2120_v51 = vmax.f32 %v2102_v28, %v2112_v19  ;;  %v4353_v52 = vld [vmem:[#allocation8 + $0x80] sm:$0xff] }
 0x3be   : > { %2485 = vmatpush.bf16.msra.mxu1 %v4353_v52 }
 0x3bf   : > { %v2075_v8 = vadd.f32 %v2074_v31, %v2046_v25 }
 0x3c1   : > { %v2104_v30 = vadd.f32 %v2103_v47, %v2075_v8 }
 0x3c3   : > { %v2113_v61 = vmul.f32 0.01, %v2104_v30 }
 0x3c5   : > { %v2121_v20 = vmax.f32 %v2104_v30, %v2113_v61 }
 0x3c7   : > { %v2125_v29 = vpack.c.bf16 %v2121_v20, %v2120_v51 }
 0x3c9   : > { %2253 = vmatmul.bf16.gmra.mxu3 %v2125_v29  ;;  %2282 = vmatmul.bf16.gmra.mxu0 %v2125_v29 }
 0x416   : > { %v2268_v36 = vpop.f32.mrf.mxu0 }
 0x417   : > { %v2269_v57 = vadd.f32 %v2268_v36, %v5594_v59 }
 0x419   : > { %v2289_v15 = vmul.f32 0.01, %v2269_v57 }
 0x41b   : > { %v2305_v10 = vmax.f32 %v2269_v57, %v2289_v15 }
 0x41c   : > { %v2239_v48 = vpop.f32.mrf.mxu3 }
 0x41d   : > { %v2240_v63 = vadd.f32 %v2239_v48, %v5597_v23  ;;  %v5602_v22 = vadd.f32 %v2305_v10, %v5405_v34 }
 0x41e   : > { %v2270_v62 = vpop.f32.mrf.mxu0 }
 0x41f   : > { %v2271_v6 = vadd.f32 %v2270_v62, %v5594_v59  ;;  %v2288_v44 = vmul.f32 0.01, %v2240_v63 }
 0x421   : > { %v2291_v21 = vmul.f32 0.01, %v2271_v6  ;;  %v2304_v7 = vmax.f32 %v2240_v63, %v2288_v44 }
 0x423   : > { %v2307_v49 = vmax.f32 %v2271_v6, %v2291_v21  ;;  %v5612_v25 = vadd.f32 %v2304_v7, %v5402_v3  ;;  %v4384_v21 = vld [vmem:[#allocation11 + $0x1f8] sm:$0xff] }
 0x424   : > { %v2241_v60 = vpop.f32.mrf.mxu3  ;;  %2923 = vmatpush.bf16.msra.mxu0 %v4384_v21  ;;  %v4390_v21 = vld [vmem:[#allocation11 + $0x228] sm:$0xff] }
 0x425   : > { %v5605_v11 = vadd.f32 %v2307_v49, %v5411_v4  ;;  %v2242_v16 = vadd.f32 %v2241_v60, %v5597_v23 }
 0x426   : > { %v2273_v13 = vpop.f32.mrf.mxu0 }
 0x427   : > { %v2337_v14 = vpack.c.bf16 %v5605_v11, %v5602_v22  ;;  %v2290_v12 = vmul.f32 0.01, %v2242_v16  ;;  %v2274_v28 = vadd.f32 %v2273_v13, %v5594_v59 }
 0x429   : > { %v2306_v27 = vmax.f32 %v2242_v16, %v2290_v12  ;;  %2515 = vmatmul.bf16.vlgmr.msrb.gmra.mxu2 %v2337_v14  ;;  %v2293_v8 = vmul.f32 0.01, %v2274_v28 }
 0x42b   : > { %v5615_v34 = vadd.f32 %v2306_v27, %v5408_v46  ;;  %v2309_v61 = vmax.f32 %v2274_v28, %v2293_v8 }
 0x42c   : > { %v2244_v4 = vpop.f32.mrf.mxu3 }
 0x42d   : > { %v2336_v31 = vpack.c.bf16 %v5615_v34, %v5612_v25  ;;  %v2245_v30 = vadd.f32 %v2244_v4, %v5597_v23  ;;  %v5622_v18 = vadd.f32 %v2309_v61, %v5428_v26 }
 0x42e   : > { %v2275_v47 = vpop.f32.mrf.mxu0 }
 0x42f   : > { %v2276_v19 = vadd.f32 %v2275_v47, %v5594_v59  ;;  %2486 = vmatmul.bf16.vlgmr.msra.gmra.mxu1 %v2336_v31  ;;  %v2292_v20 = vmul.f32 0.01, %v2245_v30 }
 0x431   : > { %v2295_v51 = vmul.f32 0.01, %v2276_v19  ;;  %v2308_v17 = vmax.f32 %v2245_v30, %v2292_v20 }
 0x433   : > { %v2311_v29 = vmax.f32 %v2276_v19, %v2295_v51  ;;  %v5632_v48 = vadd.f32 %v2308_v17, %v5422_v33  ;;  %v4383_v33 = vld [vmem:[#allocation11 + $0x1f0] sm:$0xff] }
 0x434   : > { %v2246_v3 = vpop.f32.mrf.mxu3  ;;  %2924 = vmatpush.bf16.msra.mxu0 %v4383_v33  ;;  %v4375_v33 = vld [vmem:[#allocation11 + $0x1b0] sm:$0xff] }
 0x435   : > { %v5625_v46 = vadd.f32 %v2311_v29, %v5431_v38  ;;  %v2247_v54 = vadd.f32 %v2246_v3, %v5597_v23 }
 0x436   : > { %v2278_v50 = vpop.f32.mrf.mxu0 }
 0x437   : > { %v2294_v52 = vmul.f32 0.01, %v2247_v54  ;;  %v2339_v53 = vpack.c.bf16 %v5625_v46, %v5622_v18  ;;  %v2279_v57 = vadd.f32 %v2278_v50, %v5594_v59 }
 0x439   : > { %v2310_v36 = vmax.f32 %v2247_v54, %v2294_v52  ;;  %2520 = vmatmul.bf16.gmra.mxu2 %v2339_v53  ;;  %v2297_v15 = vmul.f32 0.01, %v2279_v57 }
 0x43b   : > { %v5635_v26 = vadd.f32 %v2310_v36, %v5425_v35  ;;  %v2313_v44 = vmax.f32 %v2279_v57, %v2297_v15 }
 0x43c   : > { %v2249_v38 = vpop.f32.mrf.mxu3 }
 0x43d   : > { %v2338_v62 = vpack.c.bf16 %v5635_v26, %v5632_v48  ;;  %v2250_v6 = vadd.f32 %v2249_v38, %v5597_v23  ;;  %v5642_v13 = vadd.f32 %v2313_v44, %v5448_v2  ;;  %v4389_v44 = vld [vmem:[#allocation11 + $0x220] sm:$0xff] }
 0x43e   : > { %v2280_v63 = vpop.f32.mrf.mxu0 }
 0x43f   : > { %v2281_v10 = vadd.f32 %v2280_v63, %v5594_v59  ;;  %2491 = vmatmul.bf16.gmra.mxu1 %v2338_v62  ;;  %v2296_v60 = vmul.f32 0.01, %v2250_v6  ;;  %v4392_v62 = vld [vmem:[#allocation11 + $0x238] sm:$0xff] }
 0x440   : > { %2952 = vmatpush.bf16.msrb.mxu1 %v4392_v62  ;;  %v4380_v63 = vld [vmem:[#allocation11 + $0x1d8] sm:$0xff] }
 0x441   : > { %v2299_v49 = vmul.f32 0.01, %v2281_v10  ;;  %v2312_v27 = vmax.f32 %v2250_v6, %v2296_v60  ;;  %v4391_v6 = vld [vmem:[#allocation11 + $0x230] sm:$0xff]  ;;  %v4377_v60 = vld [vmem:[#allocation11 + $0x1c0] sm:$0xff] }
 0x443   : > { %v2315_v16 = vmax.f32 %v2281_v10, %v2299_v49  ;;  %v5652_v47 = vadd.f32 %v2312_v27, %v5442_v0  ;;  %v4376_v10 = vld [vmem:[#allocation11 + $0x1b8] sm:$0xff]  ;;  %v4374_v27 = vld [vmem:[#allocation11 + $0x1a8] sm:$0xff] }
 0x444   : > { %v2251_v35 = vpop.f32.mrf.mxu3  ;;  %2953 = vmatpush.bf16.msrb.mxu1 %v4391_v6  ;;  %2894 = vmatpush.bf16.msrb.mxu3 %v4376_v10  ;;  %v5678_v49 = vld [vmem:[#allocation9 + $0x2] ss:$0 sm:$0xff] }
 0x445   : > { %v5645_v7 = vadd.f32 %v2315_v16, %v5451_v5  ;;  %v2252_v14 = vadd.f32 %v2251_v35, %v5597_v23  ;;  %v4388_v16 = vld [vmem:[#allocation11 + $0x218] sm:$0xff] }
 0x446   : > { %v2283_v12 = vpop.f32.mrf.mxu0 }
 0x447   : > { %v2298_v28 = vmul.f32 0.01, %v2252_v14  ;;  %v2341_v4 = vpack.c.bf16 %v5645_v7, %v5642_v13  ;;  %v2284_v8 = vadd.f32 %v2283_v12, %v5594_v59 }
 0x448   : > { %2954 = vmatpush.bf16.msrb.mxu1 %v4390_v21  ;;  %2895 = vmatpush.bf16.msrb.mxu3 %v4375_v33 }
 0x449   : > { %v2314_v31 = vmax.f32 %v2252_v14, %v2298_v28  ;;  %2525 = vmatmul.bf16.gmra.mxu2 %v2341_v4  ;;  %v2301_v30 = vmul.f32 0.01, %v2284_v8  ;;  %v4387_v28 = vld [vmem:[#allocation11 + $0x210] sm:$0xff] }
 0x44b   : > { %v5655_v2 = vadd.f32 %v2314_v31, %v5445_v1  ;;  %v2317_v29 = vmax.f32 %v2284_v8, %v2301_v30  ;;  %v4386_v31 = vld [vmem:[#allocation11 + $0x208] sm:$0xff] }
 0x44c   : > { %v2254_v5 = vpop.f32.mrf.mxu3  ;;  %2955 = vmatpush.bf16.msrb.mxu1 %v4389_v44  ;;  %2896 = vmatpush.bf16.msrb.mxu3 %v4374_v27 }
 0x44d   : > { %v2340_v19 = vpack.c.bf16 %v5655_v2, %v5652_v47  ;;  %v2255_v51 = vadd.f32 %v2254_v5, %v5597_v23  ;;  %v5662_v17 = vadd.f32 %v2317_v29, %v5468_v40 }
 0x44e   : > { %v2285_v61 = vpop.f32.mrf.mxu0 }
 0x44f   : > { %v2286_v20 = vadd.f32 %v2285_v61, %v5594_v59  ;;  %2496 = vmatmul.bf16.gmra.mxu1 %v2340_v19  ;;  %v2300_v54 = vmul.f32 0.01, %v2255_v51  ;;  %v4373_v61 = vld [vmem:[#allocation11 + $0x1a0] sm:$0xff] }
 0x450   : > { %2956 = vmatpush.bf16.msrb.mxu1 %v4388_v16  ;;  %2897 = vmatpush.bf16.msrb.mxu3 %v4373_v61 }
 0x451   : > { %v2303_v3 = vmul.f32 0.01, %v2286_v20  ;;  %v2316_v53 = vmax.f32 %v2255_v51, %v2300_v54  ;;  %v4385_v51 = vld [vmem:[#allocation11 + $0x200] sm:$0xff] }
 0x453   : > { %v2319_v50 = vmax.f32 %v2286_v20, %v2303_v3  ;;  %v5671_v38 = vadd.f32 %v2316_v53, %v5462_v32  ;;  %v4379_v32 = vld [vmem:[#allocation11 + $0x1d0] sm:$0xff] }
 0x454   : > { %v2256_v0 = vpop.f32.mrf.mxu3  ;;  %2957 = vmatpush.bf16.msrb.mxu1 %v4387_v28 }
 0x455   : > { %v5665_v1 = vadd.f32 %v2319_v50, %v5471_v41  ;;  %v2257_v52 = vadd.f32 %v2256_v0, %v5597_v23  ;;  %v4382_v41 = vld [vmem:[#allocation11 + $0x1e8] sm:$0xff]  ;;  %v4381_v23 = vld [vmem:[#allocation11 + $0x1e0] sm:$0xff] }
 0x456   : > { %2925 = vmatpush.bf16.msra.mxu0 %v4382_v41 }
 0x457   : > { %v2302_v36 = vmul.f32 0.01, %v2257_v52  ;;  %v2343_v57 = vpack.c.bf16 %v5665_v1, %v5662_v17 }
 0x458   : > { %2958 = vmatpush.bf16.msrb.mxu1 %v4386_v31 }
 0x459   : > { %v2318_v59 = vmax.f32 %v2257_v52, %v2302_v36  ;;  %2530 = vmatmul.bf16.gmra.mxu2 %v2343_v57  ;;  %v4372_v57 = vld [vmem:[#allocation11 + $0x198] sm:$0xff] }
 0x45a   : > { %2926 = vmatpush.bf16.msra.mxu0 %v4381_v23  ;;  %2898 = vmatpush.bf16.msrb.mxu3 %v4372_v57  ;;  %v4370_v57 = vld [vmem:[#allocation11 + $0x188] sm:$0xff] }
 0x45b   : > { %v5674_v15 = vadd.f32 %v2318_v59, %v5465_v39  ;;  %v4378_v39 = vld [vmem:[#allocation11 + $0x1c8] sm:$0xff] }
 0x45c   : > { %2959 = vmatpush.bf16.msrb.mxu1 %v4385_v51 }
 0x45d   : > { %v2342_v40 = vpack.c.bf16 %v5674_v15, %v5671_v38 }
 0x45e   : > { %2927 = vmatpush.bf16.msra.mxu0 %v4380_v63 }
 0x45f   : > { %2501 = vmatmul.bf16.gmra.mxu1 %v2342_v40 }
 0x462   : > { %2928 = vmatpush.bf16.msra.mxu0 %v4379_v32 }
 0x466   : > { %2929 = vmatpush.bf16.msra.mxu0 %v4378_v39 }
 0x46a   : > { %2930 = vmatpush.bf16.msra.mxu0 %v4377_v60  ;;  %v4371_v60 = vld [vmem:[#allocation11 + $0x190] sm:$0xff] }
 0x46b   : > { %2899 = vmatpush.bf16.msrb.mxu3 %v4371_v60 }
 0x46f   : > { %2900 = vmatpush.bf16.msrb.mxu3 %v4370_v57 }
 0x4ac   : > { %v2487_v35 = vpop.f32.mrf.mxu1  ;;  %v2516_v14 = vpop.f32.mrf.mxu2 }
 0x4ad   : > { %v2488_v12 = vadd.f32 %v5678_v49, %v2487_v35 }
 0x4af   : > { %v2517_v4 = vadd.f32 %v2516_v14, %v2488_v12 }
 0x4b1   : > { %v2536_v8 = vmul.f32 0.01, %v2517_v4 }
 0x4b3   : > { %v5682_v20 = vmax.f32 %v2517_v4, %v2536_v8 }
 0x4b4   : > { %v2489_v5 = vpop.f32.mrf.mxu1  ;;  %v2518_v30 = vpop.f32.mrf.mxu2 }
 0x4b5   : > { %v2490_v19 = vadd.f32 %v5678_v49, %v2489_v5  ;;  %v2552_v54 = vpack.c.bf16 %v5682_v20, %v5682_v20  ;;  %v2592_v6 = vrot.slane %v5682_v20, 1 }
 0x4b7   : > { %v2519_v29 = vadd.f32 %v2518_v30, %v2490_v19  ;;  %v2656_v59 = vunpack.c.l.b16 %v2552_v54 }
 0x4b9   : > { %v2537_v3 = vmul.f32 0.01, %v2519_v29 }
 0x4bb   : > { %v5686_v50 = vmax.f32 %v2519_v29, %v2537_v3 }
 0x4bc   : > { %v2492_v0 = vpop.f32.mrf.mxu1  ;;  %v2521_v52 = vpop.f32.mrf.mxu2 }
 0x4bd   : > { %v2553_v53 = vpack.c.bf16 %v5686_v50, %v5686_v50  ;;  %v2493_v36 = vadd.f32 %v5678_v49, %v2492_v0  ;;  %v2593_v62 = vrot.slane %v5686_v50, 1 }
 0x4bf   : > { %v2657_v40 = vunpack.c.l.b16 %v2553_v53  ;;  %v2522_v41 = vadd.f32 %v2521_v52, %v2493_v36  ;;  %v2606_v32 = vsel %vm838_vm0, %v2592_v6, %v2593_v62 }
 0x4c0   : > { %v2616_v16 = vpack.c.bf16 %v2606_v32, %v2606_v32 }
 0x4c1   : > { %v2664_v23 = vpack.c.b16 %v2657_v40, %v2656_v59  ;;  %v2538_v63 = vmul.f32 0.01, %v2522_v41 }
 0x4c2   : > { %v2680_v4 = vunpack.c.l.b16 %v2616_v16 }
 0x4c3   : > { %v5693_v10 = vmax.f32 %v2522_v41, %v2538_v63  ;;  %2931 = vmatmul.bf16.vlgmr.msra.gmra.mxu0 %v2664_v23  ;;  %v4369_v63 = vld [vmem:[#allocation11 + $0x180] sm:$0xff] }
 0x4c4   : > { %v2494_v21 = vpop.f32.mrf.mxu1  ;;  %v2523_v39 = vpop.f32.mrf.mxu2  ;;  %2901 = vmatpush.bf16.msrb.mxu3 %v4369_v63 }
 0x4c5   : > { %v2594_v44 = vrot.slane %v5693_v10, 1  ;;  %v2495_v33 = vadd.f32 %v5678_v49, %v2494_v21  ;;  %v2554_v19 = vpack.c.bf16 %v5693_v10, %v5693_v10 }
 0x4c7   : > { %v2605_v35 = vsel %vm838_vm0, %v2593_v62, %v2594_v44  ;;  %v2524_v14 = vadd.f32 %v2523_v39, %v2495_v33  ;;  %v2658_v54 = vunpack.c.l.b16 %v2554_v19 }
 0x4c8   : > { %v2609_v12 = vsel %vm5241_vm1, %v2605_v35, 0.0 }
 0x4c9   : > { %v2617_v27 = vpack.c.bf16 %v2609_v12, %v2609_v12  ;;  %v2539_v28 = vmul.f32 0.01, %v2524_v14 }
 0x4cb   : > { %v2681_v31 = vunpack.c.l.b16 %v2617_v27  ;;  %v5705_v8 = vmax.f32 %v2524_v14, %v2539_v28 }
 0x4cc   : > { %v2497_v5 = vpop.f32.mrf.mxu1  ;;  %v2526_v30 = vpop.f32.mrf.mxu2 }
 0x4cd   : > { %v2498_v61 = vadd.f32 %v5678_v49, %v2497_v5  ;;  %v2688_v51 = vpack.c.b16 %v2681_v31, %v2680_v4  ;;  %v2555_v29 = vpack.c.bf16 %v5705_v8, %v5705_v8  ;;  %v2595_v9 = vrot.slane %v5705_v8, 1 }
 0x4cf   : > { %v2527_v3 = vadd.f32 %v2526_v30, %v2498_v61  ;;  %2960 = vmatmul.bf16.vlgmr.msrb.gmra.mxu1 %v2688_v51  ;;  %v2659_v0 = vunpack.c.l.b16 %v2555_v29  ;;  %v2604_v41 = vsel %vm838_vm0, %v2594_v44, %v2595_v9 }
 0x4d0   : > { %v2618_v39 = vpack.c.bf16 %v2604_v41, %v2604_v41 }
 0x4d1   : > { %v2540_v52 = vmul.f32 0.01, %v2527_v3  ;;  %v2665_v53 = vpack.c.b16 %v2659_v0, %v2658_v54 }
 0x4d2   : > { %v2682_v44 = vunpack.c.l.b16 %v2618_v39 }
 0x4d3   : > { %v5713_v36 = vmax.f32 %v2527_v3, %v2540_v52  ;;  %2936 = vmatmul.bf16.gmra.mxu0 %v2665_v53  ;;  %v2561_v53 = vrot.slane %v5686_v50, 7 }
 0x4d4   : > { %v2499_v59 = vpop.f32.mrf.mxu1  ;;  %v2528_v40 = vpop.f32.mrf.mxu2 }
 0x4d5   : > { %v2596_v62 = vrot.slane %v5713_v36, 1  ;;  %v2500_v23 = vadd.f32 %v5678_v49, %v2499_v59  ;;  %v2556_v28 = vpack.c.bf16 %v5713_v36, %v5713_v36 }
 0x4d7   : > { %v2529_v32 = vadd.f32 %v2528_v40, %v2500_v23  ;;  %v2603_v21 = vsel %vm838_vm0, %v2595_v9, %v2596_v62  ;;  %v2660_v19 = vunpack.c.l.b16 %v2556_v28  ;;  %v2560_v23 = vrot.slane %v5682_v20, 7 }
 0x4d8   : > { %v2611_v33 = vsel %vm5285_vm4, %v2603_v21, 0.0 }
 0x4d9   : > { %v2541_v60 = vmul.f32 0.01, %v2529_v32  ;;  %v2619_v16 = vpack.c.bf16 %v2611_v33, %v2611_v33 }
 0x4db   : > { %v5723_v35 = vmax.f32 %v2529_v32, %v2541_v60  ;;  %v2683_v14 = vunpack.c.l.b16 %v2619_v16 }
 0x4dc   : > { %v2502_v12 = vpop.f32.mrf.mxu1  ;;  %v2531_v27 = vpop.f32.mrf.mxu2 }
 0x4dd   : > { %v2503_v4 = vadd.f32 %v5678_v49, %v2502_v12  ;;  %v2689_v31 = vpack.c.b16 %v2683_v14, %v2682_v44  ;;  %v2557_v5 = vpack.c.bf16 %v5723_v35, %v5723_v35  ;;  %v2597_v30 = vrot.slane %v5723_v35, 1 }
 0x4df   : > { %v2532_v55 = vadd.f32 %v2531_v27, %v2503_v4  ;;  %2965 = vmatmul.bf16.gmra.mxu1 %v2689_v31  ;;  %v2661_v61 = vunpack.c.l.b16 %v2557_v5  ;;  %v2602_v54 = vsel %vm838_vm0, %v2596_v62, %v2597_v30  ;;  %v2574_v62 = vsel %vm789_vm2, %v2560_v23, %v2561_v53 }
 0x4e0   : > { %v2620_v41 = vpack.c.bf16 %v2602_v54, %v2602_v54  ;;  %v2585_v12 = vpack.c.bf16 %v2574_v62, %v2574_v62 }
 0x4e1   : > { %v2542_v51 = vmul.f32 0.01, %v2532_v55  ;;  %v2666_v29 = vpack.c.b16 %v2661_v61, %v2660_v19 }
 0x4e2   : > { %v2633_v61 = vunpack.c.l.b16 %v2585_v12 }
 0x4e3   : > { %v5731_v3 = vmax.f32 %v2532_v55, %v2542_v51  ;;  %2941 = vmatmul.bf16.gmra.mxu0 %v2666_v29  ;;  %v2562_v29 = vrot.slane %v5693_v10, 7 }
 0x4e4   : > { %v2504_v9 = vpop.f32.mrf.mxu1  ;;  %v2533_v57 = vpop.f32.mrf.mxu2 }
 0x4e5   : > { %v2598_v0 = vrot.slane %v5731_v3, 1  ;;  %v2505_v52 = vadd.f32 %v5678_v49, %v2504_v9  ;;  %v2684_v49 = vunpack.c.l.b16 %v2620_v41  ;;  %v2558_v50 = vpack.c.bf16 %v5731_v3, %v5731_v3 }
 0x4e7   : > { %v2534_v59 = vadd.f32 %v2533_v57, %v2505_v52  ;;  %v2601_v40 = vsel %vm838_vm0, %v2597_v30, %v2598_v0  ;;  %v2662_v27 = vunpack.c.l.b16 %v2558_v50  ;;  %v2573_v57 = vsel %vm789_vm2, %v2561_v53, %v2562_v29 }
 0x4e8   : > { %v2613_v63 = vsel %vm5322_vm6, %v2601_v40, 0.0  ;;  %v2566_v50 = vrot.slane %v5731_v3, 7 }
 0x4e9   : > { %v2543_v32 = vmul.f32 0.01, %v2534_v59  ;;  %v2621_v21 = vpack.c.bf16 %v2613_v63, %v2613_v63 }
 0x4eb   : > { %v2551_v39 = vmax.f32 %v2534_v59, %v2543_v32  ;;  %v2685_v33 = vunpack.c.l.b16 %v2621_v21  ;;  %v2565_v32 = vrot.slane %v5723_v35, 7 }
 0x4ed   : > { %v2567_v60 = vrot.slane %v2551_v39, 7  ;;  %v2599_v16 = vrot.slane %v2551_v39, 1  ;;  %v2690_v44 = vpack.c.b16 %v2685_v33, %v2684_v49  ;;  %v2559_v14 = vpack.c.bf16 %v2551_v39, %v2551_v39 }
 0x4ee   : > { %v2569_v35 = vsel %vm789_vm2, %v2565_v32, %v2566_v50 }
 0x4ef   : > { %v2575_v42 = vsel %vm789_vm2, %v2567_v60, %v2560_v23  ;;  %2970 = vmatmul.bf16.gmra.mxu1 %v2690_v44  ;;  %v2663_v28 = vunpack.c.l.b16 %v2559_v14  ;;  %v2607_v4 = vsel %vm838_vm0, %v2599_v16, %v2592_v6  ;;  %v2600_v30 = vsel %vm838_vm0, %v2598_v0, %v2599_v16 }
 0x4f0   : > { %v2576_v31 = vsel %vm5272_vm3, %v2575_v42, 0.0  ;;  %v2615_v19 = vsel %vm5352_vm8, %v2607_v4, 0.0  ;;  %v2622_v9 = vpack.c.bf16 %v2600_v30, %v2600_v30  ;;  %v2563_v6 = vrot.slane %v5705_v8, 7  ;;  %v4408_v4 = vld [vmem:[#allocation12 + $0x174] sm:$0xf0] }
 0x4f1   : > { %v2584_v5 = vpack.c.bf16 %v2576_v31, %v2576_v31  ;;  %v2667_v55 = vpack.c.b16 %v2663_v28, %v2662_v27  ;;  %v2623_v54 = vpack.c.bf16 %v2615_v19, %v2615_v19  ;;  %v2578_v0 = vsel %vm5305_vm5, %v2573_v57, 0.0  ;;  %v4203_v28 = vld [vmem:[#allocation12 + $0x170] sm:$0xf]  ;;  %v4195_v31 = vld [vmem:[#allocation12 + $0x160] sm:$0xf] }
 0x4f2   : > { %v2686_v45 = vunpack.c.l.b16 %v2622_v9  ;;  %v2572_v37 = vsel %vm789_vm2, %v2562_v29, %v2563_v6  ;;  %v2586_v10 = vpack.c.bf16 %v2578_v0, %v2578_v0  ;;  %v2564_v8 = vrot.slane %v5713_v36, 7  ;;  %v4187_v30 = vld [vmem:[#allocation12 + $0x150] sm:$0xf]  ;;  %v4402_v19 = vld [vmem:[#allocation12 + $0x144] sm:$0xf0] }
 0x4f3   : > { %v2632_v51 = vunpack.c.l.b16 %v2584_v5  ;;  %2946 = vmatmul.bf16.gmra.mxu0 %v2667_v55  ;;  %v2687_v52 = vunpack.c.l.b16 %v2623_v54  ;;  %v2587_v40 = vpack.c.bf16 %v2572_v37, %v2572_v37  ;;  %v2568_v16 = vsel %vm789_vm2, %v2566_v50, %v2567_v60  ;;  %v4406_v5 = vld [vmem:[#allocation12 + $0x164] sm:$0xf0]  ;;  %v4400_v29 = vld [vmem:[#allocation12 + $0x134] sm:$0xf0]  ;;  %v4407_v9 = vld [vmem:[#allocation12 + $0x174] sm:$0xf] }
 0x4f4   : > { %v2634_v23 = vunpack.c.l.b16 %v2586_v10  ;;  %v2571_v53 = vsel %vm789_vm2, %v2563_v6, %v2564_v8  ;;  %v2570_v21 = vsel %vm789_vm2, %v2564_v8, %v2565_v32  ;;  %v2582_v44 = vsel %vm5368_vm9, %v2569_v35, 0.0  ;;  %v4205_v54 = vld [vmem:[#allocation12 + $0x178] sm:$0xf0]  ;;  %v4163_v57 = vld [vmem:[#allocation12 + $0x120] sm:$0xf] }
 0x4f5   : > { %v2640_v20 = vpack.c.b16 %v2633_v61, %v2632_v51  ;;  %v2691_v59 = vpack.c.b16 %v2687_v52, %v2686_v45  ;;  %v2635_v41 = vunpack.c.l.b16 %v2587_v40  ;;  %v2580_v24 = vsel %vm5335_vm7, %v2571_v53, 0.0  ;;  %v4171_v51 = vld [vmem:[#allocation12 + $0x130] sm:$0xf]  ;;  %v4405_v45 = vld [vmem:[#allocation12 + $0x164] sm:$0xf] }
 0x4f6   : > { %v2589_v62 = vpack.c.bf16 %v2570_v21, %v2570_v21  ;;  %v2588_v39 = vpack.c.bf16 %v2580_v24, %v2580_v24  ;;  %v2591_v14 = vpack.c.bf16 %v2568_v16, %v2568_v16  ;;  %v2590_v43 = vpack.c.bf16 %v2582_v44, %v2582_v44  ;;  %v4197_v52 = vld [vmem:[#allocation12 + $0x168] sm:$0xf0]  ;;  %v4398_v0 = vld [vmem:[#allocation12 + $0x124] sm:$0xf0]  ;;  %v4403_v40 = vld [vmem:[#allocation12 + $0x154] sm:$0xf] }
 0x4f7   : > { %2902 = vmatmul.bf16.vlgmr.msrb.gmra.mxu3 %v2640_v20  ;;  %v2641_v63 = vpack.c.b16 %v2635_v41, %v2634_v23  ;;  %v4204_v3 = vor.u32 %v4408_v4, %v4203_v28  ;;  %v4196_v55 = vor.u32 %v4406_v5, %v4195_v31  ;;  %v4188_v60 = vor.u32 %v4404_v56, %v4187_v30  ;;  %v4189_v10 = vld [vmem:[#allocation12 + $0x158] sm:$0xf0]  ;;  %v4401_v23 = vld [vmem:[#allocation12 + $0x144] sm:$0xf]  ;;  %v4181_v8 = vld [vmem:[#allocation12 + $0x148] sm:$0xf0] }
 0x4f8   : > { %v2637_v49 = vunpack.c.l.b16 %v2589_v62  ;;  %v2636_v33 = vunpack.c.l.b16 %v2588_v39  ;;  %v2639_v12 = vunpack.c.l.b16 %v2591_v14  ;;  %v2638_v42 = vunpack.c.l.b16 %v2590_v43  ;;  %v4396_v53 = vld [vmem:[#allocation12 + $0x114] sm:$0xf0]  ;;  %v4399_v21 = vld [vmem:[#allocation12 + $0x134] sm:$0xf]  ;;  %v4173_v24 = vld [vmem:[#allocation12 + $0x138] sm:$0xf0] }
 0x4f9   : > { %3105 = vmatpush.bf16.msra.mxu2 %v4204_v3  ;;  %v4180_v61 = vor.u32 %v4402_v19, %v4179_v58  ;;  %v4172_v20 = vor.u32 %v4400_v29, %v4171_v51  ;;  %v4208_v6 = vor.u32 %v4407_v9, %v4205_v54  ;;  %v4200_v37 = vor.u32 %v4405_v45, %v4197_v52  ;;  %v4147_v50 = vld [vmem:[#allocation12 + $0x100] sm:$0xf]  ;;  %v4394_v16 = vld [vmem:[#allocation12 + $0x104] sm:$0xf0]  ;;  %v4395_v44 = vld [vmem:[#allocation12 + $0x114] sm:$0xf] }
 0x4fa   : > { %v2642_v36 = vpack.c.b16 %v2637_v49, %v2636_v33  ;;  %v2643_v27 = vpack.c.b16 %v2639_v12, %v2638_v42  ;;  %v4192_v41 = vor.u32 %v4403_v40, %v4189_v10  ;;  %v4184_v32 = vor.u32 %v4401_v23, %v4181_v8  ;;  %v4397_v49 = vld [vmem:[#allocation12 + $0x124] sm:$0xf]  ;;  %v4165_v33 = vld [vmem:[#allocation12 + $0x128] sm:$0xf0]  ;;  %v4157_v14 = vld [vmem:[#allocation12 + $0x118] sm:$0xf0] }
 0x4fb   : > { %3134 = vmatpush.bf16.msra.mxu3 %v4208_v6  ;;  %v4176_v39 = vor.u32 %v4399_v21, %v4173_v24  ;;  %v4168_v35 = vor.u32 %v4397_v49, %v4165_v33  ;;  %v4148_v43 = vor.u32 %v4394_v16, %v4147_v50  ;;  %v4160_v42 = vor.u32 %v4395_v44, %v4157_v14  ;;  %v4149_v28 = vld [vmem:[#allocation12 + $0x108] sm:$0xf0]  ;;  %v5785_v3 = vld [vmem:[%s5903_s5 + $0x2] ss:$0 sm:$0xff]  ;;  %v4415_v44 = vld [vmem:[#allocation15 + $0x30] sm:$0xff] }
 0x4fd   : > { %3106 = vmatpush.bf16.msra.mxu2 %v4196_v55 }
 0x4ff   : > { %2975 = vmatmul.bf16.gmra.mxu1 %v2691_v59  ;;  %v4164_v59 = vor.u32 %v4398_v0, %v4163_v57  ;;  %3135 = vmatpush.bf16.msra.mxu3 %v4200_v37 }
 0x501   : > { %3107 = vmatpush.bf16.msra.mxu2 %v4188_v60 }
 0x503   : > { %3136 = vmatpush.bf16.msra.mxu3 %v4192_v41 }
 0x505   : > { %3108 = vmatpush.bf16.msra.mxu2 %v4180_v61 }
 0x507   : > { %2907 = vmatmul.bf16.gmra.mxu3 %v2641_v63  ;;  %v4155_v63 = vld [vmem:[#allocation12 + $0x110] sm:$0xf] }
 0x508   : > { %v4156_v62 = vor.u32 %v4396_v53, %v4155_v63  ;;  %3137 = vmatpush.bf16.msra.mxu3 %v4184_v32 }
 0x509   : > { %3109 = vmatpush.bf16.msra.mxu2 %v4172_v20 }
 0x50c   : > { %3138 = vmatpush.bf16.msra.mxu3 %v4176_v39 }
 0x50d   : > { %3110 = vmatpush.bf16.msra.mxu2 %v4164_v59 }
 0x510   : > { %3139 = vmatpush.bf16.msra.mxu3 %v4168_v35  ;;  %v4416_v35 = vld [vmem:[#allocation15 + $0x38] sm:$0xff] }
 0x511   : > { %3111 = vmatpush.bf16.msra.mxu2 %v4156_v62  ;;  %3283 = vmatpush.bf16.msrb.mxu0 %v4416_v35 }
 0x514   : > { %3140 = vmatpush.bf16.msra.mxu3 %v4160_v42 }
 0x515   : > { %3112 = vmatpush.bf16.msra.mxu2 %v4148_v43  ;;  %3284 = vmatpush.bf16.msrb.mxu0 %v4415_v44 }
 0x517   : > { %2912 = vmatmul.bf16.gmra.mxu3 %v2642_v36 }
 0x519   : > { %4427 = vmatpush.bf16.msrb.mxu2 %v4416_v35 }
 0x51d   : > { %4428 = vmatpush.bf16.msrb.mxu2 %v4415_v44 }
 0x527   : > { %2917 = vmatmul.bf16.gmra.mxu3 %v2643_v27  ;;  %v4393_v27 = vld [vmem:[#allocation12 + $0x104] sm:$0xf] }
 0x528   : > { %v4152_v4 = vor.u32 %v4393_v27, %v4149_v28  ;;  %v4414_v28 = vld [vmem:[#allocation15 + $0x28] sm:$0xff] }
 0x529   : > { %3285 = vmatpush.bf16.msrb.mxu0 %v4414_v28  ;;  %4429 = vmatpush.bf16.msrb.mxu2 %v4414_v28 }
 0x52a   : > { %3141 = vmatpush.bf16.msra.mxu3 %v4152_v4 }
 0x540   : > { %v2932_v36 = vpop.f32.mrf.mxu0 }
 0x548   : > { %v2934_v31 = vpop.f32.mrf.mxu0 }
 0x54c   : > { %v2961_v12 = vpop.f32.mrf.mxu1 }
 0x550   : > { %v2937_v60 = vpop.f32.mrf.mxu0 }
 0x554   : > { %v2963_v5 = vpop.f32.mrf.mxu1 }
 0x558   : > { %v2939_v37 = vpop.f32.mrf.mxu0 }
 0x55c   : > { %v2966_v51 = vpop.f32.mrf.mxu1 }
 0x560   : > { %v2942_v63 = vpop.f32.mrf.mxu0 }
 0x564   : > { %v2968_v59 = vpop.f32.mrf.mxu1 }
 0x568   : > { %v2944_v16 = vpop.f32.mrf.mxu0 }
 0x56c   : > { %v2971_v21 = vpop.f32.mrf.mxu1 }
 0x574   : > { %v2973_v14 = vpop.f32.mrf.mxu1 }
 0x57a   : > { %v2903_v55 = vpop.f32.mrf.mxu3 }
 0x57b   : > { %v2904_v30 = vadd.f32 %v5785_v3, %v2903_v55  ;;  %v2947_v55 = vpop.f32.mrf.mxu0 }
 0x57d   : > { %v2933_v56 = vadd.f32 %v2932_v36, %v2904_v30 }
 0x57f   : > { %v2962_v19 = vadd.f32 %v2961_v12, %v2933_v56 }
 0x581   : > { %v2981_v20 = vmul.f32 0.01, %v2962_v19 }
 0x582   : > { %v2905_v58 = vpop.f32.mrf.mxu3 }
 0x583   : > { %v2906_v61 = vadd.f32 %v5785_v3, %v2905_v58  ;;  %v2989_v45 = vmax.f32 %v2962_v19, %v2981_v20  ;;  %v2976_v19 = vpop.f32.mrf.mxu1 }
 0x585   : > { %v2935_v29 = vadd.f32 %v2934_v31, %v2906_v61 }
 0x587   : > { %v2964_v9 = vadd.f32 %v2963_v5, %v2935_v29 }
 0x589   : > { %v2982_v54 = vmul.f32 0.01, %v2964_v9 }
 0x58a   : > { %v2908_v6 = vpop.f32.mrf.mxu3 }
 0x58b   : > { %v2990_v52 = vmax.f32 %v2964_v9, %v2982_v54  ;;  %v2909_v57 = vadd.f32 %v5785_v3, %v2908_v6  ;;  %v2949_v54 = vpop.f32.mrf.mxu0 }
 0x58d   : > { %v2997_v0 = vpack.c.bf16 %v2990_v52, %v2989_v45  ;;  %v2938_v40 = vadd.f32 %v2937_v60, %v2909_v57  ;;  %v2978_v45 = vpop.f32.mrf.mxu1 }
 0x58f   : > { %3113 = vmatmul.bf16.vlgmr.msra.gmra.mxu2 %v2997_v0  ;;  %3142 = vmatmul.bf16.vlgmr.msra.gmra.mxu3 %v2997_v0  ;;  %v2967_v41 = vadd.f32 %v2966_v51, %v2938_v40 }
 0x591   : > { %v2983_v32 = vmul.f32 0.01, %v2967_v41 }
 0x592   : > { %v2910_v10 = vpop.f32.mrf.mxu3 }
 0x593   : > { %v2911_v23 = vadd.f32 %v5785_v3, %v2910_v10  ;;  %v2991_v49 = vmax.f32 %v2967_v41, %v2983_v32  ;;  %v4413_v10 = vld [vmem:[#allocation15 + $0x20] sm:$0xff]  ;;  %v4412_v41 = vld [vmem:[#allocation15 + $0x18] sm:$0xff] }
 0x594   : > { %3286 = vmatpush.bf16.msrb.mxu0 %v4413_v10  ;;  %4430 = vmatpush.bf16.msrb.mxu2 %v4413_v10 }
 0x595   : > { %v2940_v8 = vadd.f32 %v2939_v37, %v2911_v23  ;;  %v4411_v23 = vld [vmem:[#allocation15 + $0x10] sm:$0xff] }
 0x597   : > { %v2969_v53 = vadd.f32 %v2968_v59, %v2940_v8  ;;  %v4409_v8 = vld [vmem:[#allocation15] sm:$0xff] }
 0x598   : > { %3287 = vmatpush.bf16.msrb.mxu0 %v4412_v41  ;;  %4431 = vmatpush.bf16.msrb.mxu2 %v4412_v41 }
 0x599   : > { %v2984_v24 = vmul.f32 0.01, %v2969_v53 }
 0x59a   : > { %v2913_v62 = vpop.f32.mrf.mxu3 }
 0x59b   : > { %v2914_v39 = vadd.f32 %v5785_v3, %v2913_v62  ;;  %v2992_v33 = vmax.f32 %v2969_v53, %v2984_v24 }
 0x59c   : > { %3288 = vmatpush.bf16.msrb.mxu0 %v4411_v23  ;;  %4432 = vmatpush.bf16.msrb.mxu2 %v4411_v23 }
 0x59d   : > { %v2998_v50 = vpack.c.bf16 %v2992_v33, %v2991_v49  ;;  %v2943_v36 = vadd.f32 %v2942_v63, %v2914_v39  ;;  %v3019_v63 = vld [vmem:[#allocation14 + $0x4] sm:$0x3] }
 0x59e   : > { %v3021_v32 = vperm.slane %v3019_v63, 0  ;;  %v5809_v23 = vperm.slane %v3019_v63, 1 }
 0x59f   : > { %3118 = vmatmul.bf16.gmra.mxu2 %v2998_v50  ;;  %3147 = vmatmul.bf16.gmra.mxu3 %v2998_v50  ;;  %v2972_v12 = vadd.f32 %v2971_v21, %v2943_v36 }
 0x5a1   : > { %v2985_v4 = vmul.f32 0.01, %v2972_v12 }
 0x5a2   : > { %v2915_v43 = vpop.f32.mrf.mxu3 }
 0x5a3   : > { %v2916_v42 = vadd.f32 %v5785_v3, %v2915_v43  ;;  %v2993_v60 = vmax.f32 %v2972_v12, %v2985_v4 }
 0x5a5   : > { %v2945_v27 = vadd.f32 %v2944_v16, %v2916_v42 }
 0x5a7   : > { %v2974_v31 = vadd.f32 %v2973_v14, %v2945_v27 }
 0x5a9   : > { %v2986_v5 = vmul.f32 0.01, %v2974_v31 }
 0x5aa   : > { %v2918_v30 = vpop.f32.mrf.mxu3 }
 0x5ab   : > { %v2919_v56 = vadd.f32 %v5785_v3, %v2918_v30  ;;  %v2994_v58 = vmax.f32 %v2974_v31, %v2986_v5 }
 0x5ad   : > { %v2999_v61 = vpack.c.bf16 %v2994_v58, %v2993_v60  ;;  %v2948_v51 = vadd.f32 %v2947_v55, %v2919_v56 }
 0x5af   : > { %3123 = vmatmul.bf16.gmra.mxu2 %v2999_v61  ;;  %3152 = vmatmul.bf16.gmra.mxu3 %v2999_v61  ;;  %v2977_v20 = vadd.f32 %v2976_v19, %v2948_v51 }
 0x5b1   : > { %v2987_v52 = vmul.f32 0.01, %v2977_v20 }
 0x5b2   : > { %v2920_v29 = vpop.f32.mrf.mxu3 }
 0x5b3   : > { %v2921_v9 = vadd.f32 %v5785_v3, %v2920_v29  ;;  %v2995_v0 = vmax.f32 %v2977_v20, %v2987_v52  ;;  %v4410_v3 = vld [vmem:[#allocation15 + $0x8] sm:$0xff] }
 0x5b4   : > { %3289 = vmatpush.bf16.msrb.mxu0 %v4410_v3  ;;  %4433 = vmatpush.bf16.msrb.mxu2 %v4410_v3 }
 0x5b5   : > { %v2950_v6 = vadd.f32 %v2949_v54, %v2921_v9 }
 0x5b7   : > { %v2979_v57 = vadd.f32 %v2978_v45, %v2950_v6 }
 0x5b8   : > { %3290 = vmatpush.bf16.msrb.mxu0 %v4409_v8  ;;  %4434 = vmatpush.bf16.msrb.mxu2 %v4409_v8 }
 0x5b9   : > { %v2988_v37 = vmul.f32 0.01, %v2979_v57 }
 0x5bb   : > { %v2996_v59 = vmax.f32 %v2979_v57, %v2988_v37 }
 0x5bd   : > { %v3000_v40 = vpack.c.bf16 %v2996_v59, %v2995_v0 }
 0x5bf   : > { %3128 = vmatmul.bf16.gmra.mxu2 %v3000_v40  ;;  %3157 = vmatmul.bf16.gmra.mxu3 %v3000_v40 }
 0x612   : > { %v3114_v53 = vpop.f32.mrf.mxu2  ;;  %v3143_v40 = vpop.f32.mrf.mxu3 }
 0x613   : > { %v3115_v21 = vadd.f32 %v3114_v53, %v3021_v32 }
 0x615   : > { %v3163_v24 = vmul.f32 0.01, %v3115_v21 }
 0x617   : > { %v3179_v49 = vmax.f32 %v3115_v21, %v3163_v24 }
 0x619   : > { %v3195_v36 = vadd.f32 %v3179_v49, %v5612_v25 }
 0x61a   : > { %v3116_v62 = vpop.f32.mrf.mxu2  ;;  %v3145_v8 = vpop.f32.mrf.mxu3 }
 0x61b   : > { %v3117_v39 = vadd.f32 %v3116_v62, %v3021_v32 }
 0x61d   : > { %v3165_v33 = vmul.f32 0.01, %v3117_v39 }
 0x61f   : > { %v3181_v50 = vmax.f32 %v3117_v39, %v3165_v33 }
 0x621   : > { %v3197_v35 = vadd.f32 %v3181_v50, %v5615_v34  ;;  %v3146_v50 = vadd.f32 %v3145_v8, %v5809_v23 }
 0x622   : > { %v3119_v16 = vpop.f32.mrf.mxu2  ;;  %v3148_v49 = vpop.f32.mrf.mxu3 }
 0x623   : > { %v3211_v44 = vpack.c.bf16 %v3197_v35, %v3195_v36  ;;  %v3120_v14 = vadd.f32 %v3119_v16, %v3021_v32 }
 0x625   : > { %3291 = vmatmul.bf16.vlgmr.msrb.gmra.mxu0 %v3211_v44  ;;  %v3167_v43 = vmul.f32 0.01, %v3120_v14 }
 0x627   : > { %v3183_v27 = vmax.f32 %v3120_v14, %v3167_v43  ;;  %v3166_v14 = vmul.f32 0.01, %v3146_v50 }
 0x629   : > { %v3199_v31 = vadd.f32 %v3183_v27, %v5632_v48 }
 0x62a   : > { %v3121_v12 = vpop.f32.mrf.mxu2 }
 0x62b   : > { %v3122_v42 = vadd.f32 %v3121_v12, %v3021_v32 }
 0x62d   : > { %v3169_v28 = vmul.f32 0.01, %v3122_v42 }
 0x62f   : > { %v3185_v4 = vmax.f32 %v3122_v42, %v3169_v28  ;;  %v5816_v42 = vstv %s3352_s23  ;;  %s4869_s23 = scalar_lea.hbm %s5944_s26, 128 }
 0x630   : > { %p4871_p8 = scmp.lt.s32.totalorder %s4869_s23, %s4865_s29 }
 0x631   : > { %v3201_v5 = vadd.f32 %v3185_v4, %v5635_v26 }
 0x632   : > { %v3124_v55 = vpop.f32.mrf.mxu2  ;;  %p4872_p7 = por %p4871_p8, %p4870_p12 }
 0x633   : > { %v3212_v30 = vpack.c.bf16 %v3201_v5, %v3199_v31  ;;  %v3125_v56 = vadd.f32 %v3124_v55, %v3021_v32  ;;  %v3182_v31 = vmax.f32 %v3146_v50, %v3166_v14  ;;  %v3149_v5 = vadd.f32 %v3148_v49, %v5809_v23  ;;  %v4604_v14 = vld [vmem:[%s5164_s10 + $0x18] sm:$0xff] }
 0x634   : > { %p4873_p9 = pnand %p4872_p7, %p4868_p5 }
 0x635   : > { %3296 = vmatmul.bf16.gmra.mxu0 %v3212_v30  ;;  %v3171_v25 = vmul.f32 0.01, %v3125_v56 }
 0x637   : > { %v3187_v58 = vmax.f32 %v3125_v56, %v3171_v25  ;;  %v3150_v56 = vpop.f32.mrf.mxu3 }
 0x639   : > { %v3203_v51 = vadd.f32 %v3187_v58, %v5652_v47  ;;  %v5806_v47 = vld [vmem:[%s5907_s9] ss:$0 sm:$0xff]  ;;  %v3198_v58 = vadd.f32 %v3182_v31, %v5605_v11 }
 0x63a   : > { %v3126_v34 = vpop.f32.mrf.mxu2 }
 0x63b   : > { %v3127_v60 = vadd.f32 %v3126_v34, %v3021_v32 }
 0x63d   : > { %v3173_v19 = vmul.f32 0.01, %v3127_v60 }
 0x63f   : > { %v3189_v61 = vmax.f32 %v3127_v60, %v3173_v19  ;;  %v3168_v19 = vmul.f32 0.01, %v3149_v5 }
 0x641   : > { %v3205_v29 = vadd.f32 %v3189_v61, %v5655_v2 }
 0x642   : > { %v3129_v20 = vpop.f32.mrf.mxu2 }
 0x643   : > { %v3213_v9 = vpack.c.bf16 %v3205_v29, %v3203_v51  ;;  %v3130_v54 = vadd.f32 %v3129_v20, %v3021_v32 }
 0x645   : > { %3301 = vmatmul.bf16.gmra.mxu0 %v3213_v9  ;;  %v3175_v48 = vmul.f32 0.01, %v3130_v54 }
 0x647   : > { %v3191_v45 = vmax.f32 %v3130_v54, %v3175_v48  ;;  %v3184_v54 = vmax.f32 %v3149_v5, %v3168_v19  ;;  %v3151_v48 = vadd.f32 %v3150_v56, %v5809_v23 }
 0x649   : > { %v3207_v37 = vadd.f32 %v3191_v45, %v5671_v38 }
 0x64a   : > { %v3131_v26 = vpop.f32.mrf.mxu2 }
 0x64b   : > { %v3132_v6 = vadd.f32 %v3131_v26, %v3021_v32 }
 0x64d   : > { %v3177_v52 = vmul.f32 0.01, %v3132_v6 }
 0x64f   : > { %v3193_v57 = vmax.f32 %v3132_v6, %v3177_v52  ;;  %v4602_v6 = vld [vmem:[%s5164_s10 + $0x8] sm:$0xff] }
 0x651   : > { %v3209_v0 = vadd.f32 %v3193_v57, %v5674_v15  ;;  %v3144_v15 = vadd.f32 %v3143_v40, %v5809_v23  ;;  %v3153_v57 = vpop.f32.mrf.mxu3 }
 0x653   : > { %v3214_v59 = vpack.c.bf16 %v3209_v0, %v3207_v37  ;;  %v3164_v24 = vmul.f32 0.01, %v3144_v15  ;;  %v3200_v0 = vadd.f32 %v3184_v54, %v5622_v18 }
 0x655   : > { %3306 = vmatmul.bf16.vlgmr.msrb.gmra.mxu2 %v3214_v59  ;;  %v3180_v63 = vmax.f32 %v3144_v15, %v3164_v24  ;;  %v3170_v59 = vmul.f32 0.01, %v3151_v48 }
 0x657   : > { %v3196_v44 = vadd.f32 %v3180_v63, %v5602_v22  ;;  %v4601_v22 = vld [vmem:[%s5164_s10] sm:$0xff]  ;;  %v3186_v8 = vmax.f32 %v3151_v48, %v3170_v59 }
 0x659   : > { %v3155_v63 = vpop.f32.mrf.mxu3 }
 0x6a2   : > { %v3292_v2 = vpop.f32.mrf.mxu0 }
 0x6a3   : > { %v3293_v10 = vadd.f32 %v5806_v47, %v3292_v2 }
 0x6a5   : > { %v3312_v41 = vsub.f32 0.0, %v3293_v10 }
 0x6a7   : > { %v3320_v3 = vmul.f32 1.442695, %v3312_v41 }
 0x6a9   : > { %4569 = vpow2.f32 %v3320_v3 }
 0x6aa   : > { %v3294_v38 = vpop.f32.mrf.mxu0 }
 0x6ab   : > { %v3295_v32 = vadd.f32 %v5806_v47, %v3294_v38  ;;  %v3154_v38 = vadd.f32 %v3153_v57, %v5809_v23 }
 0x6ad   : > { %v3313_v53 = vsub.f32 0.0, %v3295_v32 }
 0x6af   : > { %v4570_v21 = vpop.eup %4569  ;;  %v3322_v62 = vmul.f32 1.442695, %v3313_v53  ;;  %v4603_v53 = vld [vmem:[%s5164_s10 + $0x10] sm:$0xff] }
 0x6b0   : > { %v3336_v39 = vadd.f32 1.0, %v4570_v21 }
 0x6b1   : > { %4571 = vpow2.f32 %v3322_v62  ;;  %v3202_v62 = vadd.f32 %v3186_v8, %v5625_v46  ;;  %v4607_v8 = vld [vmem:[%s5164_s10 + $0x30] sm:$0xff] }
 0x6b2   : > { %4573 = vrcp.f32 %v3336_v39  ;;  %v3297_v33 = vpop.f32.mrf.mxu0  ;;  %v3172_v39 = vmul.f32 0.01, %v3154_v38 }
 0x6b3   : > { %v3298_v36 = vadd.f32 %v5806_v47, %v3297_v33 }
 0x6b5   : > { %v3314_v35 = vsub.f32 0.0, %v3298_v36 }
 0x6b7   : > { %v4572_v16 = vpop.eup %4571  ;;  %v3324_v43 = vmul.f32 1.442695, %v3314_v35  ;;  %v3188_v35 = vmax.f32 %v3154_v38, %v3172_v39 }
 0x6b8   : > { %v4574_v12 = vpop.eup %4573  ;;  %v3337_v27 = vadd.f32 1.0, %v4572_v16  ;;  %v3156_v16 = vadd.f32 %v3155_v63, %v5809_v23 }
 0x6b9   : > { %v3353_v28 = vmul.f32 %v4574_v12, %v3196_v44  ;;  %4575 = vpow2.f32 %v3324_v43  ;;  %v3204_v46 = vadd.f32 %v3188_v35, %v5642_v13 }
 0x6ba   : > { %4577 = vrcp.f32 %v3337_v27  ;;  %v3299_v4 = vpop.f32.mrf.mxu0  ;;  %v3174_v27 = vmul.f32 0.01, %v3156_v16 }
 0x6bb   : > { %v3362_v55 = vmul.f32 %v5816_v42, %v3353_v28  ;;  %v3300_v30 = vadd.f32 %v5806_v47, %v3299_v4 }
 0x6bd   : > { %v3370_v25 = vadd.f32 %v4601_v22, %v3362_v55  ;;  %v3315_v34 = vsub.f32 0.0, %v3300_v30  ;;  %v3190_v30 = vmax.f32 %v3156_v16, %v3174_v27 }
 0x6bf   : > { %v4576_v60 = vpop.eup %4575  ;;  %3378 = vst [vmem:[%s5825_s17] sm:$0xff] %v3370_v25  ;;  %v3326_v61 = vmul.f32 1.442695, %v3315_v34  ;;  %v3158_v25 = vpop.f32.mrf.mxu3  ;;  %v4605_v34 = vld [vmem:[%s5164_s10 + $0x20] sm:$0xff]  ;;  %v3206_v13 = vadd.f32 %v3190_v30, %v5645_v7 }
 0x6c0   : > { %v4578_v51 = vpop.eup %4577  ;;  %v3338_v29 = vadd.f32 1.0, %v4576_v60 }
 0x6c1   : > { %v3354_v20 = vmul.f32 %v4578_v51, %v3198_v58  ;;  %4579 = vpow2.f32 %v3326_v61  ;;  %v3159_v51 = vadd.f32 %v3158_v25, %v5809_v23 }
 0x6c2   : > { %4581 = vrcp.f32 %v3338_v29  ;;  %v3302_v9 = vpop.f32.mrf.mxu0 }
 0x6c3   : > { %v3363_v26 = vmul.f32 %v5816_v42, %v3354_v20  ;;  %v3303_v11 = vadd.f32 %v5806_v47, %v3302_v9 }
 0x6c5   : > { %v3371_v45 = vadd.f32 %v4602_v6, %v3363_v26  ;;  %v3316_v52 = vsub.f32 0.0, %v3303_v11  ;;  %v3176_v26 = vmul.f32 0.01, %v3159_v51  ;;  %v4606_v11 = vld [vmem:[%s5164_s10 + $0x28] sm:$0xff] }
 0x6c7   : > { %v4580_v37 = vpop.eup %4579  ;;  %3379 = vst [vmem:[%s5825_s17 + $0x8] sm:$0xff] %v3371_v45  ;;  %v3328_v40 = vmul.f32 1.442695, %v3316_v52  ;;  %v3160_v52 = vpop.f32.mrf.mxu3  ;;  %v3192_v57 = vmax.f32 %v3159_v51, %v3176_v26 }
 0x6c8   : > { %v4582_v2 = vpop.eup %4581  ;;  %v3339_v10 = vadd.f32 1.0, %v4580_v37  ;;  %v3161_v37 = vadd.f32 %v3160_v52, %v5809_v23 }
 0x6c9   : > { %v3355_v41 = vmul.f32 %v4582_v2, %v3200_v0  ;;  %4583 = vpow2.f32 %v3328_v40  ;;  %v3208_v0 = vadd.f32 %v3192_v57, %v5662_v17 }
 0x6ca   : > { %4585 = vrcp.f32 %v3339_v10  ;;  %v3304_v3 = vpop.f32.mrf.mxu0  ;;  %v3178_v59 = vmul.f32 0.01, %v3161_v37 }
 0x6cb   : > { %v3364_v15 = vmul.f32 %v5816_v42, %v3355_v41  ;;  %v3305_v32 = vadd.f32 %v5806_v47, %v3304_v3 }
 0x6cc   : > { %v3194_v41 = vmax.f32 %v3161_v37, %v3178_v59 }
 0x6cd   : > { %v3372_v21 = vadd.f32 %v4603_v53, %v3364_v15  ;;  %v3317_v18 = vsub.f32 0.0, %v3305_v32  ;;  %v4608_v53 = vld [vmem:[%s5164_s10 + $0x38] sm:$0xff] }
 0x6ce   : > { %v3210_v17 = vadd.f32 %v3194_v41, %v5665_v1 }
 0x6cf   : > { %v4584_v24 = vpop.eup %4583  ;;  %3380 = vst [vmem:[%s5825_s17 + $0x10] sm:$0xff] %v3372_v21  ;;  %v3330_v49 = vmul.f32 1.442695, %v3317_v18 }
 0x6d0   : > { %v4586_v33 = vpop.eup %4585  ;;  %v3340_v50 = vadd.f32 1.0, %v4584_v24 }
 0x6d1   : > { %v3356_v36 = vmul.f32 %v4586_v33, %v3202_v62  ;;  %4587 = vpow2.f32 %v3330_v49 }
 0x6d2   : > { %4589 = vrcp.f32 %v3340_v50 }
 0x6d3   : > { %v3365_v44 = vmul.f32 %v5816_v42, %v3356_v36 }
 0x6d5   : > { %v3373_v43 = vadd.f32 %v4604_v14, %v3365_v44 }
 0x6d7   : > { %v4588_v12 = vpop.eup %4587  ;;  %3381 = vst [vmem:[%s5825_s17 + $0x18] sm:$0xff] %v3373_v43 }
 0x6d8   : > { %v4590_v28 = vpop.eup %4589  ;;  %v3341_v4 = vadd.f32 1.0, %v4588_v12  ;;  %v3307_v31 = vpop.f32.mrf.mxu2 }
 0x6d9   : > { %v3357_v5 = vmul.f32 %v4590_v28, %v3204_v46  ;;  %v3308_v55 = vadd.f32 %v5806_v47, %v3307_v31 }
 0x6da   : > { %4591 = vrcp.f32 %v3341_v4 }
 0x6db   : > { %v3366_v56 = vmul.f32 %v5816_v42, %v3357_v5  ;;  %v3318_v22 = vsub.f32 0.0, %v3308_v55 }
 0x6dd   : > { %v3374_v60 = vadd.f32 %v4605_v34, %v3366_v56  ;;  %v3332_v58 = vmul.f32 1.442695, %v3318_v22 }
 0x6df   : > { %3382 = vst [vmem:[%s5825_s17 + $0x20] sm:$0xff] %v3374_v60  ;;  %4593 = vpow2.f32 %v3332_v58 }
 0x6e0   : > { %v4592_v19 = vpop.eup %4591  ;;  %v3309_v61 = vpop.f32.mrf.mxu2 }
 0x6e1   : > { %v3358_v29 = vmul.f32 %v4592_v19, %v3206_v13  ;;  %v3310_v20 = vadd.f32 %v5806_v47, %v3309_v61 }
 0x6e3   : > { %v3367_v9 = vmul.f32 %v5816_v42, %v3358_v29  ;;  %v3319_v54 = vsub.f32 0.0, %v3310_v20 }
 0x6e5   : > { %v4594_v48 = vpop.eup %4593  ;;  %v3375_v6 = vadd.f32 %v4606_v11, %v3367_v9  ;;  %v3334_v45 = vmul.f32 1.442695, %v3319_v54 }
 0x6e6   : > { %v3342_v7 = vadd.f32 1.0, %v4594_v48 }
 0x6e7   : > { %3383 = vst [vmem:[%s5825_s17 + $0x28] sm:$0xff] %v3375_v6  ;;  %4595 = vpow2.f32 %v3334_v45 }
 0x6e8   : > { %4597 = vrcp.f32 %v3342_v7 }
 0x6ed   : > { %v4596_v47 = vpop.eup %4595 }
 0x6ee   : > { %v4598_v40 = vpop.eup %4597  ;;  %v3343_v2 = vadd.f32 1.0, %v4596_v47 }
 0x6ef   : > { %v3359_v10 = vmul.f32 %v4598_v40, %v3208_v0 }
 0x6f0   : > { %4599 = vrcp.f32 %v3343_v2 }
 0x6f1   : > { %v3368_v3 = vmul.f32 %v5816_v42, %v3359_v10 }
 0x6f3   : > { %v3376_v38 = vadd.f32 %v4607_v8, %v3368_v3 }
 0x6f5   : > { %3384 = vst [vmem:[%s5825_s17 + $0x30] sm:$0xff] %v3376_v38 }
 0x6f6   : > { %v4600_v23 = vpop.eup %4599 }
 0x6f7   : > { %v3360_v15 = vmul.f32 %v4600_v23, %v3210_v17 }
 0x6f9   : > { %v3369_v32 = vmul.f32 %v5816_v42, %v3360_v15 }
 0x6fb   : > { %v3377_v21 = vadd.f32 %v4608_v53, %v3369_v32 }
 0x6fd   : > { %3385 = vst [vmem:[%s5825_s17 + $0x38] sm:$0xff] %v3377_v21 }
 0x6fe   : > { %4876 = shalt.err (!%p4873_p9)
}
 0x6ff   : > { %s4948_s18 = smov 128   ;;  %s4949_s10 = smov 8  }
 0x700   : > { %4465 = dma.vmem_to_hbm [thread:$0]  (%p5124_p13), %s3401_s13, 1024, %s3403_s3, %s3387_s25, %s4948_s18, %s4948_s18, %s4949_s10  }
 0x701 PF: > { %s3417_s17 = sand.u32 1, %s4919_s19   ;;  %p5945_p10 = scmp.ge.s32.totalorder %s4931_s22, 2 }
 0x702   : > { %s3418_s28 = scalar_lea.sflag [#allocation5], %s3417_s17 }
 0x703   : > { %p4494_p11 = pnand %p5945_p10, %p5129_p4 }
 0x705   : > { %p4495_p0 = pneg %p4494_p11 }
 0x707   : > { %4914 = dma.done.wait (%p4495_p0), %s3418_s28, 1024  }
 0x708   : > { %4916 = vsyncadd (%p4495_p0), %s3418_s28, 4294966272  ;;  %p29_p2 = scmp.ge.s32.totalorder %s5104_s30, 4   ;;  %s5946_s19 = smov %s4923_s20 }
 0x709   : > { %s5947_s20 = smov %s4927_s21  ;;  %s5948_s21 = smov %s5116_s11 }
 0x70a   : > { %s5949_s22 = smov %s5104_s30  ;;  %31 = sbr.rel (!%p29_p2) target bundleno = 15 (0xf), region = 148 }
 0x70f   :  { %3424 = vsyncpa [#allocation4], 1 }
 0x710   :  { %3426 = vsyncpa [#allocation4 + $0x1], 1 }
 0x711   :  { %3427 = vsyncpa [#allocation7], 1 }
 0x712   :  { %3428 = vsyncpa [#allocation10], 1 }
 0x713   :  { %3429 = vsyncpa [#allocation13], 1 }
 0x714   :  { %3430 = vsyncpa [#allocation16], 1 }
 0x715   :  { %3431 = vsyncpa [#allocation5], 1 }
 0x716   :  { %3433 = vsyncpa [#allocation5 + $0x1], 1 }

</bundles_post_ra>
